<compile_context>
chip_gen: v6e
topology: v6e:2x2x1
jax: 0.10.0
libtpu: 0.0.40
codegen_flags: <defaults>
</compile_context>

<pallas_src>
import numpy as np
import jax
import jax.numpy as jnp
from jax import lax
from jax.experimental import pallas as pl
from jax.experimental.pallas import tpu as pltpu


def _round_up(x, m):
    return (x + m - 1) // m * m


def _lane(n):
    return _round_up(n, 128)


def _make_kernel(T, BB, F, H):
    BH = BB // 2                      # two interleaved, independent batch halves
    full_vreg_gates = (H % 128 != 0)  # H=32: keep full-vreg transcendentals (no lane shuffles)
    unroll = True if T <= 16 else 8   # bounded unroll for long sequences

    def kernel(x_ref, wie_ref, whe_ref, be_ref, wfd_ref, bfd_ref,
               wo_ref, bo_ref,
               enc_c_ref, out_last_ref, err_ref,
               xga_ref, xgb_ref, hda_ref, hdb_ref):
        # Parameters (tiny; stay resident). Weights may be bf16; accumulation is f32.
        Wie = wie_ref[...]            # (F, 4H)
        Whe = whe_ref[...]            # (H, 4H)
        Wfd = wfd_ref[...]            # (H, 4H) == W_out @ W_ih_dec + W_hh_dec
        Wo = wo_ref[...]              # (H, F)
        w_dt = Whe.dtype
        Be = be_ref[...].astype(jnp.float32)     # (1, 4H)
        Bo = bo_ref[...].astype(jnp.float32)     # (1, F)
        # Hoisted bias broadcast (JAX does not CSE broadcast_in_dim inside loops).
        Bfd = jnp.broadcast_to(bfd_ref[...], (BH, 4 * H)).astype(jnp.float32)

        def cell_from_gates(gates, c):
            if full_vreg_gates:
                # Sub-128 H: slicing before the transcendental would add XLU lane shuffles.
                sg = jax.nn.sigmoid(gates)            # (BH, 4H)
                th = jnp.tanh(gates)                  # (BH, 4H)
                i_g, f_g = sg[:, 0:H], sg[:, H:2 * H]
                g_g, o_g = th[:, 2 * H:3 * H], sg[:, 3 * H:4 * H]
            else:
                # Lane-aligned gates: only the needed transcendental per gate (~45% less EUP).
                i_g = jax.nn.sigmoid(gates[:, 0:H])
                f_g = jax.nn.sigmoid(gates[:, H:2 * H])
                g_g = jnp.tanh(gates[:, 2 * H:3 * H])
                o_g = jax.nn.sigmoid(gates[:, 3 * H:4 * H])
            c_new = f_g * c + i_g * g_g
            h_new = o_g * jnp.tanh(c_new)
            return h_new, c_new

        x_all = x_ref[...].astype(jnp.float32)                 # (T, BB, F)

        # ---- encoder input projection: one big GEMM, off the serial chain ----
        xg = jnp.dot(x_all.reshape(T * BB, F).astype(w_dt), Wie,
                     preferred_element_type=jnp.float32) + Be
        xg = xg.reshape(T, BB, 4 * H)
        xga_ref[...] = xg[:, :BH]
        xgb_ref[...] = xg[:, BH:]

        z = jnp.zeros((BH, H), jnp.float32)

        # ---- encoder recurrence: two independent halves interleaved per step ----
        def enc_step(t, carry):
            ha, ca, hb, cb = carry
            ga = xga_ref[t] + jnp.dot(ha.astype(w_dt), Whe,
                                      preferred_element_type=jnp.float32)
            gb = xgb_ref[t] + jnp.dot(hb.astype(w_dt), Whe,
                                      preferred_element_type=jnp.float32)
            ha, ca = cell_from_gates(ga, ca)
            hb, cb = cell_from_gates(gb, cb)
            return ha, ca, hb, cb

        ha, ca, hb, cb = lax.fori_loop(0, T, enc_step, (z, z, z, z), unroll=unroll)
        enc_c_ref[0:BH] = ca                                   # enc_hidden[1][-1]
        enc_c_ref[BH:BB] = cb

        # ---- decoder recurrence (i = T-1..0), eval mode, readout fused into Wfd/Bfd ----
        def dec_step(j, carry):
            ha, ca, hb, cb = carry
            i = T - 1 - j
            hda_ref[i] = ha                                    # hidden producing output[:, i, :]
            hdb_ref[i] = hb
            ga = jnp.dot(ha.astype(w_dt), Wfd, preferred_element_type=jnp.float32) + Bfd
            gb = jnp.dot(hb.astype(w_dt), Wfd, preferred_element_type=jnp.float32) + Bfd
            ha, ca = cell_from_gates(ga, ca)
            hb, cb = cell_from_gates(gb, cb)
            return ha, ca, hb, cb

        lax.fori_loop(0, T, dec_step, (ha, ca, hb, cb), unroll=unroll)

        # ---- batched hidden2output readout + in-VMEM reconstruction error ----
        ya = (jnp.dot(hda_ref[...].reshape(T * BH, H).astype(w_dt), Wo,
                      preferred_element_type=jnp.float32) + Bo).reshape(T, BH, F)
        yb = (jnp.dot(hdb_ref[...].reshape(T * BH, H).astype(w_dt), Wo,
                      preferred_element_type=jnp.float32) + Bo).reshape(T, BH, F)
        out_last_ref[0:BH] = ya[T - 1]                         # output[:, -1, :]
        out_last_ref[BH:BB] = yb[T - 1]
        xa, xb = x_all[:, :BH], x_all[:, BH:]
        err_a = jnp.sum(jnp.sum(jnp.abs(ya * ya - xa * xa), axis=0), axis=1, keepdims=True)
        err_b = jnp.sum(jnp.sum(jnp.abs(yb * yb - xb * xb), axis=0), axis=1, keepdims=True)
        err_ref[0:BH] = err_a
        err_ref[BH:BB] = err_b

    return kernel


def _plan_tiles(B, T, F, H):
    """Pick the batch tile BB and VMEM limit from a per-generation VMEM budget."""
    try:
        cap = int(pltpu.get_tpu_info().vmem_capacity_bytes)   # 128 MiB v5e/v6e, 64 MiB v7x
    except Exception:
        cap = 64 * 1024 * 1024                                # conservative fallback (v7x)
    B_pad0 = _round_up(max(B, 1), 16)       # multiple of 16 -> two sublane-aligned halves
    # Bytes that scale with BB: x block (double-buffered, lane-padded) + xg/hdec scratch.
    per_row = 4 * T * (2 * _lane(F) + _lane(4 * H) + _lane(H))
    budget = cap // 2
    bb_vmem = max(16, (budget // max(per_row, 1)) // 16 * 16)
    bb_target = _round_up(-(-B_pad0 // 2), 16)   # >= 2 grid steps when B allows (v7x megacore)
    BB = max(16, min(bb_target, bb_vmem, 512))
    B_pad = _round_up(B_pad0, BB)
    weights = 4 * (_lane(4 * H) * (F + 2 * H + 2) + _lane(F) * (H + 1))
    footprint = per_row * BB + weights
    vmem_limit = int(min(max(2 * footprint, 32 * 1024 * 1024),
                         (cap * 4) // 5, 100 * 1024 * 1024))
    return BB, B_pad, vmem_limit


def lstm_ae_forward(params, ts_batch, return_latent=True, matmul_dtype=jnp.float32):
    """Matches LSTMAE.forward in eval mode. ts_batch: (B, T, F) float."""
    B, T, F = ts_batch.shape
    H = params["w_hh_enc"].shape[0]

    # Fold decoder readout into the decoder recurrence (computed once, in f32):
    #   gates = (h @ Wo + Bo) @ Wid + h @ Whd + Bd = h @ W_fused + b_fused
    w_fused = jnp.dot(params["w_out"], params["w_ih_dec"]) + params["w_hh_dec"]   # (H, 4H)
    b_fused = jnp.dot(params["b_out"], params["w_ih_dec"]) + params["b_dec"]      # (1, 4H)

    BB, B_pad, vmem_limit = _plan_tiles(B, T, F, H)
    nb = B_pad // BB
    BH = BB // 2

    # Time-major + batch padding (two sublane-aligned halves per tile).
    x_tm = jnp.transpose(ts_batch.astype(jnp.float32), (1, 0, 2))   # (T, B, F)
    if B_pad != B:
        x_tm = jnp.pad(x_tm, ((0, 0), (0, B_pad - B), (0, 0)))

    md = matmul_dtype
    wie = params["w_ih_enc"].astype(md)
    whe = params["w_hh_enc"].astype(md)
    wfd = w_fused.astype(md)
    wo = params["w_out"].astype(md)

    kernel = _make_kernel(T, BB, F, H)
    # Constant weights: whole-array VMEM residency (not a pipelined/blocked input).
    whole = pl.BlockSpec(memory_space=pltpu.MemorySpace.VMEM)

    # Advisory cost estimate so XLA schedules surrounding ops around the long custom call.
    flops = int(2 * T * B_pad * 4 * H * (F + 2 * H) + 2 * T * B_pad * H * F
                + 12 * T * B_pad * H)
    transc = int(2 * T * B_pad * 9 * H)
    bytes_acc = int(4 * (T * B_pad * F + (F + 2 * H + 2) * 4 * H + H * F + F
                         + B_pad * (H + F + 1)))

    grid_spec = pltpu.PrefetchScalarGridSpec(
        num_scalar_prefetch=0,
        grid=(nb,),
        in_specs=[
            pl.BlockSpec((T, BB, F), lambda b: (0, b, 0)),    # x (time-major batch slab)
            whole, whole, whole,                              # W_ih_enc, W_hh_enc, b_enc
            whole, whole,                                     # W_fused, b_fused
            whole, whole,                                     # W_out, b_out
        ],
        out_specs=(
            pl.BlockSpec((BB, H), lambda b: (b, 0)),          # enc_hidden[1][-1]
            pl.BlockSpec((BB, F), lambda b: (b, 0)),          # output[:, -1, :]
            pl.BlockSpec((BB, 1), lambda b: (b, 0)),          # rec_err
        ),
        scratch_shapes=[
            pltpu.VMEM((T, BH, 4 * H), jnp.float32),          # encoder input proj (half A)
            pltpu.VMEM((T, BH, 4 * H), jnp.float32),          # encoder input proj (half B)
            pltpu.VMEM((T, BH, H), jnp.float32),              # decoder hidden states (half A)
            pltpu.VMEM((T, BH, H), jnp.float32),              # decoder hidden states (half B)
        ],
    )

    enc_c, out_last, rec_err = pl.pallas_call(
        kernel,
        out_shape=(
            jax.ShapeDtypeStruct((B_pad, H), jnp.float32),
            jax.ShapeDtypeStruct((B_pad, F), jnp.float32),
            jax.ShapeDtypeStruct((B_pad, 1), jnp.float32),
        ),
        grid_spec=grid_spec,
        compiler_params=pltpu.CompilerParams(
            dimension_semantics=("parallel",),                # batch tiles independent
            vmem_limit_bytes=vmem_limit,
        ),
        cost_estimate=pl.CostEstimate(
            flops=flops, transcendentals=transc, bytes_accessed=bytes_acc),
    )(x_tm, wie, whe, params["b_enc"], wfd, b_fused, wo, params["b_out"])

    enc_c = enc_c[:B]
    out_last = out_last[:B]
    rec_err = rec_err[:B, 0]
    others = {"output": out_last}
    return enc_c, rec_err, (others if return_latent else out_last)


def init_params(key, n_features, hidden_size):
    """Deterministic PyTorch-style uniform(-1/sqrt(H), 1/sqrt(H)) init."""
    H, F = hidden_size, n_features
    bound = 1.0 / np.sqrt(H)
    keys = jax.random.split(key, 12)
    u = lambda kk, shape: jax.random.uniform(kk, shape, jnp.float32, -bound, bound)
    return {
        "w_ih_enc": u(keys[0], (F, 4 * H)),
        "w_hh_enc": u(keys[1], (H, 4 * H)),
        "b_enc":    u(keys[2], (1, 4 * H)) + u(keys[3], (1, 4 * H)),  # b_ih + b_hh
        "w_ih_dec": u(keys[4], (F, 4 * H)),
        "w_hh_dec": u(keys[5], (H, 4 * H)),
        "b_dec":    u(keys[6], (1, 4 * H)) + u(keys[7], (1, 4 * H)),
        "w_out":    u(keys[8], (H, F)),
        "b_out":    u(keys[9], (1, F)),
    }


def reference_forward(params, ts_batch):
    """Pure-numpy reference replicating the PyTorch forward (eval mode, unfused)."""
    B, T, F = ts_batch.shape
    H = params["w_hh_enc"].shape[0]
    x = np.asarray(ts_batch, np.float32)

    def cell(xt, h, c, Wi, Wh, b):
        g = xt @ Wi + h @ Wh + b[0]
        i = 1.0 / (1.0 + np.exp(-g[:, :H]))
        f = 1.0 / (1.0 + np.exp(-g[:, H:2 * H]))
        gg = np.tanh(g[:, 2 * H:3 * H])
        o = 1.0 / (1.0 + np.exp(-g[:, 3 * H:]))
        c2 = f * c + i * gg
        return o * np.tanh(c2), c2

    p = {k: np.asarray(v) for k, v in params.items()}
    h = np.zeros((B, H), np.float32)
    c = np.zeros((B, H), np.float32)
    for t in range(T):
        h, c = cell(x[:, t], h, c, p["w_ih_enc"], p["w_hh_enc"], p["b_enc"])
    enc_c = c.copy()

    out = np.zeros((B, T, F), np.float32)
    hd, cd = h.copy(), c.copy()
    for i in reversed(range(T)):
        y = hd @ p["w_out"] + p["b_out"][0]
        out[:, i, :] = y
        hd, cd = cell(y, hd, cd, p["w_ih_dec"], p["w_hh_dec"], p["b_dec"])

    rec_err = np.sum(np.abs(out.reshape(B, -1) ** 2 - x.reshape(B, -1) ** 2), axis=1)
    return enc_c, rec_err, out[:, -1, :]


if __name__ == "__main__":
    B, T, F, H = 2, 8, 4, 32   # batch, seq_len, n_features, hidden_size

    key = jax.random.PRNGKey(0)
    k_x, k_p = jax.random.split(key)
    ts_batch = jax.random.normal(k_x, (B, T, F), jnp.float32)
    params = init_params(k_p, F, H)

    enc_c, rec_err, others = lstm_ae_forward(params, ts_batch)
    jax.block_until_ready((enc_c, rec_err, others["output"]))

    ref_c, ref_err, ref_out = reference_forward(params, ts_batch)
    np.testing.assert_allclose(np.asarray(enc_c), ref_c, rtol=1e-4, atol=1e-4)
    np.testing.assert_allclose(np.asarray(rec_err), ref_err, rtol=1e-4, atol=1e-4)
    np.testing.assert_allclose(np.asarray(others["output"]), ref_out, rtol=1e-4, atol=1e-4)

    print("KERNEL_OK")
</pallas_src>

<mosaic_0001>
module attributes {stable_mosaic.version = 11 : i64} {
  func.func @kernel(%arg0: i32, %arg1: memref<8x16x4xf32, #tpu.memory_space<vmem>>, %arg2: memref<4x128xf32, #tpu.memory_space<vmem>>, %arg3: memref<32x128xf32, #tpu.memory_space<vmem>>, %arg4: memref<1x128xf32, #tpu.memory_space<vmem>>, %arg5: memref<32x128xf32, #tpu.memory_space<vmem>>, %arg6: memref<1x128xf32, #tpu.memory_space<vmem>>, %arg7: memref<32x4xf32, #tpu.memory_space<vmem>>, %arg8: memref<1x4xf32, #tpu.memory_space<vmem>>, %arg9: memref<16x32xf32, #tpu.memory_space<vmem>>, %arg10: memref<16x4xf32, #tpu.memory_space<vmem>>, %arg11: memref<16x1xf32, #tpu.memory_space<vmem>>, %arg12: memref<8x8x128xf32, #tpu.memory_space<vmem>>, %arg13: memref<8x8x128xf32, #tpu.memory_space<vmem>>, %arg14: memref<8x8x32xf32, #tpu.memory_space<vmem>>, %arg15: memref<8x8x32xf32, #tpu.memory_space<vmem>>) attributes {dimension_semantics = [#tpu.dimension_semantics<parallel>], iteration_bounds = array<i64: 1>, scalar_prefetch = 0 : i64, scratch_operands = 4 : i64, tpu.core_type = #tpu.core_type<tc>, window_params = [{transform_indices = @transform_0, window_bounds = array<i64: 8, 16, 4>}, {pipeline_mode = #tpu.pipeline_mode<synchronous>, transform_indices = @transform_1, window_bounds = array<i64: 4, 128>}, {pipeline_mode = #tpu.pipeline_mode<synchronous>, transform_indices = @transform_2, window_bounds = array<i64: 32, 128>}, {pipeline_mode = #tpu.pipeline_mode<synchronous>, transform_indices = @transform_3, window_bounds = array<i64: 1, 128>}, {pipeline_mode = #tpu.pipeline_mode<synchronous>, transform_indices = @transform_4, window_bounds = array<i64: 32, 128>}, {pipeline_mode = #tpu.pipeline_mode<synchronous>, transform_indices = @transform_5, window_bounds = array<i64: 1, 128>}, {pipeline_mode = #tpu.pipeline_mode<synchronous>, transform_indices = @transform_6, window_bounds = array<i64: 32, 4>}, {pipeline_mode = #tpu.pipeline_mode<synchronous>, transform_indices = @transform_7, window_bounds = array<i64: 1, 4>}, {transform_indices = @transform_8, window_bounds = array<i64: 16, 32>}, {transform_indices = @transform_9, window_bounds = array<i64: 16, 4>}, {transform_indices = @transform_10, window_bounds = array<i64: 16, 1>}]} {
    %c0 = arith.constant 0 : index
    %c0_0 = arith.constant 0 : index
    %0 = vector.load %arg2[%c0, %c0_0] : memref<4x128xf32, #tpu.memory_space<vmem>>, vector<4x128xf32>
    %c0_1 = arith.constant 0 : index
    %c0_2 = arith.constant 0 : index
    %1 = vector.load %arg3[%c0_1, %c0_2] : memref<32x128xf32, #tpu.memory_space<vmem>>, vector<32x128xf32>
    %c0_3 = arith.constant 0 : index
    %c0_4 = arith.constant 0 : index
    %2 = vector.load %arg5[%c0_3, %c0_4] : memref<32x128xf32, #tpu.memory_space<vmem>>, vector<32x128xf32>
    %c0_5 = arith.constant 0 : index
    %c0_6 = arith.constant 0 : index
    %3 = vector.load %arg7[%c0_5, %c0_6] : memref<32x4xf32, #tpu.memory_space<vmem>>, vector<32x4xf32>
    %c0_7 = arith.constant 0 : index
    %c0_8 = arith.constant 0 : index
    %4 = vector.load %arg4[%c0_7, %c0_8] : memref<1x128xf32, #tpu.memory_space<vmem>>, vector<1x128xf32>
    %c0_9 = arith.constant 0 : index
    %c0_10 = arith.constant 0 : index
    %5 = vector.load %arg8[%c0_9, %c0_10] : memref<1x4xf32, #tpu.memory_space<vmem>>, vector<1x4xf32>
    %c0_11 = arith.constant 0 : index
    %c0_12 = arith.constant 0 : index
    %6 = vector.load %arg6[%c0_11, %c0_12] : memref<1x128xf32, #tpu.memory_space<vmem>>, vector<1x128xf32>
    %7 = vector.shape_cast %6 : vector<1x128xf32> to vector<1x128xf32>
    %8 = vector.broadcast %7 : vector<1x128xf32> to vector<8x128xf32>
    %c0_13 = arith.constant 0 : index
    %c0_14 = arith.constant 0 : index
    %c0_15 = arith.constant 0 : index
    %9 = vector.load %arg1[%c0_13, %c0_14, %c0_15] : memref<8x16x4xf32, #tpu.memory_space<vmem>>, vector<8x16x4xf32>
    %10 = vector.shape_cast %9 : vector<8x16x4xf32> to vector<128x4xf32>
    %cst = arith.constant dense<0.000000e+00> : vector<128x128xf32>
    %11 = tpu.matmul %10, %0, %cst {dimension_numbers = #tpu.dot_dimension_numbers<[1], [0], [0], [1], [0, 0, 1, 1], [], []>} : vector<128x4xf32>, vector<4x128xf32>, vector<128x128xf32> -> vector<128x128xf32>
    %12 = vector.broadcast %4 : vector<1x128xf32> to vector<128x128xf32>
    %13 = arith.addf %11, %12 : vector<128x128xf32>
    %14 = vector.shape_cast %13 : vector<128x128xf32> to vector<8x16x128xf32>
    %15 = vector.extract_strided_slice %14 {offsets = [0, 0, 0], sizes = [8, 8, 128], strides = [1, 1, 1]} : vector<8x16x128xf32> to vector<8x8x128xf32>
    %c0_16 = arith.constant 0 : index
    %c0_17 = arith.constant 0 : index
    %c0_18 = arith.constant 0 : index
    %16 = vector.load %arg12[%c0_16, %c0_17, %c0_18] : memref<8x8x128xf32, #tpu.memory_space<vmem>>, vector<8x8x128xf32>
    tpu.vector_store %arg12[%c0_16, %c0_17, %c0_18], %15 {strides = array<i32>} : memref<8x8x128xf32, #tpu.memory_space<vmem>>, vector<8x8x128xf32>,
    %17 = vector.extract_strided_slice %14 {offsets = [0, 8, 0], sizes = [8, 8, 128], strides = [1, 1, 1]} : vector<8x16x128xf32> to vector<8x8x128xf32>
    %c0_19 = arith.constant 0 : index
    %c0_20 = arith.constant 0 : index
    %c0_21 = arith.constant 0 : index
    %18 = vector.load %arg13[%c0_19, %c0_20, %c0_21] : memref<8x8x128xf32, #tpu.memory_space<vmem>>, vector<8x8x128xf32>
    tpu.vector_store %arg13[%c0_19, %c0_20, %c0_21], %17 {strides = array<i32>} : memref<8x8x128xf32, #tpu.memory_space<vmem>>, vector<8x8x128xf32>,
    %cst_22 = arith.constant 0.000000e+00 : f32
    %19 = vector.broadcast %cst_22 : f32 to vector<8x32xf32>
    %c0_i32 = arith.constant 0 : i32
    %20 = arith.index_cast %c0_i32 : i32 to index
    %c0_23 = arith.constant 0 : index
    %c0_24 = arith.constant 0 : index
    %21 = vector.load %arg12[%20, %c0_23, %c0_24] : memref<8x8x128xf32, #tpu.memory_space<vmem>>, vector<1x8x128xf32>
    %22 = vector.shape_cast %21 : vector<1x8x128xf32> to vector<8x128xf32>
    %cst_25 = arith.constant dense<0.000000e+00> : vector<8x128xf32>
    %23 = tpu.matmul %19, %1, %cst_25 {dimension_numbers = #tpu.dot_dimension_numbers<[1], [0], [0], [1], [0, 0, 1, 1], [], []>} : vector<8x32xf32>, vector<32x128xf32>, vector<8x128xf32> -> vector<8x128xf32>
    %24 = arith.addf %22, %23 : vector<8x128xf32>
    %25 = arith.index_cast %c0_i32 : i32 to index
    %c0_26 = arith.constant 0 : index
    %c0_27 = arith.constant 0 : index
    %26 = vector.load %arg13[%25, %c0_26, %c0_27] : memref<8x8x128xf32, #tpu.memory_space<vmem>>, vector<1x8x128xf32>
    %27 = vector.shape_cast %26 : vector<1x8x128xf32> to vector<8x128xf32>
    %cst_28 = arith.constant dense<0.000000e+00> : vector<8x128xf32>
    %28 = tpu.matmul %19, %1, %cst_28 {dimension_numbers = #tpu.dot_dimension_numbers<[1], [0], [0], [1], [0, 0, 1, 1], [], []>} : vector<8x32xf32>, vector<32x128xf32>, vector<8x128xf32> -> vector<8x128xf32>
    %29 = arith.addf %27, %28 : vector<8x128xf32>
    %30 = arith.negf %24 : vector<8x128xf32>
    %31 = math.exp %30 : vector<8x128xf32>
    %cst_29 = arith.constant 1.000000e+00 : f32
    %32 = vector.broadcast %cst_29 : f32 to vector<8x128xf32>
    %33 = arith.addf %32, %31 : vector<8x128xf32>
    %34 = arith.divf %32, %33 : vector<8x128xf32>
    %35 = math.tanh %24 : vector<8x128xf32>
    %36 = vector.extract_strided_slice %34 {offsets = [0, 0], sizes = [8, 32], strides = [1, 1]} : vector<8x128xf32> to vector<8x32xf32>
    %37 = vector.extract_strided_slice %34 {offsets = [0, 32], sizes = [8, 32], strides = [1, 1]} : vector<8x128xf32> to vector<8x32xf32>
    %38 = vector.extract_strided_slice %35 {offsets = [0, 64], sizes = [8, 32], strides = [1, 1]} : vector<8x128xf32> to vector<8x32xf32>
    %39 = vector.extract_strided_slice %34 {offsets = [0, 96], sizes = [8, 32], strides = [1, 1]} : vector<8x128xf32> to vector<8x32xf32>
    %40 = arith.mulf %37, %19 : vector<8x32xf32>
    %41 = arith.mulf %36, %38 : vector<8x32xf32>
    %42 = arith.addf %40, %41 : vector<8x32xf32>
    %43 = math.tanh %42 : vector<8x32xf32>
    %44 = arith.mulf %39, %43 : vector<8x32xf32>
    %45 = arith.negf %29 : vector<8x128xf32>
    %46 = math.exp %45 : vector<8x128xf32>
    %cst_30 = arith.constant 1.000000e+00 : f32
    %47 = vector.broadcast %cst_30 : f32 to vector<8x128xf32>
    %48 = arith.addf %47, %46 : vector<8x128xf32>
    %49 = arith.divf %47, %48 : vector<8x128xf32>
    %50 = math.tanh %29 : vector<8x128xf32>
    %51 = vector.extract_strided_slice %49 {offsets = [0, 0], sizes = [8, 32], strides = [1, 1]} : vector<8x128xf32> to vector<8x32xf32>
    %52 = vector.extract_strided_slice %49 {offsets = [0, 32], sizes = [8, 32], strides = [1, 1]} : vector<8x128xf32> to vector<8x32xf32>
    %53 = vector.extract_strided_slice %50 {offsets = [0, 64], sizes = [8, 32], strides = [1, 1]} : vector<8x128xf32> to vector<8x32xf32>
    %54 = vector.extract_strided_slice %49 {offsets = [0, 96], sizes = [8, 32], strides = [1, 1]} : vector<8x128xf32> to vector<8x32xf32>
    %55 = arith.mulf %52, %19 : vector<8x32xf32>
    %56 = arith.mulf %51, %53 : vector<8x32xf32>
    %57 = arith.addf %55, %56 : vector<8x32xf32>
    %58 = math.tanh %57 : vector<8x32xf32>
    %59 = arith.mulf %54, %58 : vector<8x32xf32>
    %c1_i32 = arith.constant 1 : i32
    %60 = arith.index_cast %c1_i32 : i32 to index
    %c0_31 = arith.constant 0 : index
    %c0_32 = arith.constant 0 : index
    %61 = vector.load %arg12[%60, %c0_31, %c0_32] : memref<8x8x128xf32, #tpu.memory_space<vmem>>, vector<1x8x128xf32>
    %62 = vector.shape_cast %61 : vector<1x8x128xf32> to vector<8x128xf32>
    %cst_33 = arith.constant dense<0.000000e+00> : vector<8x128xf32>
    %63 = tpu.matmul %44, %1, %cst_33 {dimension_numbers = #tpu.dot_dimension_numbers<[1], [0], [0], [1], [0, 0, 1, 1], [], []>} : vector<8x32xf32>, vector<32x128xf32>, vector<8x128xf32> -> vector<8x128xf32>
    %64 = arith.addf %62, %63 : vector<8x128xf32>
    %65 = arith.index_cast %c1_i32 : i32 to index
    %c0_34 = arith.constant 0 : index
    %c0_35 = arith.constant 0 : index
    %66 = vector.load %arg13[%65, %c0_34, %c0_35] : memref<8x8x128xf32, #tpu.memory_space<vmem>>, vector<1x8x128xf32>
    %67 = vector.shape_cast %66 : vector<1x8x128xf32> to vector<8x128xf32>
    %cst_36 = arith.constant dense<0.000000e+00> : vector<8x128xf32>
    %68 = tpu.matmul %59, %1, %cst_36 {dimension_numbers = #tpu.dot_dimension_numbers<[1], [0], [0], [1], [0, 0, 1, 1], [], []>} : vector<8x32xf32>, vector<32x128xf32>, vector<8x128xf32> -> vector<8x128xf32>
    %69 = arith.addf %67, %68 : vector<8x128xf32>
    %70 = arith.negf %64 : vector<8x128xf32>
    %71 = math.exp %70 : vector<8x128xf32>
    %cst_37 = arith.constant 1.000000e+00 : f32
    %72 = vector.broadcast %cst_37 : f32 to vector<8x128xf32>
    %73 = arith.addf %72, %71 : vector<8x128xf32>
    %74 = arith.divf %72, %73 : vector<8x128xf32>
    %75 = math.tanh %64 : vector<8x128xf32>
    %76 = vector.extract_strided_slice %74 {offsets = [0, 0], sizes = [8, 32], strides = [1, 1]} : vector<8x128xf32> to vector<8x32xf32>
    %77 = vector.extract_strided_slice %74 {offsets = [0, 32], sizes = [8, 32], strides = [1, 1]} : vector<8x128xf32> to vector<8x32xf32>
    %78 = vector.extract_strided_slice %75 {offsets = [0, 64], sizes = [8, 32], strides = [1, 1]} : vector<8x128xf32> to vector<8x32xf32>
    %79 = vector.extract_strided_slice %74 {offsets = [0, 96], sizes = [8, 32], strides = [1, 1]} : vector<8x128xf32> to vector<8x32xf32>
    %80 = arith.mulf %77, %42 : vector<8x32xf32>
    %81 = arith.mulf %76, %78 : vector<8x32xf32>
    %82 = arith.addf %80, %81 : vector<8x32xf32>
    %83 = math.tanh %82 : vector<8x32xf32>
    %84 = arith.mulf %79, %83 : vector<8x32xf32>
    %85 = arith.negf %69 : vector<8x128xf32>
    %86 = math.exp %85 : vector<8x128xf32>
    %cst_38 = arith.constant 1.000000e+00 : f32
    %87 = vector.broadcast %cst_38 : f32 to vector<8x128xf32>
    %88 = arith.addf %87, %86 : vector<8x128xf32>
    %89 = arith.divf %87, %88 : vector<8x128xf32>
    %90 = math.tanh %69 : vector<8x128xf32>
    %91 = vector.extract_strided_slice %89 {offsets = [0, 0], sizes = [8, 32], strides = [1, 1]} : vector<8x128xf32> to vector<8x32xf32>
    %92 = vector.extract_strided_slice %89 {offsets = [0, 32], sizes = [8, 32], strides = [1, 1]} : vector<8x128xf32> to vector<8x32xf32>
    %93 = vector.extract_strided_slice %90 {offsets = [0, 64], sizes = [8, 32], strides = [1, 1]} : vector<8x128xf32> to vector<8x32xf32>
    %94 = vector.extract_strided_slice %89 {offsets = [0, 96], sizes = [8, 32], strides = [1, 1]} : vector<8x128xf32> to vector<8x32xf32>
    %95 = arith.mulf %92, %57 : vector<8x32xf32>
    %96 = arith.mulf %91, %93 : vector<8x32xf32>
    %97 = arith.addf %95, %96 : vector<8x32xf32>
    %98 = math.tanh %97 : vector<8x32xf32>
    %99 = arith.mulf %94, %98 : vector<8x32xf32>
    %c2_i32 = arith.constant 2 : i32
    %100 = arith.index_cast %c2_i32 : i32 to index
    %c0_39 = arith.constant 0 : index
    %c0_40 = arith.constant 0 : index
    %101 = vector.load %arg12[%100, %c0_39, %c0_40] : memref<8x8x128xf32, #tpu.memory_space<vmem>>, vector<1x8x128xf32>
    %102 = vector.shape_cast %101 : vector<1x8x128xf32> to vector<8x128xf32>
    %cst_41 = arith.constant dense<0.000000e+00> : vector<8x128xf32>
    %103 = tpu.matmul %84, %1, %cst_41 {dimension_numbers = #tpu.dot_dimension_numbers<[1], [0], [0], [1], [0, 0, 1, 1], [], []>} : vector<8x32xf32>, vector<32x128xf32>, vector<8x128xf32> -> vector<8x128xf32>
    %104 = arith.addf %102, %103 : vector<8x128xf32>
    %105 = arith.index_cast %c2_i32 : i32 to index
    %c0_42 = arith.constant 0 : index
    %c0_43 = arith.constant 0 : index
    %106 = vector.load %arg13[%105, %c0_42, %c0_43] : memref<8x8x128xf32, #tpu.memory_space<vmem>>, vector<1x8x128xf32>
    %107 = vector.shape_cast %106 : vector<1x8x128xf32> to vector<8x128xf32>
    %cst_44 = arith.constant dense<0.000000e+00> : vector<8x128xf32>
    %108 = tpu.matmul %99, %1, %cst_44 {dimension_numbers = #tpu.dot_dimension_numbers<[1], [0], [0], [1], [0, 0, 1, 1], [], []>} : vector<8x32xf32>, vector<32x128xf32>, vector<8x128xf32> -> vector<8x128xf32>
    %109 = arith.addf %107, %108 : vector<8x128xf32>
    %110 = arith.negf %104 : vector<8x128xf32>
    %111 = math.exp %110 : vector<8x128xf32>
    %cst_45 = arith.constant 1.000000e+00 : f32
    %112 = vector.broadcast %cst_45 : f32 to vector<8x128xf32>
    %113 = arith.addf %112, %111 : vector<8x128xf32>
    %114 = arith.divf %112, %113 : vector<8x128xf32>
    %115 = math.tanh %104 : vector<8x128xf32>
    %116 = vector.extract_strided_slice %114 {offsets = [0, 0], sizes = [8, 32], strides = [1, 1]} : vector<8x128xf32> to vector<8x32xf32>
    %117 = vector.extract_strided_slice %114 {offsets = [0, 32], sizes = [8, 32], strides = [1, 1]} : vector<8x128xf32> to vector<8x32xf32>
    %118 = vector.extract_strided_slice %115 {offsets = [0, 64], sizes = [8, 32], strides = [1, 1]} : vector<8x128xf32> to vector<8x32xf32>
    %119 = vector.extract_strided_slice %114 {offsets = [0, 96], sizes = [8, 32], strides = [1, 1]} : vector<8x128xf32> to vector<8x32xf32>
    %120 = arith.mulf %117, %82 : vector<8x32xf32>
    %121 = arith.mulf %116, %118 : vector<8x32xf32>
    %122 = arith.addf %120, %121 : vector<8x32xf32>
    %123 = math.tanh %122 : vector<8x32xf32>
    %124 = arith.mulf %119, %123 : vector<8x32xf32>
    %125 = arith.negf %109 : vector<8x128xf32>
    %126 = math.exp %125 : vector<8x128xf32>
    %cst_46 = arith.constant 1.000000e+00 : f32
    %127 = vector.broadcast %cst_46 : f32 to vector<8x128xf32>
    %128 = arith.addf %127, %126 : vector<8x128xf32>
    %129 = arith.divf %127, %128 : vector<8x128xf32>
    %130 = math.tanh %109 : vector<8x128xf32>
    %131 = vector.extract_strided_slice %129 {offsets = [0, 0], sizes = [8, 32], strides = [1, 1]} : vector<8x128xf32> to vector<8x32xf32>
    %132 = vector.extract_strided_slice %129 {offsets = [0, 32], sizes = [8, 32], strides = [1, 1]} : vector<8x128xf32> to vector<8x32xf32>
    %133 = vector.extract_strided_slice %130 {offsets = [0, 64], sizes = [8, 32], strides = [1, 1]} : vector<8x128xf32> to vector<8x32xf32>
    %134 = vector.extract_strided_slice %129 {offsets = [0, 96], sizes = [8, 32], strides = [1, 1]} : vector<8x128xf32> to vector<8x32xf32>
    %135 = arith.mulf %132, %97 : vector<8x32xf32>
    %136 = arith.mulf %131, %133 : vector<8x32xf32>
    %137 = arith.addf %135, %136 : vector<8x32xf32>
    %138 = math.tanh %137 : vector<8x32xf32>
    %139 = arith.mulf %134, %138 : vector<8x32xf32>
    %c3_i32 = arith.constant 3 : i32
    %140 = arith.index_cast %c3_i32 : i32 to index
    %c0_47 = arith.constant 0 : index
    %c0_48 = arith.constant 0 : index
    %141 = vector.load %arg12[%140, %c0_47, %c0_48] : memref<8x8x128xf32, #tpu.memory_space<vmem>>, vector<1x8x128xf32>
    %142 = vector.shape_cast %141 : vector<1x8x128xf32> to vector<8x128xf32>
    %cst_49 = arith.constant dense<0.000000e+00> : vector<8x128xf32>
    %143 = tpu.matmul %124, %1, %cst_49 {dimension_numbers = #tpu.dot_dimension_numbers<[1], [0], [0], [1], [0, 0, 1, 1], [], []>} : vector<8x32xf32>, vector<32x128xf32>, vector<8x128xf32> -> vector<8x128xf32>
    %144 = arith.addf %142, %143 : vector<8x128xf32>
    %145 = arith.index_cast %c3_i32 : i32 to index
    %c0_50 = arith.constant 0 : index
    %c0_51 = arith.constant 0 : index
    %146 = vector.load %arg13[%145, %c0_50, %c0_51] : memref<8x8x128xf32, #tpu.memory_space<vmem>>, vector<1x8x128xf32>
    %147 = vector.shape_cast %146 : vector<1x8x128xf32> to vector<8x128xf32>
    %cst_52 = arith.constant dense<0.000000e+00> : vector<8x128xf32>
    %148 = tpu.matmul %139, %1, %cst_52 {dimension_numbers = #tpu.dot_dimension_numbers<[1], [0], [0], [1], [0, 0, 1, 1], [], []>} : vector<8x32xf32>, vector<32x128xf32>, vector<8x128xf32> -> vector<8x128xf32>
    %149 = arith.addf %147, %148 : vector<8x128xf32>
    %150 = arith.negf %144 : vector<8x128xf32>
    %151 = math.exp %150 : vector<8x128xf32>
    %cst_53 = arith.constant 1.000000e+00 : f32
    %152 = vector.broadcast %cst_53 : f32 to vector<8x128xf32>
    %153 = arith.addf %152, %151 : vector<8x128xf32>
    %154 = arith.divf %152, %153 : vector<8x128xf32>
    %155 = math.tanh %144 : vector<8x128xf32>
    %156 = vector.extract_strided_slice %154 {offsets = [0, 0], sizes = [8, 32], strides = [1, 1]} : vector<8x128xf32> to vector<8x32xf32>
    %157 = vector.extract_strided_slice %154 {offsets = [0, 32], sizes = [8, 32], strides = [1, 1]} : vector<8x128xf32> to vector<8x32xf32>
    %158 = vector.extract_strided_slice %155 {offsets = [0, 64], sizes = [8, 32], strides = [1, 1]} : vector<8x128xf32> to vector<8x32xf32>
    %159 = vector.extract_strided_slice %154 {offsets = [0, 96], sizes = [8, 32], strides = [1, 1]} : vector<8x128xf32> to vector<8x32xf32>
    %160 = arith.mulf %157, %122 : vector<8x32xf32>
    %161 = arith.mulf %156, %158 : vector<8x32xf32>
    %162 = arith.addf %160, %161 : vector<8x32xf32>
    %163 = math.tanh %162 : vector<8x32xf32>
    %164 = arith.mulf %159, %163 : vector<8x32xf32>
    %165 = arith.negf %149 : vector<8x128xf32>
    %166 = math.exp %165 : vector<8x128xf32>
    %cst_54 = arith.constant 1.000000e+00 : f32
    %167 = vector.broadcast %cst_54 : f32 to vector<8x128xf32>
    %168 = arith.addf %167, %166 : vector<8x128xf32>
    %169 = arith.divf %167, %168 : vector<8x128xf32>
    %170 = math.tanh %149 : vector<8x128xf32>
    %171 = vector.extract_strided_slice %169 {offsets = [0, 0], sizes = [8, 32], strides = [1, 1]} : vector<8x128xf32> to vector<8x32xf32>
    %172 = vector.extract_strided_slice %169 {offsets = [0, 32], sizes = [8, 32], strides = [1, 1]} : vector<8x128xf32> to vector<8x32xf32>
    %173 = vector.extract_strided_slice %170 {offsets = [0, 64], sizes = [8, 32], strides = [1, 1]} : vector<8x128xf32> to vector<8x32xf32>
    %174 = vector.extract_strided_slice %169 {offsets = [0, 96], sizes = [8, 32], strides = [1, 1]} : vector<8x128xf32> to vector<8x32xf32>
    %175 = arith.mulf %172, %137 : vector<8x32xf32>
    %176 = arith.mulf %171, %173 : vector<8x32xf32>
    %177 = arith.addf %175, %176 : vector<8x32xf32>
    %178 = math.tanh %177 : vector<8x32xf32>
    %179 = arith.mulf %174, %178 : vector<8x32xf32>
    %c4_i32 = arith.constant 4 : i32
    %180 = arith.index_cast %c4_i32 : i32 to index
    %c0_55 = arith.constant 0 : index
    %c0_56 = arith.constant 0 : index
    %181 = vector.load %arg12[%180, %c0_55, %c0_56] : memref<8x8x128xf32, #tpu.memory_space<vmem>>, vector<1x8x128xf32>
    %182 = vector.shape_cast %181 : vector<1x8x128xf32> to vector<8x128xf32>
    %cst_57 = arith.constant dense<0.000000e+00> : vector<8x128xf32>
    %183 = tpu.matmul %164, %1, %cst_57 {dimension_numbers = #tpu.dot_dimension_numbers<[1], [0], [0], [1], [0, 0, 1, 1], [], []>} : vector<8x32xf32>, vector<32x128xf32>, vector<8x128xf32> -> vector<8x128xf32>
    %184 = arith.addf %182, %183 : vector<8x128xf32>
    %185 = arith.index_cast %c4_i32 : i32 to index
    %c0_58 = arith.constant 0 : index
    %c0_59 = arith.constant 0 : index
    %186 = vector.load %arg13[%185, %c0_58, %c0_59] : memref<8x8x128xf32, #tpu.memory_space<vmem>>, vector<1x8x128xf32>
    %187 = vector.shape_cast %186 : vector<1x8x128xf32> to vector<8x128xf32>
    %cst_60 = arith.constant dense<0.000000e+00> : vector<8x128xf32>
    %188 = tpu.matmul %179, %1, %cst_60 {dimension_numbers = #tpu.dot_dimension_numbers<[1], [0], [0], [1], [0, 0, 1, 1], [], []>} : vector<8x32xf32>, vector<32x128xf32>, vector<8x128xf32> -> vector<8x128xf32>
    %189 = arith.addf %187, %188 : vector<8x128xf32>
    %190 = arith.negf %184 : vector<8x128xf32>
    %191 = math.exp %190 : vector<8x128xf32>
    %cst_61 = arith.constant 1.000000e+00 : f32
    %192 = vector.broadcast %cst_61 : f32 to vector<8x128xf32>
    %193 = arith.addf %192, %191 : vector<8x128xf32>
    %194 = arith.divf %192, %193 : vector<8x128xf32>
    %195 = math.tanh %184 : vector<8x128xf32>
    %196 = vector.extract_strided_slice %194 {offsets = [0, 0], sizes = [8, 32], strides = [1, 1]} : vector<8x128xf32> to vector<8x32xf32>
    %197 = vector.extract_strided_slice %194 {offsets = [0, 32], sizes = [8, 32], strides = [1, 1]} : vector<8x128xf32> to vector<8x32xf32>
    %198 = vector.extract_strided_slice %195 {offsets = [0, 64], sizes = [8, 32], strides = [1, 1]} : vector<8x128xf32> to vector<8x32xf32>
    %199 = vector.extract_strided_slice %194 {offsets = [0, 96], sizes = [8, 32], strides = [1, 1]} : vector<8x128xf32> to vector<8x32xf32>
    %200 = arith.mulf %197, %162 : vector<8x32xf32>
    %201 = arith.mulf %196, %198 : vector<8x32xf32>
    %202 = arith.addf %200, %201 : vector<8x32xf32>
    %203 = math.tanh %202 : vector<8x32xf32>
    %204 = arith.mulf %199, %203 : vector<8x32xf32>
    %205 = arith.negf %189 : vector<8x128xf32>
    %206 = math.exp %205 : vector<8x128xf32>
    %cst_62 = arith.constant 1.000000e+00 : f32
    %207 = vector.broadcast %cst_62 : f32 to vector<8x128xf32>
    %208 = arith.addf %207, %206 : vector<8x128xf32>
    %209 = arith.divf %207, %208 : vector<8x128xf32>
    %210 = math.tanh %189 : vector<8x128xf32>
    %211 = vector.extract_strided_slice %209 {offsets = [0, 0], sizes = [8, 32], strides = [1, 1]} : vector<8x128xf32> to vector<8x32xf32>
    %212 = vector.extract_strided_slice %209 {offsets = [0, 32], sizes = [8, 32], strides = [1, 1]} : vector<8x128xf32> to vector<8x32xf32>
    %213 = vector.extract_strided_slice %210 {offsets = [0, 64], sizes = [8, 32], strides = [1, 1]} : vector<8x128xf32> to vector<8x32xf32>
    %214 = vector.extract_strided_slice %209 {offsets = [0, 96], sizes = [8, 32], strides = [1, 1]} : vector<8x128xf32> to vector<8x32xf32>
    %215 = arith.mulf %212, %177 : vector<8x32xf32>
    %216 = arith.mulf %211, %213 : vector<8x32xf32>
    %217 = arith.addf %215, %216 : vector<8x32xf32>
    %218 = math.tanh %217 : vector<8x32xf32>
    %219 = arith.mulf %214, %218 : vector<8x32xf32>
    %c5_i32 = arith.constant 5 : i32
    %220 = arith.index_cast %c5_i32 : i32 to index
    %c0_63 = arith.constant 0 : index
    %c0_64 = arith.constant 0 : index
    %221 = vector.load %arg12[%220, %c0_63, %c0_64] : memref<8x8x128xf32, #tpu.memory_space<vmem>>, vector<1x8x128xf32>
    %222 = vector.shape_cast %221 : vector<1x8x128xf32> to vector<8x128xf32>
    %cst_65 = arith.constant dense<0.000000e+00> : vector<8x128xf32>
    %223 = tpu.matmul %204, %1, %cst_65 {dimension_numbers = #tpu.dot_dimension_numbers<[1], [0], [0], [1], [0, 0, 1, 1], [], []>} : vector<8x32xf32>, vector<32x128xf32>, vector<8x128xf32> -> vector<8x128xf32>
    %224 = arith.addf %222, %223 : vector<8x128xf32>
    %225 = arith.index_cast %c5_i32 : i32 to index
    %c0_66 = arith.constant 0 : index
    %c0_67 = arith.constant 0 : index
    %226 = vector.load %arg13[%225, %c0_66, %c0_67] : memref<8x8x128xf32, #tpu.memory_space<vmem>>, vector<1x8x128xf32>
    %227 = vector.shape_cast %226 : vector<1x8x128xf32> to vector<8x128xf32>
    %cst_68 = arith.constant dense<0.000000e+00> : vector<8x128xf32>
    %228 = tpu.matmul %219, %1, %cst_68 {dimension_numbers = #tpu.dot_dimension_numbers<[1], [0], [0], [1], [0, 0, 1, 1], [], []>} : vector<8x32xf32>, vector<32x128xf32>, vector<8x128xf32> -> vector<8x128xf32>
    %229 = arith.addf %227, %228 : vector<8x128xf32>
    %230 = arith.negf %224 : vector<8x128xf32>
    %231 = math.exp %230 : vector<8x128xf32>
    %cst_69 = arith.constant 1.000000e+00 : f32
    %232 = vector.broadcast %cst_69 : f32 to vector<8x128xf32>
    %233 = arith.addf %232, %231 : vector<8x128xf32>
    %234 = arith.divf %232, %233 : vector<8x128xf32>
    %235 = math.tanh %224 : vector<8x128xf32>
    %236 = vector.extract_strided_slice %234 {offsets = [0, 0], sizes = [8, 32], strides = [1, 1]} : vector<8x128xf32> to vector<8x32xf32>
    %237 = vector.extract_strided_slice %234 {offsets = [0, 32], sizes = [8, 32], strides = [1, 1]} : vector<8x128xf32> to vector<8x32xf32>
    %238 = vector.extract_strided_slice %235 {offsets = [0, 64], sizes = [8, 32], strides = [1, 1]} : vector<8x128xf32> to vector<8x32xf32>
    %239 = vector.extract_strided_slice %234 {offsets = [0, 96], sizes = [8, 32], strides = [1, 1]} : vector<8x128xf32> to vector<8x32xf32>
    %240 = arith.mulf %237, %202 : vector<8x32xf32>
    %241 = arith.mulf %236, %238 : vector<8x32xf32>
    %242 = arith.addf %240, %241 : vector<8x32xf32>
    %243 = math.tanh %242 : vector<8x32xf32>
    %244 = arith.mulf %239, %243 : vector<8x32xf32>
    %245 = arith.negf %229 : vector<8x128xf32>
    %246 = math.exp %245 : vector<8x128xf32>
    %cst_70 = arith.constant 1.000000e+00 : f32
    %247 = vector.broadcast %cst_70 : f32 to vector<8x128xf32>
    %248 = arith.addf %247, %246 : vector<8x128xf32>
    %249 = arith.divf %247, %248 : vector<8x128xf32>
    %250 = math.tanh %229 : vector<8x128xf32>
    %251 = vector.extract_strided_slice %249 {offsets = [0, 0], sizes = [8, 32], strides = [1, 1]} : vector<8x128xf32> to vector<8x32xf32>
    %252 = vector.extract_strided_slice %249 {offsets = [0, 32], sizes = [8, 32], strides = [1, 1]} : vector<8x128xf32> to vector<8x32xf32>
    %253 = vector.extract_strided_slice %250 {offsets = [0, 64], sizes = [8, 32], strides = [1, 1]} : vector<8x128xf32> to vector<8x32xf32>
    %254 = vector.extract_strided_slice %249 {offsets = [0, 96], sizes = [8, 32], strides = [1, 1]} : vector<8x128xf32> to vector<8x32xf32>
    %255 = arith.mulf %252, %217 : vector<8x32xf32>
    %256 = arith.mulf %251, %253 : vector<8x32xf32>
    %257 = arith.addf %255, %256 : vector<8x32xf32>
    %258 = math.tanh %257 : vector<8x32xf32>
    %259 = arith.mulf %254, %258 : vector<8x32xf32>
    %c6_i32 = arith.constant 6 : i32
    %260 = arith.index_cast %c6_i32 : i32 to index
    %c0_71 = arith.constant 0 : index
    %c0_72 = arith.constant 0 : index
    %261 = vector.load %arg12[%260, %c0_71, %c0_72] : memref<8x8x128xf32, #tpu.memory_space<vmem>>, vector<1x8x128xf32>
    %262 = vector.shape_cast %261 : vector<1x8x128xf32> to vector<8x128xf32>
    %cst_73 = arith.constant dense<0.000000e+00> : vector<8x128xf32>
    %263 = tpu.matmul %244, %1, %cst_73 {dimension_numbers = #tpu.dot_dimension_numbers<[1], [0], [0], [1], [0, 0, 1, 1], [], []>} : vector<8x32xf32>, vector<32x128xf32>, vector<8x128xf32> -> vector<8x128xf32>
    %264 = arith.addf %262, %263 : vector<8x128xf32>
    %265 = arith.index_cast %c6_i32 : i32 to index
    %c0_74 = arith.constant 0 : index
    %c0_75 = arith.constant 0 : index
    %266 = vector.load %arg13[%265, %c0_74, %c0_75] : memref<8x8x128xf32, #tpu.memory_space<vmem>>, vector<1x8x128xf32>
    %267 = vector.shape_cast %266 : vector<1x8x128xf32> to vector<8x128xf32>
    %cst_76 = arith.constant dense<0.000000e+00> : vector<8x128xf32>
    %268 = tpu.matmul %259, %1, %cst_76 {dimension_numbers = #tpu.dot_dimension_numbers<[1], [0], [0], [1], [0, 0, 1, 1], [], []>} : vector<8x32xf32>, vector<32x128xf32>, vector<8x128xf32> -> vector<8x128xf32>
    %269 = arith.addf %267, %268 : vector<8x128xf32>
    %270 = arith.negf %264 : vector<8x128xf32>
    %271 = math.exp %270 : vector<8x128xf32>
    %cst_77 = arith.constant 1.000000e+00 : f32
    %272 = vector.broadcast %cst_77 : f32 to vector<8x128xf32>
    %273 = arith.addf %272, %271 : vector<8x128xf32>
    %274 = arith.divf %272, %273 : vector<8x128xf32>
    %275 = math.tanh %264 : vector<8x128xf32>
    %276 = vector.extract_strided_slice %274 {offsets = [0, 0], sizes = [8, 32], strides = [1, 1]} : vector<8x128xf32> to vector<8x32xf32>
    %277 = vector.extract_strided_slice %274 {offsets = [0, 32], sizes = [8, 32], strides = [1, 1]} : vector<8x128xf32> to vector<8x32xf32>
    %278 = vector.extract_strided_slice %275 {offsets = [0, 64], sizes = [8, 32], strides = [1, 1]} : vector<8x128xf32> to vector<8x32xf32>
    %279 = vector.extract_strided_slice %274 {offsets = [0, 96], sizes = [8, 32], strides = [1, 1]} : vector<8x128xf32> to vector<8x32xf32>
    %280 = arith.mulf %277, %242 : vector<8x32xf32>
    %281 = arith.mulf %276, %278 : vector<8x32xf32>
    %282 = arith.addf %280, %281 : vector<8x32xf32>
    %283 = math.tanh %282 : vector<8x32xf32>
    %284 = arith.mulf %279, %283 : vector<8x32xf32>
    %285 = arith.negf %269 : vector<8x128xf32>
    %286 = math.exp %285 : vector<8x128xf32>
    %cst_78 = arith.constant 1.000000e+00 : f32
    %287 = vector.broadcast %cst_78 : f32 to vector<8x128xf32>
    %288 = arith.addf %287, %286 : vector<8x128xf32>
    %289 = arith.divf %287, %288 : vector<8x128xf32>
    %290 = math.tanh %269 : vector<8x128xf32>
    %291 = vector.extract_strided_slice %289 {offsets = [0, 0], sizes = [8, 32], strides = [1, 1]} : vector<8x128xf32> to vector<8x32xf32>
    %292 = vector.extract_strided_slice %289 {offsets = [0, 32], sizes = [8, 32], strides = [1, 1]} : vector<8x128xf32> to vector<8x32xf32>
    %293 = vector.extract_strided_slice %290 {offsets = [0, 64], sizes = [8, 32], strides = [1, 1]} : vector<8x128xf32> to vector<8x32xf32>
    %294 = vector.extract_strided_slice %289 {offsets = [0, 96], sizes = [8, 32], strides = [1, 1]} : vector<8x128xf32> to vector<8x32xf32>
    %295 = arith.mulf %292, %257 : vector<8x32xf32>
    %296 = arith.mulf %291, %293 : vector<8x32xf32>
    %297 = arith.addf %295, %296 : vector<8x32xf32>
    %298 = math.tanh %297 : vector<8x32xf32>
    %299 = arith.mulf %294, %298 : vector<8x32xf32>
    %c7_i32 = arith.constant 7 : i32
    %300 = arith.index_cast %c7_i32 : i32 to index
    %c0_79 = arith.constant 0 : index
    %c0_80 = arith.constant 0 : index
    %301 = vector.load %arg12[%300, %c0_79, %c0_80] : memref<8x8x128xf32, #tpu.memory_space<vmem>>, vector<1x8x128xf32>
    %302 = vector.shape_cast %301 : vector<1x8x128xf32> to vector<8x128xf32>
    %cst_81 = arith.constant dense<0.000000e+00> : vector<8x128xf32>
    %303 = tpu.matmul %284, %1, %cst_81 {dimension_numbers = #tpu.dot_dimension_numbers<[1], [0], [0], [1], [0, 0, 1, 1], [], []>} : vector<8x32xf32>, vector<32x128xf32>, vector<8x128xf32> -> vector<8x128xf32>
    %304 = arith.addf %302, %303 : vector<8x128xf32>
    %305 = arith.index_cast %c7_i32 : i32 to index
    %c0_82 = arith.constant 0 : index
    %c0_83 = arith.constant 0 : index
    %306 = vector.load %arg13[%305, %c0_82, %c0_83] : memref<8x8x128xf32, #tpu.memory_space<vmem>>, vector<1x8x128xf32>
    %307 = vector.shape_cast %306 : vector<1x8x128xf32> to vector<8x128xf32>
    %cst_84 = arith.constant dense<0.000000e+00> : vector<8x128xf32>
    %308 = tpu.matmul %299, %1, %cst_84 {dimension_numbers = #tpu.dot_dimension_numbers<[1], [0], [0], [1], [0, 0, 1, 1], [], []>} : vector<8x32xf32>, vector<32x128xf32>, vector<8x128xf32> -> vector<8x128xf32>
    %309 = arith.addf %307, %308 : vector<8x128xf32>
    %310 = arith.negf %304 : vector<8x128xf32>
    %311 = math.exp %310 : vector<8x128xf32>
    %cst_85 = arith.constant 1.000000e+00 : f32
    %312 = vector.broadcast %cst_85 : f32 to vector<8x128xf32>
    %313 = arith.addf %312, %311 : vector<8x128xf32>
    %314 = arith.divf %312, %313 : vector<8x128xf32>
    %315 = math.tanh %304 : vector<8x128xf32>
    %316 = vector.extract_strided_slice %314 {offsets = [0, 0], sizes = [8, 32], strides = [1, 1]} : vector<8x128xf32> to vector<8x32xf32>
    %317 = vector.extract_strided_slice %314 {offsets = [0, 32], sizes = [8, 32], strides = [1, 1]} : vector<8x128xf32> to vector<8x32xf32>
    %318 = vector.extract_strided_slice %315 {offsets = [0, 64], sizes = [8, 32], strides = [1, 1]} : vector<8x128xf32> to vector<8x32xf32>
    %319 = vector.extract_strided_slice %314 {offsets = [0, 96], sizes = [8, 32], strides = [1, 1]} : vector<8x128xf32> to vector<8x32xf32>
    %320 = arith.mulf %317, %282 : vector<8x32xf32>
    %321 = arith.mulf %316, %318 : vector<8x32xf32>
    %322 = arith.addf %320, %321 : vector<8x32xf32>
    %323 = math.tanh %322 : vector<8x32xf32>
    %324 = arith.mulf %319, %323 : vector<8x32xf32>
    %325 = arith.negf %309 : vector<8x128xf32>
    %326 = math.exp %325 : vector<8x128xf32>
    %cst_86 = arith.constant 1.000000e+00 : f32
    %327 = vector.broadcast %cst_86 : f32 to vector<8x128xf32>
    %328 = arith.addf %327, %326 : vector<8x128xf32>
    %329 = arith.divf %327, %328 : vector<8x128xf32>
    %330 = math.tanh %309 : vector<8x128xf32>
    %331 = vector.extract_strided_slice %329 {offsets = [0, 0], sizes = [8, 32], strides = [1, 1]} : vector<8x128xf32> to vector<8x32xf32>
    %332 = vector.extract_strided_slice %329 {offsets = [0, 32], sizes = [8, 32], strides = [1, 1]} : vector<8x128xf32> to vector<8x32xf32>
    %333 = vector.extract_strided_slice %330 {offsets = [0, 64], sizes = [8, 32], strides = [1, 1]} : vector<8x128xf32> to vector<8x32xf32>
    %334 = vector.extract_strided_slice %329 {offsets = [0, 96], sizes = [8, 32], strides = [1, 1]} : vector<8x128xf32> to vector<8x32xf32>
    %335 = arith.mulf %332, %297 : vector<8x32xf32>
    %336 = arith.mulf %331, %333 : vector<8x32xf32>
    %337 = arith.addf %335, %336 : vector<8x32xf32>
    %338 = math.tanh %337 : vector<8x32xf32>
    %339 = arith.mulf %334, %338 : vector<8x32xf32>
    %c8_i32 = arith.constant 8 : i32
    %c0_87 = arith.constant 0 : index
    %c0_88 = arith.constant 0 : index
    %340 = vector.load %arg9[%c0_87, %c0_88] : memref<16x32xf32, #tpu.memory_space<vmem>>, vector<8x32xf32>
    tpu.vector_store %arg9[%c0_87, %c0_88], %322 {strides = array<i32>} : memref<16x32xf32, #tpu.memory_space<vmem>>, vector<8x32xf32>,
    %c8 = arith.constant 8 : index
    %c0_89 = arith.constant 0 : index
    %341 = vector.load %arg9[%c8, %c0_89] : memref<16x32xf32, #tpu.memory_space<vmem>>, vector<8x32xf32>
    tpu.vector_store %arg9[%c8, %c0_89], %337 {strides = array<i32>} : memref<16x32xf32, #tpu.memory_space<vmem>>, vector<8x32xf32>,
    %c0_i32_90 = arith.constant 0 : i32
    %c7_i32_91 = arith.constant 7 : i32
    %342 = arith.subi %c7_i32_91, %c0_i32_90 : i32
    %343 = arith.index_cast %342 : i32 to index
    %c0_92 = arith.constant 0 : index
    %c0_93 = arith.constant 0 : index
    %344 = vector.load %arg14[%343, %c0_92, %c0_93] : memref<8x8x32xf32, #tpu.memory_space<vmem>>, vector<1x8x32xf32>
    %345 = vector.shape_cast %344 : vector<1x8x32xf32> to vector<8x32xf32>
    %346 = vector.shape_cast %324 : vector<8x32xf32> to vector<1x8x32xf32>
    tpu.vector_store %arg14[%343, %c0_92, %c0_93], %346 {strides = array<i32>} : memref<8x8x32xf32, #tpu.memory_space<vmem>>, vector<1x8x32xf32>,
    %347 = arith.index_cast %342 : i32 to index
    %c0_94 = arith.constant 0 : index
    %c0_95 = arith.constant 0 : index
    %348 = vector.load %arg15[%347, %c0_94, %c0_95] : memref<8x8x32xf32, #tpu.memory_space<vmem>>, vector<1x8x32xf32>
    %349 = vector.shape_cast %348 : vector<1x8x32xf32> to vector<8x32xf32>
    %350 = vector.shape_cast %339 : vector<8x32xf32> to vector<1x8x32xf32>
    tpu.vector_store %arg15[%347, %c0_94, %c0_95], %350 {strides = array<i32>} : memref<8x8x32xf32, #tpu.memory_space<vmem>>, vector<1x8x32xf32>,
    %cst_96 = arith.constant dense<0.000000e+00> : vector<8x128xf32>
    %351 = tpu.matmul %324, %2, %cst_96 {dimension_numbers = #tpu.dot_dimension_numbers<[1], [0], [0], [1], [0, 0, 1, 1], [], []>} : vector<8x32xf32>, vector<32x128xf32>, vector<8x128xf32> -> vector<8x128xf32>
    %352 = arith.addf %351, %8 : vector<8x128xf32>
    %cst_97 = arith.constant dense<0.000000e+00> : vector<8x128xf32>
    %353 = tpu.matmul %339, %2, %cst_97 {dimension_numbers = #tpu.dot_dimension_numbers<[1], [0], [0], [1], [0, 0, 1, 1], [], []>} : vector<8x32xf32>, vector<32x128xf32>, vector<8x128xf32> -> vector<8x128xf32>
    %354 = arith.addf %353, %8 : vector<8x128xf32>
    %355 = arith.negf %352 : vector<8x128xf32>
    %356 = math.exp %355 : vector<8x128xf32>
    %cst_98 = arith.constant 1.000000e+00 : f32
    %357 = vector.broadcast %cst_98 : f32 to vector<8x128xf32>
    %358 = arith.addf %357, %356 : vector<8x128xf32>
    %359 = arith.divf %357, %358 : vector<8x128xf32>
    %360 = math.tanh %352 : vector<8x128xf32>
    %361 = vector.extract_strided_slice %359 {offsets = [0, 0], sizes = [8, 32], strides = [1, 1]} : vector<8x128xf32> to vector<8x32xf32>
    %362 = vector.extract_strided_slice %359 {offsets = [0, 32], sizes = [8, 32], strides = [1, 1]} : vector<8x128xf32> to vector<8x32xf32>
    %363 = vector.extract_strided_slice %360 {offsets = [0, 64], sizes = [8, 32], strides = [1, 1]} : vector<8x128xf32> to vector<8x32xf32>
    %364 = vector.extract_strided_slice %359 {offsets = [0, 96], sizes = [8, 32], strides = [1, 1]} : vector<8x128xf32> to vector<8x32xf32>
    %365 = arith.mulf %362, %322 : vector<8x32xf32>
    %366 = arith.mulf %361, %363 : vector<8x32xf32>
    %367 = arith.addf %365, %366 : vector<8x32xf32>
    %368 = math.tanh %367 : vector<8x32xf32>
    %369 = arith.mulf %364, %368 : vector<8x32xf32>
    %370 = arith.negf %354 : vector<8x128xf32>
    %371 = math.exp %370 : vector<8x128xf32>
    %cst_99 = arith.constant 1.000000e+00 : f32
    %372 = vector.broadcast %cst_99 : f32 to vector<8x128xf32>
    %373 = arith.addf %372, %371 : vector<8x128xf32>
    %374 = arith.divf %372, %373 : vector<8x128xf32>
    %375 = math.tanh %354 : vector<8x128xf32>
    %376 = vector.extract_strided_slice %374 {offsets = [0, 0], sizes = [8, 32], strides = [1, 1]} : vector<8x128xf32> to vector<8x32xf32>
    %377 = vector.extract_strided_slice %374 {offsets = [0, 32], sizes = [8, 32], strides = [1, 1]} : vector<8x128xf32> to vector<8x32xf32>
    %378 = vector.extract_strided_slice %375 {offsets = [0, 64], sizes = [8, 32], strides = [1, 1]} : vector<8x128xf32> to vector<8x32xf32>
    %379 = vector.extract_strided_slice %374 {offsets = [0, 96], sizes = [8, 32], strides = [1, 1]} : vector<8x128xf32> to vector<8x32xf32>
    %380 = arith.mulf %377, %337 : vector<8x32xf32>
    %381 = arith.mulf %376, %378 : vector<8x32xf32>
    %382 = arith.addf %380, %381 : vector<8x32xf32>
    %383 = math.tanh %382 : vector<8x32xf32>
    %384 = arith.mulf %379, %383 : vector<8x32xf32>
    %c1_i32_100 = arith.constant 1 : i32
    %c7_i32_101 = arith.constant 7 : i32
    %385 = arith.subi %c7_i32_101, %c1_i32_100 : i32
    %386 = arith.index_cast %385 : i32 to index
    %c0_102 = arith.constant 0 : index
    %c0_103 = arith.constant 0 : index
    %387 = vector.load %arg14[%386, %c0_102, %c0_103] : memref<8x8x32xf32, #tpu.memory_space<vmem>>, vector<1x8x32xf32>
    %388 = vector.shape_cast %387 : vector<1x8x32xf32> to vector<8x32xf32>
    %389 = vector.shape_cast %369 : vector<8x32xf32> to vector<1x8x32xf32>
    tpu.vector_store %arg14[%386, %c0_102, %c0_103], %389 {strides = array<i32>} : memref<8x8x32xf32, #tpu.memory_space<vmem>>, vector<1x8x32xf32>,
    %390 = arith.index_cast %385 : i32 to index
    %c0_104 = arith.constant 0 : index
    %c0_105 = arith.constant 0 : index
    %391 = vector.load %arg15[%390, %c0_104, %c0_105] : memref<8x8x32xf32, #tpu.memory_space<vmem>>, vector<1x8x32xf32>
    %392 = vector.shape_cast %391 : vector<1x8x32xf32> to vector<8x32xf32>
    %393 = vector.shape_cast %384 : vector<8x32xf32> to vector<1x8x32xf32>
    tpu.vector_store %arg15[%390, %c0_104, %c0_105], %393 {strides = array<i32>} : memref<8x8x32xf32, #tpu.memory_space<vmem>>, vector<1x8x32xf32>,
    %cst_106 = arith.constant dense<0.000000e+00> : vector<8x128xf32>
    %394 = tpu.matmul %369, %2, %cst_106 {dimension_numbers = #tpu.dot_dimension_numbers<[1], [0], [0], [1], [0, 0, 1, 1], [], []>} : vector<8x32xf32>, vector<32x128xf32>, vector<8x128xf32> -> vector<8x128xf32>
    %395 = arith.addf %394, %8 : vector<8x128xf32>
    %cst_107 = arith.constant dense<0.000000e+00> : vector<8x128xf32>
    %396 = tpu.matmul %384, %2, %cst_107 {dimension_numbers = #tpu.dot_dimension_numbers<[1], [0], [0], [1], [0, 0, 1, 1], [], []>} : vector<8x32xf32>, vector<32x128xf32>, vector<8x128xf32> -> vector<8x128xf32>
    %397 = arith.addf %396, %8 : vector<8x128xf32>
    %398 = arith.negf %395 : vector<8x128xf32>
    %399 = math.exp %398 : vector<8x128xf32>
    %cst_108 = arith.constant 1.000000e+00 : f32
    %400 = vector.broadcast %cst_108 : f32 to vector<8x128xf32>
    %401 = arith.addf %400, %399 : vector<8x128xf32>
    %402 = arith.divf %400, %401 : vector<8x128xf32>
    %403 = math.tanh %395 : vector<8x128xf32>
    %404 = vector.extract_strided_slice %402 {offsets = [0, 0], sizes = [8, 32], strides = [1, 1]} : vector<8x128xf32> to vector<8x32xf32>
    %405 = vector.extract_strided_slice %402 {offsets = [0, 32], sizes = [8, 32], strides = [1, 1]} : vector<8x128xf32> to vector<8x32xf32>
    %406 = vector.extract_strided_slice %403 {offsets = [0, 64], sizes = [8, 32], strides = [1, 1]} : vector<8x128xf32> to vector<8x32xf32>
    %407 = vector.extract_strided_slice %402 {offsets = [0, 96], sizes = [8, 32], strides = [1, 1]} : vector<8x128xf32> to vector<8x32xf32>
    %408 = arith.mulf %405, %367 : vector<8x32xf32>
    %409 = arith.mulf %404, %406 : vector<8x32xf32>
    %410 = arith.addf %408, %409 : vector<8x32xf32>
    %411 = math.tanh %410 : vector<8x32xf32>
    %412 = arith.mulf %407, %411 : vector<8x32xf32>
    %413 = arith.negf %397 : vector<8x128xf32>
    %414 = math.exp %413 : vector<8x128xf32>
    %cst_109 = arith.constant 1.000000e+00 : f32
    %415 = vector.broadcast %cst_109 : f32 to vector<8x128xf32>
    %416 = arith.addf %415, %414 : vector<8x128xf32>
    %417 = arith.divf %415, %416 : vector<8x128xf32>
    %418 = math.tanh %397 : vector<8x128xf32>
    %419 = vector.extract_strided_slice %417 {offsets = [0, 0], sizes = [8, 32], strides = [1, 1]} : vector<8x128xf32> to vector<8x32xf32>
    %420 = vector.extract_strided_slice %417 {offsets = [0, 32], sizes = [8, 32], strides = [1, 1]} : vector<8x128xf32> to vector<8x32xf32>
    %421 = vector.extract_strided_slice %418 {offsets = [0, 64], sizes = [8, 32], strides = [1, 1]} : vector<8x128xf32> to vector<8x32xf32>
    %422 = vector.extract_strided_slice %417 {offsets = [0, 96], sizes = [8, 32], strides = [1, 1]} : vector<8x128xf32> to vector<8x32xf32>
    %423 = arith.mulf %420, %382 : vector<8x32xf32>
    %424 = arith.mulf %419, %421 : vector<8x32xf32>
    %425 = arith.addf %423, %424 : vector<8x32xf32>
    %426 = math.tanh %425 : vector<8x32xf32>
    %427 = arith.mulf %422, %426 : vector<8x32xf32>
    %c2_i32_110 = arith.constant 2 : i32
    %c7_i32_111 = arith.constant 7 : i32
    %428 = arith.subi %c7_i32_111, %c2_i32_110 : i32
    %429 = arith.index_cast %428 : i32 to index
    %c0_112 = arith.constant 0 : index
    %c0_113 = arith.constant 0 : index
    %430 = vector.load %arg14[%429, %c0_112, %c0_113] : memref<8x8x32xf32, #tpu.memory_space<vmem>>, vector<1x8x32xf32>
    %431 = vector.shape_cast %430 : vector<1x8x32xf32> to vector<8x32xf32>
    %432 = vector.shape_cast %412 : vector<8x32xf32> to vector<1x8x32xf32>
    tpu.vector_store %arg14[%429, %c0_112, %c0_113], %432 {strides = array<i32>} : memref<8x8x32xf32, #tpu.memory_space<vmem>>, vector<1x8x32xf32>,
    %433 = arith.index_cast %428 : i32 to index
    %c0_114 = arith.constant 0 : index
    %c0_115 = arith.constant 0 : index
    %434 = vector.load %arg15[%433, %c0_114, %c0_115] : memref<8x8x32xf32, #tpu.memory_space<vmem>>, vector<1x8x32xf32>
    %435 = vector.shape_cast %434 : vector<1x8x32xf32> to vector<8x32xf32>
    %436 = vector.shape_cast %427 : vector<8x32xf32> to vector<1x8x32xf32>
    tpu.vector_store %arg15[%433, %c0_114, %c0_115], %436 {strides = array<i32>} : memref<8x8x32xf32, #tpu.memory_space<vmem>>, vector<1x8x32xf32>,
    %cst_116 = arith.constant dense<0.000000e+00> : vector<8x128xf32>
    %437 = tpu.matmul %412, %2, %cst_116 {dimension_numbers = #tpu.dot_dimension_numbers<[1], [0], [0], [1], [0, 0, 1, 1], [], []>} : vector<8x32xf32>, vector<32x128xf32>, vector<8x128xf32> -> vector<8x128xf32>
    %438 = arith.addf %437, %8 : vector<8x128xf32>
    %cst_117 = arith.constant dense<0.000000e+00> : vector<8x128xf32>
    %439 = tpu.matmul %427, %2, %cst_117 {dimension_numbers = #tpu.dot_dimension_numbers<[1], [0], [0], [1], [0, 0, 1, 1], [], []>} : vector<8x32xf32>, vector<32x128xf32>, vector<8x128xf32> -> vector<8x128xf32>
    %440 = arith.addf %439, %8 : vector<8x128xf32>
    %441 = arith.negf %438 : vector<8x128xf32>
    %442 = math.exp %441 : vector<8x128xf32>
    %cst_118 = arith.constant 1.000000e+00 : f32
    %443 = vector.broadcast %cst_118 : f32 to vector<8x128xf32>
    %444 = arith.addf %443, %442 : vector<8x128xf32>
    %445 = arith.divf %443, %444 : vector<8x128xf32>
    %446 = math.tanh %438 : vector<8x128xf32>
    %447 = vector.extract_strided_slice %445 {offsets = [0, 0], sizes = [8, 32], strides = [1, 1]} : vector<8x128xf32> to vector<8x32xf32>
    %448 = vector.extract_strided_slice %445 {offsets = [0, 32], sizes = [8, 32], strides = [1, 1]} : vector<8x128xf32> to vector<8x32xf32>
    %449 = vector.extract_strided_slice %446 {offsets = [0, 64], sizes = [8, 32], strides = [1, 1]} : vector<8x128xf32> to vector<8x32xf32>
    %450 = vector.extract_strided_slice %445 {offsets = [0, 96], sizes = [8, 32], strides = [1, 1]} : vector<8x128xf32> to vector<8x32xf32>
    %451 = arith.mulf %448, %410 : vector<8x32xf32>
    %452 = arith.mulf %447, %449 : vector<8x32xf32>
    %453 = arith.addf %451, %452 : vector<8x32xf32>
    %454 = math.tanh %453 : vector<8x32xf32>
    %455 = arith.mulf %450, %454 : vector<8x32xf32>
    %456 = arith.negf %440 : vector<8x128xf32>
    %457 = math.exp %456 : vector<8x128xf32>
    %cst_119 = arith.constant 1.000000e+00 : f32
    %458 = vector.broadcast %cst_119 : f32 to vector<8x128xf32>
    %459 = arith.addf %458, %457 : vector<8x128xf32>
    %460 = arith.divf %458, %459 : vector<8x128xf32>
    %461 = math.tanh %440 : vector<8x128xf32>
    %462 = vector.extract_strided_slice %460 {offsets = [0, 0], sizes = [8, 32], strides = [1, 1]} : vector<8x128xf32> to vector<8x32xf32>
    %463 = vector.extract_strided_slice %460 {offsets = [0, 32], sizes = [8, 32], strides = [1, 1]} : vector<8x128xf32> to vector<8x32xf32>
    %464 = vector.extract_strided_slice %461 {offsets = [0, 64], sizes = [8, 32], strides = [1, 1]} : vector<8x128xf32> to vector<8x32xf32>
    %465 = vector.extract_strided_slice %460 {offsets = [0, 96], sizes = [8, 32], strides = [1, 1]} : vector<8x128xf32> to vector<8x32xf32>
    %466 = arith.mulf %463, %425 : vector<8x32xf32>
    %467 = arith.mulf %462, %464 : vector<8x32xf32>
    %468 = arith.addf %466, %467 : vector<8x32xf32>
    %469 = math.tanh %468 : vector<8x32xf32>
    %470 = arith.mulf %465, %469 : vector<8x32xf32>
    %c3_i32_120 = arith.constant 3 : i32
    %c7_i32_121 = arith.constant 7 : i32
    %471 = arith.subi %c7_i32_121, %c3_i32_120 : i32
    %472 = arith.index_cast %471 : i32 to index
    %c0_122 = arith.constant 0 : index
    %c0_123 = arith.constant 0 : index
    %473 = vector.load %arg14[%472, %c0_122, %c0_123] : memref<8x8x32xf32, #tpu.memory_space<vmem>>, vector<1x8x32xf32>
    %474 = vector.shape_cast %473 : vector<1x8x32xf32> to vector<8x32xf32>
    %475 = vector.shape_cast %455 : vector<8x32xf32> to vector<1x8x32xf32>
    tpu.vector_store %arg14[%472, %c0_122, %c0_123], %475 {strides = array<i32>} : memref<8x8x32xf32, #tpu.memory_space<vmem>>, vector<1x8x32xf32>,
    %476 = arith.index_cast %471 : i32 to index
    %c0_124 = arith.constant 0 : index
    %c0_125 = arith.constant 0 : index
    %477 = vector.load %arg15[%476, %c0_124, %c0_125] : memref<8x8x32xf32, #tpu.memory_space<vmem>>, vector<1x8x32xf32>
    %478 = vector.shape_cast %477 : vector<1x8x32xf32> to vector<8x32xf32>
    %479 = vector.shape_cast %470 : vector<8x32xf32> to vector<1x8x32xf32>
    tpu.vector_store %arg15[%476, %c0_124, %c0_125], %479 {strides = array<i32>} : memref<8x8x32xf32, #tpu.memory_space<vmem>>, vector<1x8x32xf32>,
    %cst_126 = arith.constant dense<0.000000e+00> : vector<8x128xf32>
    %480 = tpu.matmul %455, %2, %cst_126 {dimension_numbers = #tpu.dot_dimension_numbers<[1], [0], [0], [1], [0, 0, 1, 1], [], []>} : vector<8x32xf32>, vector<32x128xf32>, vector<8x128xf32> -> vector<8x128xf32>
    %481 = arith.addf %480, %8 : vector<8x128xf32>
    %cst_127 = arith.constant dense<0.000000e+00> : vector<8x128xf32>
    %482 = tpu.matmul %470, %2, %cst_127 {dimension_numbers = #tpu.dot_dimension_numbers<[1], [0], [0], [1], [0, 0, 1, 1], [], []>} : vector<8x32xf32>, vector<32x128xf32>, vector<8x128xf32> -> vector<8x128xf32>
    %483 = arith.addf %482, %8 : vector<8x128xf32>
    %484 = arith.negf %481 : vector<8x128xf32>
    %485 = math.exp %484 : vector<8x128xf32>
    %cst_128 = arith.constant 1.000000e+00 : f32
    %486 = vector.broadcast %cst_128 : f32 to vector<8x128xf32>
    %487 = arith.addf %486, %485 : vector<8x128xf32>
    %488 = arith.divf %486, %487 : vector<8x128xf32>
    %489 = math.tanh %481 : vector<8x128xf32>
    %490 = vector.extract_strided_slice %488 {offsets = [0, 0], sizes = [8, 32], strides = [1, 1]} : vector<8x128xf32> to vector<8x32xf32>
    %491 = vector.extract_strided_slice %488 {offsets = [0, 32], sizes = [8, 32], strides = [1, 1]} : vector<8x128xf32> to vector<8x32xf32>
    %492 = vector.extract_strided_slice %489 {offsets = [0, 64], sizes = [8, 32], strides = [1, 1]} : vector<8x128xf32> to vector<8x32xf32>
    %493 = vector.extract_strided_slice %488 {offsets = [0, 96], sizes = [8, 32], strides = [1, 1]} : vector<8x128xf32> to vector<8x32xf32>
    %494 = arith.mulf %491, %453 : vector<8x32xf32>
    %495 = arith.mulf %490, %492 : vector<8x32xf32>
    %496 = arith.addf %494, %495 : vector<8x32xf32>
    %497 = math.tanh %496 : vector<8x32xf32>
    %498 = arith.mulf %493, %497 : vector<8x32xf32>
    %499 = arith.negf %483 : vector<8x128xf32>
    %500 = math.exp %499 : vector<8x128xf32>
    %cst_129 = arith.constant 1.000000e+00 : f32
    %501 = vector.broadcast %cst_129 : f32 to vector<8x128xf32>
    %502 = arith.addf %501, %500 : vector<8x128xf32>
    %503 = arith.divf %501, %502 : vector<8x128xf32>
    %504 = math.tanh %483 : vector<8x128xf32>
    %505 = vector.extract_strided_slice %503 {offsets = [0, 0], sizes = [8, 32], strides = [1, 1]} : vector<8x128xf32> to vector<8x32xf32>
    %506 = vector.extract_strided_slice %503 {offsets = [0, 32], sizes = [8, 32], strides = [1, 1]} : vector<8x128xf32> to vector<8x32xf32>
    %507 = vector.extract_strided_slice %504 {offsets = [0, 64], sizes = [8, 32], strides = [1, 1]} : vector<8x128xf32> to vector<8x32xf32>
    %508 = vector.extract_strided_slice %503 {offsets = [0, 96], sizes = [8, 32], strides = [1, 1]} : vector<8x128xf32> to vector<8x32xf32>
    %509 = arith.mulf %506, %468 : vector<8x32xf32>
    %510 = arith.mulf %505, %507 : vector<8x32xf32>
    %511 = arith.addf %509, %510 : vector<8x32xf32>
    %512 = math.tanh %511 : vector<8x32xf32>
    %513 = arith.mulf %508, %512 : vector<8x32xf32>
    %c4_i32_130 = arith.constant 4 : i32
    %c7_i32_131 = arith.constant 7 : i32
    %514 = arith.subi %c7_i32_131, %c4_i32_130 : i32
    %515 = arith.index_cast %514 : i32 to index
    %c0_132 = arith.constant 0 : index
    %c0_133 = arith.constant 0 : index
    %516 = vector.load %arg14[%515, %c0_132, %c0_133] : memref<8x8x32xf32, #tpu.memory_space<vmem>>, vector<1x8x32xf32>
    %517 = vector.shape_cast %516 : vector<1x8x32xf32> to vector<8x32xf32>
    %518 = vector.shape_cast %498 : vector<8x32xf32> to vector<1x8x32xf32>
    tpu.vector_store %arg14[%515, %c0_132, %c0_133], %518 {strides = array<i32>} : memref<8x8x32xf32, #tpu.memory_space<vmem>>, vector<1x8x32xf32>,
    %519 = arith.index_cast %514 : i32 to index
    %c0_134 = arith.constant 0 : index
    %c0_135 = arith.constant 0 : index
    %520 = vector.load %arg15[%519, %c0_134, %c0_135] : memref<8x8x32xf32, #tpu.memory_space<vmem>>, vector<1x8x32xf32>
    %521 = vector.shape_cast %520 : vector<1x8x32xf32> to vector<8x32xf32>
    %522 = vector.shape_cast %513 : vector<8x32xf32> to vector<1x8x32xf32>
    tpu.vector_store %arg15[%519, %c0_134, %c0_135], %522 {strides = array<i32>} : memref<8x8x32xf32, #tpu.memory_space<vmem>>, vector<1x8x32xf32>,
    %cst_136 = arith.constant dense<0.000000e+00> : vector<8x128xf32>
    %523 = tpu.matmul %498, %2, %cst_136 {dimension_numbers = #tpu.dot_dimension_numbers<[1], [0], [0], [1], [0, 0, 1, 1], [], []>} : vector<8x32xf32>, vector<32x128xf32>, vector<8x128xf32> -> vector<8x128xf32>
    %524 = arith.addf %523, %8 : vector<8x128xf32>
    %cst_137 = arith.constant dense<0.000000e+00> : vector<8x128xf32>
    %525 = tpu.matmul %513, %2, %cst_137 {dimension_numbers = #tpu.dot_dimension_numbers<[1], [0], [0], [1], [0, 0, 1, 1], [], []>} : vector<8x32xf32>, vector<32x128xf32>, vector<8x128xf32> -> vector<8x128xf32>
    %526 = arith.addf %525, %8 : vector<8x128xf32>
    %527 = arith.negf %524 : vector<8x128xf32>
    %528 = math.exp %527 : vector<8x128xf32>
    %cst_138 = arith.constant 1.000000e+00 : f32
    %529 = vector.broadcast %cst_138 : f32 to vector<8x128xf32>
    %530 = arith.addf %529, %528 : vector<8x128xf32>
    %531 = arith.divf %529, %530 : vector<8x128xf32>
    %532 = math.tanh %524 : vector<8x128xf32>
    %533 = vector.extract_strided_slice %531 {offsets = [0, 0], sizes = [8, 32], strides = [1, 1]} : vector<8x128xf32> to vector<8x32xf32>
    %534 = vector.extract_strided_slice %531 {offsets = [0, 32], sizes = [8, 32], strides = [1, 1]} : vector<8x128xf32> to vector<8x32xf32>
    %535 = vector.extract_strided_slice %532 {offsets = [0, 64], sizes = [8, 32], strides = [1, 1]} : vector<8x128xf32> to vector<8x32xf32>
    %536 = vector.extract_strided_slice %531 {offsets = [0, 96], sizes = [8, 32], strides = [1, 1]} : vector<8x128xf32> to vector<8x32xf32>
    %537 = arith.mulf %534, %496 : vector<8x32xf32>
    %538 = arith.mulf %533, %535 : vector<8x32xf32>
    %539 = arith.addf %537, %538 : vector<8x32xf32>
    %540 = math.tanh %539 : vector<8x32xf32>
    %541 = arith.mulf %536, %540 : vector<8x32xf32>
    %542 = arith.negf %526 : vector<8x128xf32>
    %543 = math.exp %542 : vector<8x128xf32>
    %cst_139 = arith.constant 1.000000e+00 : f32
    %544 = vector.broadcast %cst_139 : f32 to vector<8x128xf32>
    %545 = arith.addf %544, %543 : vector<8x128xf32>
    %546 = arith.divf %544, %545 : vector<8x128xf32>
    %547 = math.tanh %526 : vector<8x128xf32>
    %548 = vector.extract_strided_slice %546 {offsets = [0, 0], sizes = [8, 32], strides = [1, 1]} : vector<8x128xf32> to vector<8x32xf32>
    %549 = vector.extract_strided_slice %546 {offsets = [0, 32], sizes = [8, 32], strides = [1, 1]} : vector<8x128xf32> to vector<8x32xf32>
    %550 = vector.extract_strided_slice %547 {offsets = [0, 64], sizes = [8, 32], strides = [1, 1]} : vector<8x128xf32> to vector<8x32xf32>
    %551 = vector.extract_strided_slice %546 {offsets = [0, 96], sizes = [8, 32], strides = [1, 1]} : vector<8x128xf32> to vector<8x32xf32>
    %552 = arith.mulf %549, %511 : vector<8x32xf32>
    %553 = arith.mulf %548, %550 : vector<8x32xf32>
    %554 = arith.addf %552, %553 : vector<8x32xf32>
    %555 = math.tanh %554 : vector<8x32xf32>
    %556 = arith.mulf %551, %555 : vector<8x32xf32>
    %c5_i32_140 = arith.constant 5 : i32
    %c7_i32_141 = arith.constant 7 : i32
    %557 = arith.subi %c7_i32_141, %c5_i32_140 : i32
    %558 = arith.index_cast %557 : i32 to index
    %c0_142 = arith.constant 0 : index
    %c0_143 = arith.constant 0 : index
    %559 = vector.load %arg14[%558, %c0_142, %c0_143] : memref<8x8x32xf32, #tpu.memory_space<vmem>>, vector<1x8x32xf32>
    %560 = vector.shape_cast %559 : vector<1x8x32xf32> to vector<8x32xf32>
    %561 = vector.shape_cast %541 : vector<8x32xf32> to vector<1x8x32xf32>
    tpu.vector_store %arg14[%558, %c0_142, %c0_143], %561 {strides = array<i32>} : memref<8x8x32xf32, #tpu.memory_space<vmem>>, vector<1x8x32xf32>,
    %562 = arith.index_cast %557 : i32 to index
    %c0_144 = arith.constant 0 : index
    %c0_145 = arith.constant 0 : index
    %563 = vector.load %arg15[%562, %c0_144, %c0_145] : memref<8x8x32xf32, #tpu.memory_space<vmem>>, vector<1x8x32xf32>
    %564 = vector.shape_cast %563 : vector<1x8x32xf32> to vector<8x32xf32>
    %565 = vector.shape_cast %556 : vector<8x32xf32> to vector<1x8x32xf32>
    tpu.vector_store %arg15[%562, %c0_144, %c0_145], %565 {strides = array<i32>} : memref<8x8x32xf32, #tpu.memory_space<vmem>>, vector<1x8x32xf32>,
    %cst_146 = arith.constant dense<0.000000e+00> : vector<8x128xf32>
    %566 = tpu.matmul %541, %2, %cst_146 {dimension_numbers = #tpu.dot_dimension_numbers<[1], [0], [0], [1], [0, 0, 1, 1], [], []>} : vector<8x32xf32>, vector<32x128xf32>, vector<8x128xf32> -> vector<8x128xf32>
    %567 = arith.addf %566, %8 : vector<8x128xf32>
    %cst_147 = arith.constant dense<0.000000e+00> : vector<8x128xf32>
    %568 = tpu.matmul %556, %2, %cst_147 {dimension_numbers = #tpu.dot_dimension_numbers<[1], [0], [0], [1], [0, 0, 1, 1], [], []>} : vector<8x32xf32>, vector<32x128xf32>, vector<8x128xf32> -> vector<8x128xf32>
    %569 = arith.addf %568, %8 : vector<8x128xf32>
    %570 = arith.negf %567 : vector<8x128xf32>
    %571 = math.exp %570 : vector<8x128xf32>
    %cst_148 = arith.constant 1.000000e+00 : f32
    %572 = vector.broadcast %cst_148 : f32 to vector<8x128xf32>
    %573 = arith.addf %572, %571 : vector<8x128xf32>
    %574 = arith.divf %572, %573 : vector<8x128xf32>
    %575 = math.tanh %567 : vector<8x128xf32>
    %576 = vector.extract_strided_slice %574 {offsets = [0, 0], sizes = [8, 32], strides = [1, 1]} : vector<8x128xf32> to vector<8x32xf32>
    %577 = vector.extract_strided_slice %574 {offsets = [0, 32], sizes = [8, 32], strides = [1, 1]} : vector<8x128xf32> to vector<8x32xf32>
    %578 = vector.extract_strided_slice %575 {offsets = [0, 64], sizes = [8, 32], strides = [1, 1]} : vector<8x128xf32> to vector<8x32xf32>
    %579 = vector.extract_strided_slice %574 {offsets = [0, 96], sizes = [8, 32], strides = [1, 1]} : vector<8x128xf32> to vector<8x32xf32>
    %580 = arith.mulf %577, %539 : vector<8x32xf32>
    %581 = arith.mulf %576, %578 : vector<8x32xf32>
    %582 = arith.addf %580, %581 : vector<8x32xf32>
    %583 = math.tanh %582 : vector<8x32xf32>
    %584 = arith.mulf %579, %583 : vector<8x32xf32>
    %585 = arith.negf %569 : vector<8x128xf32>
    %586 = math.exp %585 : vector<8x128xf32>
    %cst_149 = arith.constant 1.000000e+00 : f32
    %587 = vector.broadcast %cst_149 : f32 to vector<8x128xf32>
    %588 = arith.addf %587, %586 : vector<8x128xf32>
    %589 = arith.divf %587, %588 : vector<8x128xf32>
    %590 = math.tanh %569 : vector<8x128xf32>
    %591 = vector.extract_strided_slice %589 {offsets = [0, 0], sizes = [8, 32], strides = [1, 1]} : vector<8x128xf32> to vector<8x32xf32>
    %592 = vector.extract_strided_slice %589 {offsets = [0, 32], sizes = [8, 32], strides = [1, 1]} : vector<8x128xf32> to vector<8x32xf32>
    %593 = vector.extract_strided_slice %590 {offsets = [0, 64], sizes = [8, 32], strides = [1, 1]} : vector<8x128xf32> to vector<8x32xf32>
    %594 = vector.extract_strided_slice %589 {offsets = [0, 96], sizes = [8, 32], strides = [1, 1]} : vector<8x128xf32> to vector<8x32xf32>
    %595 = arith.mulf %592, %554 : vector<8x32xf32>
    %596 = arith.mulf %591, %593 : vector<8x32xf32>
    %597 = arith.addf %595, %596 : vector<8x32xf32>
    %598 = math.tanh %597 : vector<8x32xf32>
    %599 = arith.mulf %594, %598 : vector<8x32xf32>
    %c6_i32_150 = arith.constant 6 : i32
    %c7_i32_151 = arith.constant 7 : i32
    %600 = arith.subi %c7_i32_151, %c6_i32_150 : i32
    %601 = arith.index_cast %600 : i32 to index
    %c0_152 = arith.constant 0 : index
    %c0_153 = arith.constant 0 : index
    %602 = vector.load %arg14[%601, %c0_152, %c0_153] : memref<8x8x32xf32, #tpu.memory_space<vmem>>, vector<1x8x32xf32>
    %603 = vector.shape_cast %602 : vector<1x8x32xf32> to vector<8x32xf32>
    %604 = vector.shape_cast %584 : vector<8x32xf32> to vector<1x8x32xf32>
    tpu.vector_store %arg14[%601, %c0_152, %c0_153], %604 {strides = array<i32>} : memref<8x8x32xf32, #tpu.memory_space<vmem>>, vector<1x8x32xf32>,
    %605 = arith.index_cast %600 : i32 to index
    %c0_154 = arith.constant 0 : index
    %c0_155 = arith.constant 0 : index
    %606 = vector.load %arg15[%605, %c0_154, %c0_155] : memref<8x8x32xf32, #tpu.memory_space<vmem>>, vector<1x8x32xf32>
    %607 = vector.shape_cast %606 : vector<1x8x32xf32> to vector<8x32xf32>
    %608 = vector.shape_cast %599 : vector<8x32xf32> to vector<1x8x32xf32>
    tpu.vector_store %arg15[%605, %c0_154, %c0_155], %608 {strides = array<i32>} : memref<8x8x32xf32, #tpu.memory_space<vmem>>, vector<1x8x32xf32>,
    %cst_156 = arith.constant dense<0.000000e+00> : vector<8x128xf32>
    %609 = tpu.matmul %584, %2, %cst_156 {dimension_numbers = #tpu.dot_dimension_numbers<[1], [0], [0], [1], [0, 0, 1, 1], [], []>} : vector<8x32xf32>, vector<32x128xf32>, vector<8x128xf32> -> vector<8x128xf32>
    %610 = arith.addf %609, %8 : vector<8x128xf32>
    %cst_157 = arith.constant dense<0.000000e+00> : vector<8x128xf32>
    %611 = tpu.matmul %599, %2, %cst_157 {dimension_numbers = #tpu.dot_dimension_numbers<[1], [0], [0], [1], [0, 0, 1, 1], [], []>} : vector<8x32xf32>, vector<32x128xf32>, vector<8x128xf32> -> vector<8x128xf32>
    %612 = arith.addf %611, %8 : vector<8x128xf32>
    %613 = arith.negf %610 : vector<8x128xf32>
    %614 = math.exp %613 : vector<8x128xf32>
    %cst_158 = arith.constant 1.000000e+00 : f32
    %615 = vector.broadcast %cst_158 : f32 to vector<8x128xf32>
    %616 = arith.addf %615, %614 : vector<8x128xf32>
    %617 = arith.divf %615, %616 : vector<8x128xf32>
    %618 = math.tanh %610 : vector<8x128xf32>
    %619 = vector.extract_strided_slice %617 {offsets = [0, 0], sizes = [8, 32], strides = [1, 1]} : vector<8x128xf32> to vector<8x32xf32>
    %620 = vector.extract_strided_slice %617 {offsets = [0, 32], sizes = [8, 32], strides = [1, 1]} : vector<8x128xf32> to vector<8x32xf32>
    %621 = vector.extract_strided_slice %618 {offsets = [0, 64], sizes = [8, 32], strides = [1, 1]} : vector<8x128xf32> to vector<8x32xf32>
    %622 = vector.extract_strided_slice %617 {offsets = [0, 96], sizes = [8, 32], strides = [1, 1]} : vector<8x128xf32> to vector<8x32xf32>
    %623 = arith.mulf %620, %582 : vector<8x32xf32>
    %624 = arith.mulf %619, %621 : vector<8x32xf32>
    %625 = arith.addf %623, %624 : vector<8x32xf32>
    %626 = math.tanh %625 : vector<8x32xf32>
    %627 = arith.mulf %622, %626 : vector<8x32xf32>
    %628 = arith.negf %612 : vector<8x128xf32>
    %629 = math.exp %628 : vector<8x128xf32>
    %cst_159 = arith.constant 1.000000e+00 : f32
    %630 = vector.broadcast %cst_159 : f32 to vector<8x128xf32>
    %631 = arith.addf %630, %629 : vector<8x128xf32>
    %632 = arith.divf %630, %631 : vector<8x128xf32>
    %633 = math.tanh %612 : vector<8x128xf32>
    %634 = vector.extract_strided_slice %632 {offsets = [0, 0], sizes = [8, 32], strides = [1, 1]} : vector<8x128xf32> to vector<8x32xf32>
    %635 = vector.extract_strided_slice %632 {offsets = [0, 32], sizes = [8, 32], strides = [1, 1]} : vector<8x128xf32> to vector<8x32xf32>
    %636 = vector.extract_strided_slice %633 {offsets = [0, 64], sizes = [8, 32], strides = [1, 1]} : vector<8x128xf32> to vector<8x32xf32>
    %637 = vector.extract_strided_slice %632 {offsets = [0, 96], sizes = [8, 32], strides = [1, 1]} : vector<8x128xf32> to vector<8x32xf32>
    %638 = arith.mulf %635, %597 : vector<8x32xf32>
    %639 = arith.mulf %634, %636 : vector<8x32xf32>
    %640 = arith.addf %638, %639 : vector<8x32xf32>
    %641 = math.tanh %640 : vector<8x32xf32>
    %642 = arith.mulf %637, %641 : vector<8x32xf32>
    %c7_i32_160 = arith.constant 7 : i32
    %c7_i32_161 = arith.constant 7 : i32
    %643 = arith.subi %c7_i32_161, %c7_i32_160 : i32
    %644 = arith.index_cast %643 : i32 to index
    %c0_162 = arith.constant 0 : index
    %c0_163 = arith.constant 0 : index
    %645 = vector.load %arg14[%644, %c0_162, %c0_163] : memref<8x8x32xf32, #tpu.memory_space<vmem>>, vector<1x8x32xf32>
    %646 = vector.shape_cast %645 : vector<1x8x32xf32> to vector<8x32xf32>
    %647 = vector.shape_cast %627 : vector<8x32xf32> to vector<1x8x32xf32>
    tpu.vector_store %arg14[%644, %c0_162, %c0_163], %647 {strides = array<i32>} : memref<8x8x32xf32, #tpu.memory_space<vmem>>, vector<1x8x32xf32>,
    %648 = arith.index_cast %643 : i32 to index
    %c0_164 = arith.constant 0 : index
    %c0_165 = arith.constant 0 : index
    %649 = vector.load %arg15[%648, %c0_164, %c0_165] : memref<8x8x32xf32, #tpu.memory_space<vmem>>, vector<1x8x32xf32>
    %650 = vector.shape_cast %649 : vector<1x8x32xf32> to vector<8x32xf32>
    %651 = vector.shape_cast %642 : vector<8x32xf32> to vector<1x8x32xf32>
    tpu.vector_store %arg15[%648, %c0_164, %c0_165], %651 {strides = array<i32>} : memref<8x8x32xf32, #tpu.memory_space<vmem>>, vector<1x8x32xf32>,
    %cst_166 = arith.constant dense<0.000000e+00> : vector<8x128xf32>
    %652 = tpu.matmul %627, %2, %cst_166 {dimension_numbers = #tpu.dot_dimension_numbers<[1], [0], [0], [1], [0, 0, 1, 1], [], []>} : vector<8x32xf32>, vector<32x128xf32>, vector<8x128xf32> -> vector<8x128xf32>
    %653 = arith.addf %652, %8 : vector<8x128xf32>
    %cst_167 = arith.constant dense<0.000000e+00> : vector<8x128xf32>
    %654 = tpu.matmul %642, %2, %cst_167 {dimension_numbers = #tpu.dot_dimension_numbers<[1], [0], [0], [1], [0, 0, 1, 1], [], []>} : vector<8x32xf32>, vector<32x128xf32>, vector<8x128xf32> -> vector<8x128xf32>
    %655 = arith.addf %654, %8 : vector<8x128xf32>
    %656 = arith.negf %653 : vector<8x128xf32>
    %657 = math.exp %656 : vector<8x128xf32>
    %cst_168 = arith.constant 1.000000e+00 : f32
    %658 = vector.broadcast %cst_168 : f32 to vector<8x128xf32>
    %659 = arith.addf %658, %657 : vector<8x128xf32>
    %660 = arith.divf %658, %659 : vector<8x128xf32>
    %661 = math.tanh %653 : vector<8x128xf32>
    %662 = vector.extract_strided_slice %660 {offsets = [0, 0], sizes = [8, 32], strides = [1, 1]} : vector<8x128xf32> to vector<8x32xf32>
    %663 = vector.extract_strided_slice %660 {offsets = [0, 32], sizes = [8, 32], strides = [1, 1]} : vector<8x128xf32> to vector<8x32xf32>
    %664 = vector.extract_strided_slice %661 {offsets = [0, 64], sizes = [8, 32], strides = [1, 1]} : vector<8x128xf32> to vector<8x32xf32>
    %665 = vector.extract_strided_slice %660 {offsets = [0, 96], sizes = [8, 32], strides = [1, 1]} : vector<8x128xf32> to vector<8x32xf32>
    %666 = arith.mulf %663, %625 : vector<8x32xf32>
    %667 = arith.mulf %662, %664 : vector<8x32xf32>
    %668 = arith.addf %666, %667 : vector<8x32xf32>
    %669 = math.tanh %668 : vector<8x32xf32>
    %670 = arith.mulf %665, %669 : vector<8x32xf32>
    %671 = arith.negf %655 : vector<8x128xf32>
    %672 = math.exp %671 : vector<8x128xf32>
    %cst_169 = arith.constant 1.000000e+00 : f32
    %673 = vector.broadcast %cst_169 : f32 to vector<8x128xf32>
    %674 = arith.addf %673, %672 : vector<8x128xf32>
    %675 = arith.divf %673, %674 : vector<8x128xf32>
    %676 = math.tanh %655 : vector<8x128xf32>
    %677 = vector.extract_strided_slice %675 {offsets = [0, 0], sizes = [8, 32], strides = [1, 1]} : vector<8x128xf32> to vector<8x32xf32>
    %678 = vector.extract_strided_slice %675 {offsets = [0, 32], sizes = [8, 32], strides = [1, 1]} : vector<8x128xf32> to vector<8x32xf32>
    %679 = vector.extract_strided_slice %676 {offsets = [0, 64], sizes = [8, 32], strides = [1, 1]} : vector<8x128xf32> to vector<8x32xf32>
    %680 = vector.extract_strided_slice %675 {offsets = [0, 96], sizes = [8, 32], strides = [1, 1]} : vector<8x128xf32> to vector<8x32xf32>
    %681 = arith.mulf %678, %640 : vector<8x32xf32>
    %682 = arith.mulf %677, %679 : vector<8x32xf32>
    %683 = arith.addf %681, %682 : vector<8x32xf32>
    %684 = math.tanh %683 : vector<8x32xf32>
    %685 = arith.mulf %680, %684 : vector<8x32xf32>
    %c8_i32_170 = arith.constant 8 : i32
    %c0_171 = arith.constant 0 : index
    %c0_172 = arith.constant 0 : index
    %c0_173 = arith.constant 0 : index
    %686 = vector.load %arg14[%c0_171, %c0_172, %c0_173] : memref<8x8x32xf32, #tpu.memory_space<vmem>>, vector<8x8x32xf32>
    %687 = vector.shape_cast %686 : vector<8x8x32xf32> to vector<64x32xf32>
    %cst_174 = arith.constant dense<0.000000e+00> : vector<64x4xf32>
    %688 = tpu.matmul %687, %3, %cst_174 {dimension_numbers = #tpu.dot_dimension_numbers<[1], [0], [0], [1], [0, 0, 1, 1], [], []>} : vector<64x32xf32>, vector<32x4xf32>, vector<64x4xf32> -> vector<64x4xf32>
    %689 = vector.broadcast %5 : vector<1x4xf32> to vector<64x4xf32>
    %690 = arith.addf %688, %689 : vector<64x4xf32>
    %691 = vector.shape_cast %690 : vector<64x4xf32> to vector<8x8x4xf32>
    %c0_175 = arith.constant 0 : index
    %c0_176 = arith.constant 0 : index
    %c0_177 = arith.constant 0 : index
    %692 = vector.load %arg15[%c0_175, %c0_176, %c0_177] : memref<8x8x32xf32, #tpu.memory_space<vmem>>, vector<8x8x32xf32>
    %693 = vector.shape_cast %692 : vector<8x8x32xf32> to vector<64x32xf32>
    %cst_178 = arith.constant dense<0.000000e+00> : vector<64x4xf32>
    %694 = tpu.matmul %693, %3, %cst_178 {dimension_numbers = #tpu.dot_dimension_numbers<[1], [0], [0], [1], [0, 0, 1, 1], [], []>} : vector<64x32xf32>, vector<32x4xf32>, vector<64x4xf32> -> vector<64x4xf32>
    %695 = vector.broadcast %5 : vector<1x4xf32> to vector<64x4xf32>
    %696 = arith.addf %694, %695 : vector<64x4xf32>
    %697 = vector.shape_cast %696 : vector<64x4xf32> to vector<8x8x4xf32>
    %698 = vector.extract_strided_slice %691 {offsets = [7, 0, 0], sizes = [1, 8, 4], strides = [1, 1, 1]} : vector<8x8x4xf32> to vector<1x8x4xf32>
    %699 = vector.shape_cast %698 : vector<1x8x4xf32> to vector<8x4xf32>
    %c0_179 = arith.constant 0 : index
    %c0_180 = arith.constant 0 : index
    %700 = vector.load %arg10[%c0_179, %c0_180] : memref<16x4xf32, #tpu.memory_space<vmem>>, vector<8x4xf32>
    tpu.vector_store %arg10[%c0_179, %c0_180], %699 {strides = array<i32>} : memref<16x4xf32, #tpu.memory_space<vmem>>, vector<8x4xf32>,
    %701 = vector.extract_strided_slice %697 {offsets = [7, 0, 0], sizes = [1, 8, 4], strides = [1, 1, 1]} : vector<8x8x4xf32> to vector<1x8x4xf32>
    %702 = vector.shape_cast %701 : vector<1x8x4xf32> to vector<8x4xf32>
    %c8_181 = arith.constant 8 : index
    %c0_182 = arith.constant 0 : index
    %703 = vector.load %arg10[%c8_181, %c0_182] : memref<16x4xf32, #tpu.memory_space<vmem>>, vector<8x4xf32>
    tpu.vector_store %arg10[%c8_181, %c0_182], %702 {strides = array<i32>} : memref<16x4xf32, #tpu.memory_space<vmem>>, vector<8x4xf32>,
    %704 = vector.extract_strided_slice %9 {offsets = [0, 0, 0], sizes = [8, 8, 4], strides = [1, 1, 1]} : vector<8x16x4xf32> to vector<8x8x4xf32>
    %705 = vector.extract_strided_slice %9 {offsets = [0, 8, 0], sizes = [8, 8, 4], strides = [1, 1, 1]} : vector<8x16x4xf32> to vector<8x8x4xf32>
    %706 = arith.mulf %691, %691 : vector<8x8x4xf32>
    %707 = arith.mulf %704, %704 : vector<8x8x4xf32>
    %708 = arith.subf %706, %707 : vector<8x8x4xf32>
    %709 = math.absf %708 : vector<8x8x4xf32>
    %cst_183 = arith.constant dense<0.000000e+00> : vector<8x4xf32>
    %710 = vector.multi_reduction <add>, %709, %cst_183 [0] : vector<8x8x4xf32> to vector<8x4xf32>
    %cst_184 = arith.constant dense<0.000000e+00> : vector<8xf32>
    %711 = vector.multi_reduction <add>, %710, %cst_184 [1] : vector<8x4xf32> to vector<8xf32>
    %712 = vector.shape_cast %711 : vector<8xf32> to vector<8x1xf32>
    %713 = arith.mulf %697, %697 : vector<8x8x4xf32>
    %714 = arith.mulf %705, %705 : vector<8x8x4xf32>
    %715 = arith.subf %713, %714 : vector<8x8x4xf32>
    %716 = math.absf %715 : vector<8x8x4xf32>
    %cst_185 = arith.constant dense<0.000000e+00> : vector<8x4xf32>
    %717 = vector.multi_reduction <add>, %716, %cst_185 [0] : vector<8x8x4xf32> to vector<8x4xf32>
    %cst_186 = arith.constant dense<0.000000e+00> : vector<8xf32>
    %718 = vector.multi_reduction <add>, %717, %cst_186 [1] : vector<8x4xf32> to vector<8xf32>
    %719 = vector.shape_cast %718 : vector<8xf32> to vector<8x1xf32>
    %c0_187 = arith.constant 0 : index
    %c0_188 = arith.constant 0 : index
    %720 = vector.load %arg11[%c0_187, %c0_188] : memref<16x1xf32, #tpu.memory_space<vmem>>, vector<8x1xf32>
    tpu.vector_store %arg11[%c0_187, %c0_188], %712 {strides = array<i32>} : memref<16x1xf32, #tpu.memory_space<vmem>>, vector<8x1xf32>,
    %c8_189 = arith.constant 8 : index
    %c0_190 = arith.constant 0 : index
    %721 = vector.load %arg11[%c8_189, %c0_190] : memref<16x1xf32, #tpu.memory_space<vmem>>, vector<8x1xf32>
    tpu.vector_store %arg11[%c8_189, %c0_190], %719 {strides = array<i32>} : memref<16x1xf32, #tpu.memory_space<vmem>>, vector<8x1xf32>,
    return
  }
  func.func @transform_0(%arg0: i32) -> (i32, i32, i32) {
    %c0_i32 = arith.constant 0 : i32
    %c0_i32_0 = arith.constant 0 : i32
    %c0_i32_1 = arith.constant 0 : i32
    return %c0_i32, %arg0, %c0_i32_0 : i32, i32, i32
  }
  func.func @transform_1(%arg0: i32) -> (i32, i32) {
    %c0_i32 = arith.constant 0 : i32
    %c0_i32_0 = arith.constant 0 : i32
    %c0_i32_1 = arith.constant 0 : i32
    return %c0_i32, %c0_i32_0 : i32, i32
  }
  func.func @transform_2(%arg0: i32) -> (i32, i32) {
    %c0_i32 = arith.constant 0 : i32
    %c0_i32_0 = arith.constant 0 : i32
    %c0_i32_1 = arith.constant 0 : i32
    return %c0_i32, %c0_i32_0 : i32, i32
  }
  func.func @transform_3(%arg0: i32) -> (i32, i32) {
    %c0_i32 = arith.constant 0 : i32
    %c0_i32_0 = arith.constant 0 : i32
    %c0_i32_1 = arith.constant 0 : i32
    return %c0_i32, %c0_i32_0 : i32, i32
  }
  func.func @transform_4(%arg0: i32) -> (i32, i32) {
    %c0_i32 = arith.constant 0 : i32
    %c0_i32_0 = arith.constant 0 : i32
    %c0_i32_1 = arith.constant 0 : i32
    return %c0_i32, %c0_i32_0 : i32, i32
  }
  func.func @transform_5(%arg0: i32) -> (i32, i32) {
    %c0_i32 = arith.constant 0 : i32
    %c0_i32_0 = arith.constant 0 : i32
    %c0_i32_1 = arith.constant 0 : i32
    return %c0_i32, %c0_i32_0 : i32, i32
  }
  func.func @transform_6(%arg0: i32) -> (i32, i32) {
    %c0_i32 = arith.constant 0 : i32
    %c0_i32_0 = arith.constant 0 : i32
    %c0_i32_1 = arith.constant 0 : i32
    return %c0_i32, %c0_i32_0 : i32, i32
  }
  func.func @transform_7(%arg0: i32) -> (i32, i32) {
    %c0_i32 = arith.constant 0 : i32
    %c0_i32_0 = arith.constant 0 : i32
    %c0_i32_1 = arith.constant 0 : i32
    return %c0_i32, %c0_i32_0 : i32, i32
  }
  func.func @transform_8(%arg0: i32) -> (i32, i32) {
    %c0_i32 = arith.constant 0 : i32
    %c0_i32_0 = arith.constant 0 : i32
    return %arg0, %c0_i32 : i32, i32
  }
  func.func @transform_9(%arg0: i32) -> (i32, i32) {
    %c0_i32 = arith.constant 0 : i32
    %c0_i32_0 = arith.constant 0 : i32
    return %arg0, %c0_i32 : i32, i32
  }
  func.func @transform_10(%arg0: i32) -> (i32, i32) {
    %c0_i32 = arith.constant 0 : i32
    %c0_i32_0 = arith.constant 0 : i32
    return %arg0, %c0_i32 : i32, i32
  }
}

</mosaic_0001>

<bundles_post_ra>
// kernel: tpu_custom_call.1
= control target key start
LH: loop header
LB: loop body
LE: loop exit
PB: predicated region body
PF: predicated region fallthrough
CT: control target
= control target key end

     0   :  { %vm126_vm0 = vcmask 1043456   ;;  %vm77_vm1 = vcmask 31744   ;;  %v4654_v2 = vmov 0.0   ;;  %s5600_s0 = inlined_call_operand.vmem [shape: f32[8,16,4], index: 0, kind: input, shape index: {}]   ;;  %s5601_s1 = inlined_call_operand.vmem [shape: f32[4,128], index: 1, kind: input, shape index: {}]   ;;  %s5602_s2 = inlined_call_operand.vmem [shape: f32[32,128], index: 2, kind: input, shape index: {}]   ;;  %s5603_s3 = inlined_call_operand.vmem [shape: f32[1,128], index: 3, kind: input, shape index: {}]   ;;  %s5604_s4 = inlined_call_operand.vmem [shape: f32[32,128], index: 4, kind: input, shape index: {}]   ;;  %s5605_s5 = inlined_call_operand.vmem [shape: f32[1,128], index: 5, kind: input, shape index: {}]   ;;  %s5606_s6 = inlined_call_operand.vmem [shape: f32[32,4], index: 6, kind: input, shape index: {}]   ;;  %s5607_s7 = inlined_call_operand.vmem [shape: f32[1,4], index: 7, kind: input, shape index: {}]   ;;  %s5608_s8 = inlined_call_operand.hbm [shape: f32[16,32], index: 8, kind: output, shape index: {0}]   ;;  %s5609_s9 = inlined_call_operand.vmem [shape: f32[16,4], index: 9, kind: output, shape index: {1}]   ;;  %s5610_s10 = inlined_call_operand.vmem [shape: f32[16,1], index: 10, kind: output, shape index: {2}]  }
   0x1   :  { %v33_v0 = vld [vmem:[%s5601_s1] sm:$0xf]  ;;  %4008 = vmatprep.subr.mxu1 %v4654_v2  ;;  %v4727_v3 = vld [vmem:[%s5602_s2 + $0x18] sm:$0xff]  ;;  %v56_v4 = vld [vmem:[%s5600_s0 + $0x8] sm:$0xff] }
   0x2   :  { %v55_v1 = vld [vmem:[%s5600_s0] sm:$0xff]  ;;  %3982 = vmatprep.subr.msk.mxu0 %vm126_vm0, %v33_v0  ;;  %v4736_v5 = vld [vmem:[%s5602_s2 + $0x10] sm:$0xff] }
   0x3   :  { %3983 = vmatpush3.msk.msra.mxu0 %vm126_vm0, %v33_v0  ;;  %3984 = vmatprep.mubr.msk.f32.mxu0 %vm77_vm1, %v55_v1 }
   0x4   :  { %16 = vsyncpa [#allocation7], 0  ;;  %4009 = vmatpush3.msra.mxu1 %v4727_v3  ;;  %3985 = vmatmul.mubr.msk.f32.vlgmr.msra.gmra.mxu0 %vm77_vm1, %v56_v4  ;;  %v4744_v6 = vld [vmem:[%s5602_s2 + $0x8] sm:$0xff]  ;;  %vm4655_vm2 = vmmov 0   ;;  %v4754_v7 = vld [vmem:[%s5602_s2] sm:$0xff]  ;;  %s4656_s27 = smov 64  }
   0x5   :  { %4010 = vmatprep.subr.mxu1 %v4654_v2  ;;  %4016 = vmatprep.mubr.msk.f32.mxu1 %vm4655_vm2, %v4654_v2  ;;  %v4782_v9 = vld [vmem:[%s5603_s3] ss:$0 sm:$0xff]  ;;  %s4657_s28 = smov 32   ;;  %v57_v37 = vld [vmem:[%s5600_s0 + $0x10] sm:$0xff]  ;;  %v58_v38 = vld [vmem:[%s5600_s0 + $0x18] sm:$0xff]  ;;  %vm292_vm3 = vcmask 261120  }
   0x6   :  { %4011 = vmatpush3.msra.mxu1 %v4736_v5  ;;  %4052 = vmatprep.subr.mxu0 %v4654_v2  ;;  %vm3675_vm4 = vcmask 7168   ;;  %s4659_s1 = smov [#allocation6]  }
   0x7   :  { %4012 = vmatprep.subr.mxu1 %v4654_v2  ;;  %4053 = vmatpush3.msra.mxu0 %v4727_v3  ;;  %s3683_s21 = sshll.u32 %s4659_s1, 4  ;;  %s3684_s21 = int_to_ptr.vmem [resolvable:$true] %s3683_s21 }
   0x8   :  { %4013 = vmatpush3.msra.mxu1 %v4744_v6  ;;  %4054 = vmatprep.subr.mxu0 %v4654_v2  ;;  %s4632_s24 = scalar_lea.vmem %s3684_s21, 256  ;;  %p4637_p1 = scmp.lt.s32.totalorder %s3684_s21, %s3684_s21 }
   0x9   :  { %4014 = vmatprep.subr.mxu1 %v4654_v2  ;;  %4055 = vmatpush3.msra.mxu0 %v4736_v5  ;;  %p4633_p0 = scmp.ne.s32.totalorder %s3684_s21, %s4632_s24  ;;  %p4638_p2 = scmp.lt.s32.totalorder %s4632_s24, %s4632_s24 }
   0xa   :  { %4015 = vmatpush3.msra.mxu1 %v4754_v7  ;;  %4056 = vmatprep.subr.mxu0 %v4654_v2 }
   0xb   :  { %4017 = vmatmul.mubr.f32.vlgmr.msra.gmra.mxu1 %v4654_v2  ;;  %4019 = vmatprep.subr.mxu1 %v4654_v2  ;;  %p4639_p3 = por %p4638_p2, %p4637_p1 }
   0xc   :  { %4020 = vmatpush3.msra.mxu1 %v4727_v3  ;;  %4027 = vmatprep.mubr.msk.f32.mxu1 %vm4655_vm2, %v4654_v2 }
   0xd   :  { %4021 = vmatprep.subr.mxu1 %v4654_v2  ;;  %4057 = vmatpush3.msra.mxu0 %v4744_v6  ;;  %p4640_p4 = pnand %p4639_p3, %p4633_p0 }
   0xe   :  { %4022 = vmatpush3.msra.mxu1 %v4736_v5  ;;  %4058 = vmatprep.subr.mxu0 %v4654_v2 }
   0xf   :  { %4023 = vmatprep.subr.mxu1 %v4654_v2  ;;  %4059 = vmatpush3.msra.mxu0 %v4754_v7 }
  0x10   :  { %4024 = vmatpush3.msra.mxu1 %v4744_v6  ;;  %4074 = vmatprep.subr.mxu0 %v4654_v2 }
  0x11   :  { %4025 = vmatprep.subr.mxu1 %v4654_v2  ;;  %3987 = vmatprep.mubr.msk.f32.mxu0 %vm77_vm1, %v57_v37 }
  0x12   :  { %4026 = vmatpush3.msra.mxu1 %v4754_v7  ;;  %3988 = vmatmul.mubr.msk.f32.gmra.mxu0 %vm77_vm1, %v58_v38 }
  0x13   :  { %4030 = vmatprep.subr.mxu1 %v4654_v2 }
  0xc4   :  { %v3986_v8 = vpop.f32.mrf.mxu0 }
  0xc5   :  { %v202_v13 = vadd.f32 %v3986_v8, %v4782_v9 }
  0xc6   :  { %v196_v10 = vpop.f32.mrf.mxu0 }
  0xc7   :  { %v197_v11 = vadd.f32 %v4782_v9, %v196_v10 }
  0xcb   :  { %v362_v12 = vpop.f32.mrf.mxu1 }
  0xcc   :  { %v366_v14 = vadd.f32 %v362_v12, %v197_v11  ;;  %v368_v16 = vadd.f32 %v362_v12, %v202_v13 }
  0xcd   :  { %v4018_v15 = vpop.f32.mrf.mxu1 }
  0xce   :  { %4375 = vtanh.f32 %v366_v14  ;;  %v3721_v19 = vmul.f32 -1.442695, %v366_v14  ;;  %v3722_v20 = vmul.f32 -1.442695, %v368_v16 }
  0xcf   :  { %4377 = vtanh.f32 %v368_v16 }
  0xd0   :  { %4379 = vpow2.f32 %v3721_v19  ;;  %v59_v19 = vld [vmem:[%s5600_s0 + $0x20] sm:$0xff] }
  0xd1   :  { %4381 = vpow2.f32 %v3722_v20  ;;  %v60_v20 = vld [vmem:[%s5600_s0 + $0x28] sm:$0xff]  ;;  %3990 = vmatprep.mubr.msk.f32.mxu0 %vm77_vm1, %v59_v19 }
  0xd2   :  { %v3989_v47 = vpop.f32.mrf.mxu0  ;;  %3991 = vmatmul.mubr.msk.f32.gmra.mxu0 %vm77_vm1, %v60_v20 }
  0xd3   :  { %v212_v53 = vadd.f32 %v3989_v47, %v4782_v9 }
  0xd4   :  { %v206_v48 = vpop.f32.mrf.mxu0 }
  0xd5   :  { %v207_v49 = vadd.f32 %v4782_v9, %v206_v48 }
  0xdb   :  { %v4376_v17 = vpop.eup %4375 }
  0xdc   :  { %378 = vrot.lane.b32.xlu0 %v4376_v17, %s4656_s27  ;;  %v4378_v18 = vpop.eup %4377 }
  0xdd   :  { %v4380_v21 = vpop.eup %4379 }
  0xde   :  { %v372_v22 = vadd.f32 1.0, %v4380_v21  ;;  %v4382_v23 = vpop.eup %4381  ;;  %v61_v21 = vld [vmem:[%s5600_s0 + $0x30] sm:$0xff] }
  0xdf   :  { %v396_v24 = vadd.f32 1.0, %v4382_v23  ;;  %3993 = vmatprep.mubr.msk.f32.mxu0 %vm77_vm1, %v61_v21  ;;  %v62_v23 = vld [vmem:[%s5600_s0 + $0x38] sm:$0xff] }
  0xe0   :  { %402 = vrot.lane.b32.xlu0 %v4378_v18, %s4656_s27  ;;  %4383 = vrcp.f32 %v372_v22  ;;  %3994 = vmatmul.mubr.msk.f32.gmra.mxu0 %vm77_vm1, %v62_v23 }
  0xe1   :  { %4385 = vrcp.f32 %v396_v24  ;;  %v63_v24 = vld [vmem:[%s5600_s0 + $0x40] sm:$0xff] }
  0xe2   :  { %3996 = vmatprep.mubr.msk.f32.mxu0 %vm77_vm1, %v63_v24 }
  0xed   :  { %v4384_v25 = vpop.eup %4383 }
  0xee   :  { %v4386_v28 = vpop.eup %4385  ;;  %v376_v31 = vmul.f32 0.0, %v4384_v25 }
  0xef   :  { %v400_v34 = vmul.f32 0.0, %v4386_v28 }
 0x14e   :  { %v379_v26 = vpop.permute.xlu0 %378 }
 0x14f   :  { %v381_v27 = vmul.f32 %v4384_v25, %v379_v26  ;;  %v65_v26 = vld [vmem:[%s5600_s0 + $0x50] sm:$0xff] }
 0x151   :  { %383 = vrot.lane.b32.xlu1 %v381_v27, %s4657_s28 }
 0x152   :  { %v403_v29 = vpop.permute.xlu0 %402 }
 0x153   :  { %v405_v30 = vmul.f32 %v4386_v28, %v403_v29  ;;  %v67_v29 = vld [vmem:[%s5600_s0 + $0x60] sm:$0xff] }
 0x155   :  { %407 = vrot.lane.b32.xlu1 %v405_v30, %s4657_s28  ;;  %v68_v30 = vld [vmem:[%s5600_s0 + $0x68] sm:$0xff] }
 0x1c3   :  { %v384_v32 = vpop.permute.xlu1 %383 }
 0x1c4   :  { %v4790_v33 = vadd.f32 %v384_v32, %v376_v31  ;;  %v69_v31 = vld [vmem:[%s5600_s0 + $0x70] sm:$0xff]  ;;  %v70_v32 = vld [vmem:[%s5600_s0 + $0x78] sm:$0xff] }
 0x1c6   :  { %4387 = vtanh.f32 %v4790_v33 }
 0x1c7   :  { %v408_v35 = vpop.permute.xlu1 %407 }
 0x1c8   :  { %v4793_v36 = vadd.f32 %v408_v35, %v400_v34 }
 0x1ca   :  { %4389 = vtanh.f32 %v4793_v36 }
 0x1d3   :  { %v4388_v39 = vpop.eup %4387 }
 0x1d4   :  { %389 = vrot.lane.b32.xlu0 %v4388_v39, %s4656_s27  ;;  %v3992_v39 = vpop.f32.mrf.mxu0 }
 0x1d7   :  { %v4390_v40 = vpop.eup %4389 }
 0x1d8   :  { %413 = vrot.lane.b32.xlu1 %v4390_v40, %s4656_s27  ;;  %v216_v40 = vpop.f32.mrf.mxu0 }
 0x246   :  { %v390_v41 = vpop.permute.xlu0 %389 }
 0x247   :  { %v392_v42 = vmul.f32 %v4384_v25, %v390_v41  ;;  %v64_v25 = vld [vmem:[%s5600_s0 + $0x48] sm:$0xff]  ;;  %v4920_v41 = vpop.f32.mrf.mxu0 }
 0x248   :  { %3997 = vmatmul.mubr.msk.f32.gmra.mxu0 %vm77_vm1, %v64_v25 }
 0x249   :  { %420 = vrot.lane.b32.xlu0 %v392_v42, %s4657_s28  ;;  %3999 = vmatprep.mubr.msk.f32.mxu0 %vm77_vm1, %v65_v26  ;;  %v4922_v42 = vpop.f32.mrf.mxu0 }
 0x24a   :  { %v414_v43 = vpop.permute.xlu1 %413 }
 0x24b   :  { %v416_v44 = vmul.f32 %v4386_v28, %v414_v43  ;;  %v66_v28 = vld [vmem:[%s5600_s0 + $0x58] sm:$0xff] }
 0x24c   :  { %4000 = vmatmul.mubr.msk.f32.gmra.mxu0 %vm77_vm1, %v66_v28 }
 0x24d   :  { %498 = vrot.lane.b32.xlu1 %v416_v44, %s4657_s28  ;;  %4002 = vmatprep.mubr.msk.f32.mxu0 %vm77_vm1, %v67_v29  ;;  %v227_v29 = vadd.f32 %v4782_v9, %v4922_v42 }
 0x250   :  { %4003 = vmatmul.mubr.msk.f32.gmra.mxu0 %vm77_vm1, %v68_v30 }
 0x251   :  { %4005 = vmatprep.mubr.msk.f32.mxu0 %vm77_vm1, %v69_v31 }
 0x254   :  { %4006 = vmatmul.mubr.msk.f32.gmra.mxu0 %vm77_vm1, %v70_v32 }
 0x255   :  { %4060 = vmatprep.mubr.msk.f32.mxu0 %vm4655_vm2, %v4654_v2 }
 0x2bb   :  { %v421_v45 = vpop.permute.xlu0 %420 }
 0x2bc   :  { %4028 = vmatmul.mubr.msk.f32.vlgmr.msra.gmra.mxu1 %vm292_vm3, %v421_v45 }
 0x2bd   :  { %4031 = vmatpush3.msra.mxu1 %v4727_v3  ;;  %4038 = vmatprep.mubr.msk.f32.mxu1 %vm4655_vm2, %v4654_v2 }
 0x2be   :  { %4032 = vmatprep.subr.mxu1 %v4654_v2 }
 0x2bf   :  { %4033 = vmatpush3.msra.mxu1 %v4736_v5  ;;  %v499_v46 = vpop.permute.xlu1 %498 }
 0x2c0   :  { %4034 = vmatprep.subr.mxu1 %v4654_v2 }
 0x2c1   :  { %4035 = vmatpush3.msra.mxu1 %v4744_v6 }
 0x2c2   :  { %4036 = vmatprep.subr.mxu1 %v4654_v2 }
 0x2c3   :  { %4037 = vmatpush3.msra.mxu1 %v4754_v7 }
 0x2c4   :  { %4039 = vmatmul.mubr.msk.f32.vlgmr.msra.gmra.mxu1 %vm292_vm3, %v499_v46  ;;  %4041 = vmatprep.subr.mxu1 %v4654_v2 }
 0x2c5   :  { %4042 = vmatpush3.msra.mxu1 %v4727_v3  ;;  %4049 = vmatprep.mubr.msk.f32.mxu1 %vm4655_vm2, %v4654_v2 }
 0x2c6   :  { %4043 = vmatprep.subr.mxu1 %v4654_v2 }
 0x2c7   :  { %4044 = vmatpush3.msra.mxu1 %v4736_v5 }
 0x2c8   :  { %4045 = vmatprep.subr.mxu1 %v4654_v2 }
 0x2c9   :  { %4046 = vmatpush3.msra.mxu1 %v4744_v6 }
 0x2ca   :  { %4047 = vmatprep.subr.mxu1 %v4654_v2 }
 0x2cb   :  { %4048 = vmatpush3.msra.mxu1 %v4754_v7 }
 0x2cc   :  { %4063 = vmatprep.subr.mxu1 %v4654_v2 }
 0x308   :  { %v4924_v43 = vpop.f32.mrf.mxu0 }
 0x30a   :  { %v4926_v44 = vpop.f32.mrf.mxu0 }
 0x30c   :  { %v4928_v45 = vpop.f32.mrf.mxu0 }
 0x30e   :  { %v4930_v46 = vpop.f32.mrf.mxu0 }
 0x310   :  { %v4932_v47 = vpop.f32.mrf.mxu0 }
 0x312   :  { %v4934_v48 = vpop.f32.mrf.mxu0 }
 0x37c   :  { %v490_v50 = vpop.f32.mrf.mxu1 }
 0x37d   :  { %v494_v51 = vadd.f32 %v490_v50, %v207_v49  ;;  %v217_v49 = vadd.f32 %v4782_v9, %v216_v40 }
 0x37e   :  { %v4029_v52 = vpop.f32.mrf.mxu1 }
 0x37f   :  { %4391 = vtanh.f32 %v494_v51  ;;  %v3725_v59 = vmul.f32 -1.442695, %v494_v51  ;;  %v4937_v52 = vpop.f32.mrf.mxu0 }
 0x384   :  { %v568_v54 = vpop.f32.mrf.mxu1 }
 0x385   :  { %v572_v55 = vadd.f32 %v568_v54, %v212_v53  ;;  %v4939_v54 = vpop.f32.mrf.mxu0 }
 0x386   :  { %v4040_v56 = vpop.f32.mrf.mxu1 }
 0x387   :  { %4393 = vtanh.f32 %v572_v55  ;;  %v3726_v60 = vmul.f32 -1.442695, %v572_v55  ;;  %v222_v55 = vadd.f32 %v3992_v39, %v4782_v9 }
 0x388   :  { %4395 = vpow2.f32 %v3725_v59 }
 0x389   :  { %4397 = vpow2.f32 %v3726_v60 }
 0x38c   :  { %v4392_v57 = vpop.eup %4391 }
 0x38d   :  { %582 = vrot.lane.b32.xlu0 %v4392_v57, %s4656_s27 }
 0x394   :  { %v4394_v58 = vpop.eup %4393 }
 0x395   :  { %606 = vrot.lane.b32.xlu1 %v4394_v58, %s4656_s27  ;;  %v4396_v61 = vpop.eup %4395 }
 0x396   :  { %v576_v62 = vadd.f32 1.0, %v4396_v61  ;;  %v4398_v63 = vpop.eup %4397 }
 0x397   :  { %v600_v0 = vadd.f32 1.0, %v4398_v63 }
 0x398   :  { %4399 = vrcp.f32 %v576_v62 }
 0x399   :  { %4401 = vrcp.f32 %v600_v0 }
 0x3a5   :  { %v4400_v1 = vpop.eup %4399 }
 0x3a6   :  { %v4402_v10 = vpop.eup %4401  ;;  %v580_v13 = vmul.f32 %v4400_v1, %v4790_v33 }
 0x3a7   :  { %v604_v16 = vmul.f32 %v4402_v10, %v4793_v36 }
 0x3ff   :  { %v583_v4 = vpop.permute.xlu0 %582 }
 0x400   :  { %v585_v8 = vmul.f32 %v4400_v1, %v583_v4 }
 0x402   :  { %587 = vrot.lane.b32.xlu0 %v585_v8, %s4657_s28 }
 0x407   :  { %v607_v11 = vpop.permute.xlu1 %606 }
 0x408   :  { %v609_v12 = vmul.f32 %v4402_v10, %v607_v11 }
 0x40a   :  { %611 = vrot.lane.b32.xlu1 %v609_v12, %s4657_s28 }
 0x474   :  { %v588_v14 = vpop.permute.xlu0 %587 }
 0x475   :  { %v4837_v15 = vadd.f32 %v588_v14, %v580_v13 }
 0x477   :  { %4403 = vtanh.f32 %v4837_v15 }
 0x47c   :  { %v612_v17 = vpop.permute.xlu1 %611 }
 0x47d   :  { %v4841_v18 = vadd.f32 %v612_v17, %v604_v16 }
 0x47f   :  { %4405 = vtanh.f32 %v4841_v18 }
 0x484   :  { %v4404_v22 = vpop.eup %4403 }
 0x485   :  { %593 = vrot.lane.b32.xlu0 %v4404_v22, %s4656_s27 }
 0x48c   :  { %v4406_v27 = vpop.eup %4405 }
 0x48d   :  { %617 = vrot.lane.b32.xlu1 %v4406_v27, %s4656_s27 }
 0x4f7   :  { %v594_v33 = vpop.permute.xlu0 %593 }
 0x4f8   :  { %v596_v34 = vmul.f32 %v4400_v1, %v594_v33  ;;  %v232_v33 = vadd.f32 %v4920_v41, %v4782_v9 }
 0x4fa   :  { %624 = vrot.lane.b32.xlu0 %v596_v34, %s4657_s28 }
 0x4ff   :  { %v618_v35 = vpop.permute.xlu1 %617 }
 0x500   :  { %v620_v36 = vmul.f32 %v4402_v10, %v618_v35 }
 0x502   :  { %702 = vrot.lane.b32.xlu1 %v620_v36, %s4657_s28 }
 0x56c   :  { %v625_v37 = vpop.permute.xlu0 %624 }
 0x56d   :  { %4050 = vmatmul.mubr.msk.f32.vlgmr.msra.gmra.mxu1 %vm292_vm3, %v625_v37 }
 0x56e   :  { %4064 = vmatpush3.msra.mxu1 %v4727_v3  ;;  %4071 = vmatprep.mubr.msk.f32.mxu1 %vm4655_vm2, %v4654_v2 }
 0x56f   :  { %4065 = vmatprep.subr.mxu1 %v4654_v2 }
 0x570   :  { %4066 = vmatpush3.msra.mxu1 %v4736_v5 }
 0x571   :  { %4067 = vmatprep.subr.mxu1 %v4654_v2 }
 0x572   :  { %4068 = vmatpush3.msra.mxu1 %v4744_v6 }
 0x573   :  { %4069 = vmatprep.subr.mxu1 %v4654_v2 }
 0x574   :  { %v703_v38 = vpop.permute.xlu1 %702  ;;  %4070 = vmatpush3.msra.mxu1 %v4754_v7 }
 0x575   :  { %4061 = vmatmul.mubr.msk.f32.vlgmr.msra.gmra.mxu0 %vm292_vm3, %v703_v38  ;;  %4085 = vmatprep.subr.mxu1 %v4654_v2 }
 0x576   :  { %4075 = vmatpush3.msra.mxu0 %v4727_v3  ;;  %4082 = vmatprep.mubr.msk.f32.mxu0 %vm4655_vm2, %v4654_v2 }
 0x577   :  { %4076 = vmatprep.subr.mxu0 %v4654_v2 }
 0x578   :  { %4077 = vmatpush3.msra.mxu0 %v4736_v5 }
 0x579   :  { %4078 = vmatprep.subr.mxu0 %v4654_v2 }
 0x57a   :  { %4079 = vmatpush3.msra.mxu0 %v4744_v6 }
 0x57b   :  { %4080 = vmatprep.subr.mxu0 %v4654_v2 }
 0x57c   :  { %4081 = vmatpush3.msra.mxu0 %v4754_v7 }
 0x57d   :  { %4096 = vmatprep.subr.mxu0 %v4654_v2 }
 0x62d   :  { %v694_v50 = vpop.f32.mrf.mxu1 }
 0x62e   :  { %v698_v51 = vadd.f32 %v694_v50, %v217_v49 }
 0x62f   :  { %v4051_v53 = vpop.f32.mrf.mxu1 }
 0x630   :  { %4407 = vtanh.f32 %v698_v51  ;;  %v3729_v61 = vmul.f32 -1.442695, %v698_v51 }
 0x635   :  { %v772_v56 = vpop.f32.mrf.mxu0 }
 0x636   :  { %v776_v57 = vadd.f32 %v772_v56, %v222_v55 }
 0x637   :  { %v4062_v58 = vpop.f32.mrf.mxu0 }
 0x638   :  { %4409 = vtanh.f32 %v776_v57  ;;  %v3730_v62 = vmul.f32 -1.442695, %v776_v57 }
 0x639   :  { %4411 = vpow2.f32 %v3729_v61 }
 0x63a   :  { %4413 = vpow2.f32 %v3730_v62 }
 0x63d   :  { %v4408_v59 = vpop.eup %4407 }
 0x63e   :  { %786 = vrot.lane.b32.xlu0 %v4408_v59, %s4656_s27 }
 0x645   :  { %v4410_v60 = vpop.eup %4409 }
 0x646   :  { %810 = vrot.lane.b32.xlu1 %v4410_v60, %s4656_s27  ;;  %v4412_v63 = vpop.eup %4411 }
 0x647   :  { %v780_v0 = vadd.f32 1.0, %v4412_v63  ;;  %v4414_v1 = vpop.eup %4413 }
 0x648   :  { %v804_v4 = vadd.f32 1.0, %v4414_v1 }
 0x649   :  { %4415 = vrcp.f32 %v780_v0 }
 0x64a   :  { %4417 = vrcp.f32 %v804_v4 }
 0x656   :  { %v4416_v8 = vpop.eup %4415 }
 0x657   :  { %v4418_v12 = vpop.eup %4417  ;;  %v784_v16 = vmul.f32 %v4416_v8, %v4837_v15 }
 0x658   :  { %v808_v20 = vmul.f32 %v4418_v12, %v4841_v18 }
 0x6b0   :  { %v787_v10 = vpop.permute.xlu0 %786 }
 0x6b1   :  { %v789_v11 = vmul.f32 %v4416_v8, %v787_v10 }
 0x6b3   :  { %791 = vrot.lane.b32.xlu0 %v789_v11, %s4657_s28 }
 0x6b8   :  { %v811_v13 = vpop.permute.xlu1 %810 }
 0x6b9   :  { %v813_v14 = vmul.f32 %v4418_v12, %v811_v13 }
 0x6bb   :  { %815 = vrot.lane.b32.xlu1 %v813_v14, %s4657_s28 }
 0x725   :  { %v792_v17 = vpop.permute.xlu0 %791 }
 0x726   :  { %v4947_v19 = vadd.f32 %v792_v17, %v784_v16  ;;  %v237_v16 = vadd.f32 %v4782_v9, %v4926_v44 }
 0x728   :  { %4419 = vtanh.f32 %v4947_v19 }
 0x72d   :  { %v816_v21 = vpop.permute.xlu1 %815 }
 0x72e   :  { %v4951_v22 = vadd.f32 %v816_v21, %v808_v20  ;;  %v242_v21 = vadd.f32 %v4924_v43, %v4782_v9 }
 0x730   :  { %4421 = vtanh.f32 %v4951_v22 }
 0x735   :  { %v4420_v23 = vpop.eup %4419 }
 0x736   :  { %797 = vrot.lane.b32.xlu0 %v4420_v23, %s4656_s27 }
 0x73d   :  { %v4422_v24 = vpop.eup %4421 }
 0x73e   :  { %821 = vrot.lane.b32.xlu1 %v4422_v24, %s4656_s27 }
 0x7a8   :  { %v798_v25 = vpop.permute.xlu0 %797 }
 0x7a9   :  { %v800_v15 = vmul.f32 %v4416_v8, %v798_v25 }
 0x7ab   :  { %828 = vrot.lane.b32.xlu0 %v800_v15, %s4657_s28 }
 0x7b0   :  { %v822_v26 = vpop.permute.xlu1 %821 }
 0x7b1   :  { %v824_v27 = vmul.f32 %v4418_v12, %v822_v26 }
 0x7b3   :  { %906 = vrot.lane.b32.xlu1 %v824_v27, %s4657_s28 }
 0x81d   :  { %v829_v18 = vpop.permute.xlu0 %828 }
 0x81e   :  { %4072 = vmatmul.mubr.msk.f32.vlgmr.msra.gmra.mxu1 %vm292_vm3, %v829_v18 }
 0x81f   :  { %4086 = vmatpush3.msra.mxu1 %v4727_v3  ;;  %4093 = vmatprep.mubr.msk.f32.mxu1 %vm4655_vm2, %v4654_v2 }
 0x820   :  { %4087 = vmatprep.subr.mxu1 %v4654_v2 }
 0x821   :  { %4088 = vmatpush3.msra.mxu1 %v4736_v5 }
 0x822   :  { %4089 = vmatprep.subr.mxu1 %v4654_v2 }
 0x823   :  { %4090 = vmatpush3.msra.mxu1 %v4744_v6 }
 0x824   :  { %4091 = vmatprep.subr.mxu1 %v4654_v2 }
 0x825   :  { %v907_v28 = vpop.permute.xlu1 %906  ;;  %4092 = vmatpush3.msra.mxu1 %v4754_v7 }
 0x826   :  { %4083 = vmatmul.mubr.msk.f32.vlgmr.msra.gmra.mxu0 %vm292_vm3, %v907_v28  ;;  %4107 = vmatprep.subr.mxu1 %v4654_v2 }
 0x827   :  { %4097 = vmatpush3.msra.mxu0 %v4727_v3  ;;  %4104 = vmatprep.mubr.msk.f32.mxu0 %vm4655_vm2, %v4654_v2 }
 0x828   :  { %4098 = vmatprep.subr.mxu0 %v4654_v2 }
 0x829   :  { %4099 = vmatpush3.msra.mxu0 %v4736_v5 }
 0x82a   :  { %4100 = vmatprep.subr.mxu0 %v4654_v2 }
 0x82b   :  { %4101 = vmatpush3.msra.mxu0 %v4744_v6 }
 0x82c   :  { %4102 = vmatprep.subr.mxu0 %v4654_v2 }
 0x82d   :  { %4103 = vmatpush3.msra.mxu0 %v4754_v7 }
 0x82e   :  { %4118 = vmatprep.subr.mxu0 %v4654_v2 }
 0x8de   :  { %v898_v30 = vpop.f32.mrf.mxu1 }
 0x8df   :  { %v902_v31 = vadd.f32 %v898_v30, %v227_v29 }
 0x8e0   :  { %v4073_v32 = vpop.f32.mrf.mxu1 }
 0x8e1   :  { %4423 = vtanh.f32 %v902_v31  ;;  %v3733_v39 = vmul.f32 -1.442695, %v902_v31 }
 0x8e6   :  { %v976_v34 = vpop.f32.mrf.mxu0 }
 0x8e7   :  { %v980_v35 = vadd.f32 %v976_v34, %v232_v33 }
 0x8e8   :  { %v4084_v36 = vpop.f32.mrf.mxu0 }
 0x8e9   :  { %4425 = vtanh.f32 %v980_v35  ;;  %v3734_v40 = vmul.f32 -1.442695, %v980_v35 }
 0x8ea   :  { %4427 = vpow2.f32 %v3733_v39 }
 0x8eb   :  { %4429 = vpow2.f32 %v3734_v40 }
 0x8ee   :  { %v4424_v37 = vpop.eup %4423 }
 0x8ef   :  { %990 = vrot.lane.b32.xlu0 %v4424_v37, %s4656_s27 }
 0x8f6   :  { %v4426_v38 = vpop.eup %4425 }
 0x8f7   :  { %1014 = vrot.lane.b32.xlu1 %v4426_v38, %s4656_s27  ;;  %v4428_v42 = vpop.eup %4427 }
 0x8f8   :  { %v984_v49 = vadd.f32 1.0, %v4428_v42  ;;  %v4430_v50 = vpop.eup %4429 }
 0x8f9   :  { %v1008_v51 = vadd.f32 1.0, %v4430_v50 }
 0x8fa   :  { %4431 = vrcp.f32 %v984_v49 }
 0x8fb   :  { %4433 = vrcp.f32 %v1008_v51 }
 0x907   :  { %v4432_v41 = vpop.eup %4431 }
 0x908   :  { %v4434_v56 = vpop.eup %4433  ;;  %v988_v59 = vmul.f32 %v4432_v41, %v4947_v19 }
 0x909   :  { %v1012_v62 = vmul.f32 %v4434_v56, %v4951_v22 }
 0x961   :  { %v991_v53 = vpop.permute.xlu0 %990 }
 0x962   :  { %v993_v55 = vmul.f32 %v4432_v41, %v991_v53 }
 0x964   :  { %995 = vrot.lane.b32.xlu0 %v993_v55, %s4657_s28 }
 0x969   :  { %v1015_v57 = vpop.permute.xlu1 %1014 }
 0x96a   :  { %v1017_v58 = vmul.f32 %v4434_v56, %v1015_v57  ;;  %v247_v57 = vadd.f32 %v4782_v9, %v4930_v46 }
 0x96c   :  { %1019 = vrot.lane.b32.xlu1 %v1017_v58, %s4657_s28 }
 0x9d6   :  { %v996_v60 = vpop.permute.xlu0 %995 }
 0x9d7   :  { %v4989_v61 = vadd.f32 %v996_v60, %v988_v59 }
 0x9d9   :  { %4435 = vtanh.f32 %v4989_v61 }
 0x9de   :  { %v1020_v63 = vpop.permute.xlu1 %1019 }
 0x9df   :  { %v4993_v0 = vadd.f32 %v1020_v63, %v1012_v62 }
 0x9e1   :  { %4437 = vtanh.f32 %v4993_v0 }
 0x9e6   :  { %v4436_v1 = vpop.eup %4435 }
 0x9e7   :  { %1001 = vrot.lane.b32.xlu0 %v4436_v1, %s4656_s27 }
 0x9ee   :  { %v4438_v4 = vpop.eup %4437 }
 0x9ef   :  { %1025 = vrot.lane.b32.xlu1 %v4438_v4, %s4656_s27 }
 0xa59   :  { %v1002_v8 = vpop.permute.xlu0 %1001 }
 0xa5a   :  { %v1004_v10 = vmul.f32 %v4432_v41, %v1002_v8 }
 0xa5c   :  { %1032 = vrot.lane.b32.xlu0 %v1004_v10, %s4657_s28 }
 0xa61   :  { %v1026_v11 = vpop.permute.xlu1 %1025 }
 0xa62   :  { %v1028_v12 = vmul.f32 %v4434_v56, %v1026_v11 }
 0xa64   :  { %1110 = vrot.lane.b32.xlu1 %v1028_v12, %s4657_s28 }
 0xace   :  { %v1033_v13 = vpop.permute.xlu0 %1032 }
 0xacf   :  { %4094 = vmatmul.mubr.msk.f32.vlgmr.msra.gmra.mxu1 %vm292_vm3, %v1033_v13 }
 0xad0   :  { %4108 = vmatpush3.msra.mxu1 %v4727_v3  ;;  %4115 = vmatprep.mubr.msk.f32.mxu1 %vm4655_vm2, %v4654_v2 }
 0xad1   :  { %4109 = vmatprep.subr.mxu1 %v4654_v2 }
 0xad2   :  { %4110 = vmatpush3.msra.mxu1 %v4736_v5 }
 0xad3   :  { %4111 = vmatprep.subr.mxu1 %v4654_v2 }
 0xad4   :  { %4112 = vmatpush3.msra.mxu1 %v4744_v6 }
 0xad5   :  { %4113 = vmatprep.subr.mxu1 %v4654_v2 }
 0xad6   :  { %v1111_v14 = vpop.permute.xlu1 %1110  ;;  %4114 = vmatpush3.msra.mxu1 %v4754_v7 }
 0xad7   :  { %4105 = vmatmul.mubr.msk.f32.vlgmr.msra.gmra.mxu0 %vm292_vm3, %v1111_v14  ;;  %4129 = vmatprep.subr.mxu1 %v4654_v2 }
 0xad8   :  { %4119 = vmatpush3.msra.mxu0 %v4727_v3  ;;  %4126 = vmatprep.mubr.msk.f32.mxu0 %vm4655_vm2, %v4654_v2 }
 0xad9   :  { %4120 = vmatprep.subr.mxu0 %v4654_v2 }
 0xada   :  { %4121 = vmatpush3.msra.mxu0 %v4736_v5 }
 0xadb   :  { %4122 = vmatprep.subr.mxu0 %v4654_v2 }
 0xadc   :  { %4123 = vmatpush3.msra.mxu0 %v4744_v6 }
 0xadd   :  { %4124 = vmatprep.subr.mxu0 %v4654_v2 }
 0xade   :  { %4125 = vmatpush3.msra.mxu0 %v4754_v7 }
 0xadf   :  { %4140 = vmatprep.subr.mxu0 %v4654_v2 }
 0xb8f   :  { %v1102_v17 = vpop.f32.mrf.mxu1 }
 0xb90   :  { %v1106_v19 = vadd.f32 %v1102_v17, %v237_v16 }
 0xb91   :  { %v4095_v20 = vpop.f32.mrf.mxu1 }
 0xb92   :  { %4439 = vtanh.f32 %v1106_v19  ;;  %v3737_v26 = vmul.f32 -1.442695, %v1106_v19 }
 0xb97   :  { %v1180_v22 = vpop.f32.mrf.mxu0 }
 0xb98   :  { %v1184_v23 = vadd.f32 %v1180_v22, %v242_v21 }
 0xb99   :  { %v4106_v24 = vpop.f32.mrf.mxu0 }
 0xb9a   :  { %4441 = vtanh.f32 %v1184_v23  ;;  %v3738_v44 = vmul.f32 -1.442695, %v1184_v23 }
 0xb9b   :  { %4443 = vpow2.f32 %v3737_v26 }
 0xb9c   :  { %4445 = vpow2.f32 %v3738_v44 }
 0xb9f   :  { %v4440_v25 = vpop.eup %4439 }
 0xba0   :  { %1194 = vrot.lane.b32.xlu0 %v4440_v25, %s4656_s27 }
 0xba7   :  { %v4442_v15 = vpop.eup %4441 }
 0xba8   :  { %1218 = vrot.lane.b32.xlu1 %v4442_v15, %s4656_s27  ;;  %v4444_v27 = vpop.eup %4443 }
 0xba9   :  { %v1188_v18 = vadd.f32 1.0, %v4444_v27  ;;  %v4446_v28 = vpop.eup %4445 }
 0xbaa   :  { %v1212_v29 = vadd.f32 1.0, %v4446_v28 }
 0xbab   :  { %4447 = vrcp.f32 %v1188_v18 }
 0xbac   :  { %4449 = vrcp.f32 %v1212_v29 }
 0xbb8   :  { %v4448_v43 = vpop.eup %4447 }
 0xbb9   :  { %v4450_v32 = vpop.eup %4449  ;;  %v1192_v35 = vmul.f32 %v4448_v43, %v4989_v61  ;;  %v252_v61 = vadd.f32 %v4928_v45, %v4782_v9 }
 0xbba   :  { %v1216_v38 = vmul.f32 %v4450_v32, %v4993_v0 }
 0xc12   :  { %v1195_v30 = vpop.permute.xlu0 %1194 }
 0xc13   :  { %v1197_v31 = vmul.f32 %v4448_v43, %v1195_v30 }
 0xc15   :  { %1199 = vrot.lane.b32.xlu0 %v1197_v31, %s4657_s28 }
 0xc1a   :  { %v1219_v33 = vpop.permute.xlu1 %1218 }
 0xc1b   :  { %v1221_v34 = vmul.f32 %v4450_v32, %v1219_v33 }
 0xc1d   :  { %1223 = vrot.lane.b32.xlu1 %v1221_v34, %s4657_s28 }
 0xc87   :  { %v1200_v36 = vpop.permute.xlu0 %1199 }
 0xc88   :  { %v5031_v37 = vadd.f32 %v1200_v36, %v1192_v35 }
 0xc8a   :  { %4451 = vtanh.f32 %v5031_v37 }
 0xc8f   :  { %v1224_v39 = vpop.permute.xlu1 %1223 }
 0xc90   :  { %v5035_v40 = vadd.f32 %v1224_v39, %v1216_v38 }
 0xc92   :  { %4453 = vtanh.f32 %v5035_v40 }
 0xc97   :  { %v4452_v42 = vpop.eup %4451 }
 0xc98   :  { %1205 = vrot.lane.b32.xlu0 %v4452_v42, %s4656_s27 }
 0xc9f   :  { %v4454_v49 = vpop.eup %4453 }
 0xca0   :  { %1229 = vrot.lane.b32.xlu1 %v4454_v49, %s4656_s27 }
 0xd0a   :  { %v1206_v50 = vpop.permute.xlu0 %1205 }
 0xd0b   :  { %v1208_v51 = vmul.f32 %v4448_v43, %v1206_v50 }
 0xd0d   :  { %1236 = vrot.lane.b32.xlu0 %v1208_v51, %s4657_s28 }
 0xd12   :  { %v1230_v41 = vpop.permute.xlu1 %1229 }
 0xd13   :  { %v1232_v53 = vmul.f32 %v4450_v32, %v1230_v41 }
 0xd15   :  { %1314 = vrot.lane.b32.xlu1 %v1232_v53, %s4657_s28 }
 0xd7f   :  { %v1237_v55 = vpop.permute.xlu0 %1236 }
 0xd80   :  { %4116 = vmatmul.mubr.msk.f32.vlgmr.msra.gmra.mxu1 %vm292_vm3, %v1237_v55 }
 0xd81   :  { %4130 = vmatpush3.msra.mxu1 %v4727_v3  ;;  %4137 = vmatprep.mubr.msk.f32.mxu1 %vm4655_vm2, %v4654_v2 }
 0xd82   :  { %4131 = vmatprep.subr.mxu1 %v4654_v2 }
 0xd83   :  { %4132 = vmatpush3.msra.mxu1 %v4736_v5 }
 0xd84   :  { %4133 = vmatprep.subr.mxu1 %v4654_v2 }
 0xd85   :  { %4134 = vmatpush3.msra.mxu1 %v4744_v6 }
 0xd86   :  { %4135 = vmatprep.subr.mxu1 %v4654_v2 }
 0xd87   :  { %v1315_v56 = vpop.permute.xlu1 %1314  ;;  %4136 = vmatpush3.msra.mxu1 %v4754_v7 }
 0xd88   :  { %4127 = vmatmul.mubr.msk.f32.vlgmr.msra.gmra.mxu0 %vm292_vm3, %v1315_v56  ;;  %4151 = vmatprep.subr.mxu1 %v4654_v2 }
 0xd89   :  { %4141 = vmatpush3.msra.mxu0 %v4727_v3  ;;  %4148 = vmatprep.mubr.msk.f32.mxu0 %vm4655_vm2, %v4654_v2 }
 0xd8a   :  { %4142 = vmatprep.subr.mxu0 %v4654_v2 }
 0xd8b   :  { %4143 = vmatpush3.msra.mxu0 %v4736_v5 }
 0xd8c   :  { %4144 = vmatprep.subr.mxu0 %v4654_v2 }
 0xd8d   :  { %4145 = vmatpush3.msra.mxu0 %v4744_v6 }
 0xd8e   :  { %4146 = vmatprep.subr.mxu0 %v4654_v2 }
 0xd8f   :  { %4147 = vmatpush3.msra.mxu0 %v4754_v7 }
 0xd90   :  { %4162 = vmatprep.subr.mxu0 %v4654_v2 }
 0xe40   :  { %v1306_v58 = vpop.f32.mrf.mxu1 }
 0xe41   :  { %v1310_v59 = vadd.f32 %v1306_v58, %v247_v57 }
 0xe42   :  { %v4117_v60 = vpop.f32.mrf.mxu1 }
 0xe43   :  { %4455 = vtanh.f32 %v1310_v59  ;;  %v3741_v8 = vmul.f32 -1.442695, %v1310_v59 }
 0xe48   :  { %v1384_v62 = vpop.f32.mrf.mxu0 }
 0xe49   :  { %v1388_v63 = vadd.f32 %v1384_v62, %v252_v61 }
 0xe4a   :  { %v4128_v0 = vpop.f32.mrf.mxu0 }
 0xe4b   :  { %4457 = vtanh.f32 %v1388_v63  ;;  %v3742_v46 = vmul.f32 -1.442695, %v1388_v63 }
 0xe4c   :  { %4459 = vpow2.f32 %v3741_v8 }
 0xe4d   :  { %4461 = vpow2.f32 %v3742_v46  ;;  %v4615_v46 = vld [vmem:[%s5603_s3] ss:$0 sm:$0xff] }
 0xe50   :  { %v4456_v1 = vpop.eup %4455 }
 0xe51   :  { %1398 = vrot.lane.b32.xlu0 %v4456_v1, %s4656_s27 }
 0xe58   :  { %v4458_v4 = vpop.eup %4457 }
 0xe59   :  { %1422 = vrot.lane.b32.xlu1 %v4458_v4, %s4656_s27  ;;  %v4460_v10 = vpop.eup %4459 }
 0xe5a   :  { %v1392_v11 = vadd.f32 1.0, %v4460_v10  ;;  %v4462_v12 = vpop.eup %4461  ;;  %v267_v10 = vadd.f32 %v4615_v46, %v4939_v54 }
 0xe5b   :  { %v1416_v13 = vadd.f32 1.0, %v4462_v12 }
 0xe5c   :  { %4463 = vrcp.f32 %v1392_v11 }
 0xe5d   :  { %4465 = vrcp.f32 %v1416_v13 }
 0xe69   :  { %v4464_v45 = vpop.eup %4463 }
 0xe6a   :  { %v4466_v17 = vpop.eup %4465  ;;  %v1396_v21 = vmul.f32 %v4464_v45, %v5031_v37 }
 0xe6b   :  { %v1420_v24 = vmul.f32 %v4466_v17, %v5035_v40 }
 0xec3   :  { %v1399_v14 = vpop.permute.xlu0 %1398 }
 0xec4   :  { %v1401_v16 = vmul.f32 %v4464_v45, %v1399_v14 }
 0xec6   :  { %1403 = vrot.lane.b32.xlu0 %v1401_v16, %s4657_s28 }
 0xecb   :  { %v1423_v19 = vpop.permute.xlu1 %1422 }
 0xecc   :  { %v1425_v20 = vmul.f32 %v4466_v17, %v1423_v19 }
 0xece   :  { %1427 = vrot.lane.b32.xlu1 %v1425_v20, %s4657_s28 }
 0xf38   :  { %v1404_v22 = vpop.permute.xlu0 %1403 }
 0xf39   :  { %v5073_v23 = vadd.f32 %v1404_v22, %v1396_v21 }
 0xf3b   :  { %4467 = vtanh.f32 %v5073_v23 }
 0xf40   :  { %v1428_v25 = vpop.permute.xlu1 %1427 }
 0xf41   :  { %v5077_v15 = vadd.f32 %v1428_v25, %v1420_v24 }
 0xf43   :  { %4469 = vtanh.f32 %v5077_v15 }
 0xf48   :  { %v4468_v26 = vpop.eup %4467 }
 0xf49   :  { %1409 = vrot.lane.b32.xlu0 %v4468_v26, %s4656_s27 }
 0xf50   :  { %v4470_v44 = vpop.eup %4469 }
 0xf51   :  { %1433 = vrot.lane.b32.xlu1 %v4470_v44, %s4656_s27 }
 0xfbb   :  { %v1410_v27 = vpop.permute.xlu0 %1409 }
 0xfbc   :  { %v1412_v18 = vmul.f32 %v4464_v45, %v1410_v27  ;;  %v272_v45 = vadd.f32 %v4615_v46, %v4937_v52 }
 0xfbe   :  { %1440 = vrot.lane.b32.xlu0 %v1412_v18, %s4657_s28 }
 0xfc3   :  { %v1434_v28 = vpop.permute.xlu1 %1433 }
 0xfc4   :  { %v1436_v29 = vmul.f32 %v4466_v17, %v1434_v28 }
 0xfc6   :  { %1518 = vrot.lane.b32.xlu1 %v1436_v29, %s4657_s28 }
0x1030   :  { %v1441_v43 = vpop.permute.xlu0 %1440 }
0x1031   :  { %4138 = vmatmul.mubr.msk.f32.vlgmr.msra.gmra.mxu1 %vm292_vm3, %v1441_v43 }
0x1032   :  { %4152 = vmatpush3.msra.mxu1 %v4727_v3  ;;  %4159 = vmatprep.mubr.msk.f32.mxu1 %vm4655_vm2, %v4654_v2 }
0x1033   :  { %4153 = vmatprep.subr.mxu1 %v4654_v2 }
0x1034   :  { %4154 = vmatpush3.msra.mxu1 %v4736_v5 }
0x1035   :  { %4155 = vmatprep.subr.mxu1 %v4654_v2 }
0x1036   :  { %4156 = vmatpush3.msra.mxu1 %v4744_v6 }
0x1037   :  { %4157 = vmatprep.subr.mxu1 %v4654_v2 }
0x1038   :  { %v1519_v30 = vpop.permute.xlu1 %1518  ;;  %4158 = vmatpush3.msra.mxu1 %v4754_v7 }
0x1039   :  { %4149 = vmatmul.mubr.msk.f32.vlgmr.msra.gmra.mxu0 %vm292_vm3, %v1519_v30  ;;  %4173 = vmatprep.subr.mxu1 %v4654_v2 }
0x103a   :  { %4163 = vmatpush3.msra.mxu0 %v4727_v3  ;;  %4170 = vmatprep.mubr.msk.f32.mxu0 %vm4655_vm2, %v4654_v2  ;;  %v257_v3 = vadd.f32 %v4782_v9, %v4934_v48 }
0x103b   :  { %4164 = vmatprep.subr.mxu0 %v4654_v2 }
0x103c   :  { %4165 = vmatpush3.msra.mxu0 %v4736_v5  ;;  %v262_v5 = vadd.f32 %v4932_v47, %v4782_v9 }
0x103d   :  { %4166 = vmatprep.subr.mxu0 %v4654_v2 }
0x103e   :  { %4167 = vmatpush3.msra.mxu0 %v4744_v6 }
0x103f   :  { %4168 = vmatprep.subr.mxu0 %v4654_v2 }
0x1040   :  { %4169 = vmatpush3.msra.mxu0 %v4754_v7 }
0x1041   :  { %4184 = vmatprep.subr.mxu0 %v4654_v2 }
0x10f1   :  { %v1510_v31 = vpop.f32.mrf.mxu1 }
0x10f2   :  { %v1514_v32 = vadd.f32 %v1510_v31, %v257_v3 }
0x10f3   :  { %v4139_v33 = vpop.f32.mrf.mxu1 }
0x10f4   :  { %4471 = vtanh.f32 %v1514_v32  ;;  %v3745_v37 = vmul.f32 -1.442695, %v1514_v32  ;;  %v5144_v32 = vld [vmem:[%s5604_s4 + $0x18] sm:$0xff]  ;;  %v5149_v33 = vld [vmem:[%s5604_s4 + $0x10] sm:$0xff] }
0x10f9   :  { %v1588_v34 = vpop.f32.mrf.mxu0 }
0x10fa   :  { %v1592_v35 = vadd.f32 %v1588_v34, %v262_v5  ;;  %v5157_v34 = vld [vmem:[%s5604_s4 + $0x8] sm:$0xff] }
0x10fb   :  { %v4150_v36 = vpop.f32.mrf.mxu0 }
0x10fc   :  { %4473 = vtanh.f32 %v1592_v35  ;;  %v3746_v48 = vmul.f32 -1.442695, %v1592_v35  ;;  %v5166_v35 = vld [vmem:[%s5604_s4] sm:$0xff] }
0x10fd   :  { %4475 = vpow2.f32 %v3745_v37 }
0x10fe   :  { %4477 = vpow2.f32 %v3746_v48 }
0x1101   :  { %v4472_v6 = vpop.eup %4471 }
0x1102   :  { %1602 = vrot.lane.b32.xlu0 %v4472_v6, %s4656_s27 }
0x1109   :  { %v4474_v7 = vpop.eup %4473 }
0x110a   :  { %1626 = vrot.lane.b32.xlu1 %v4474_v7, %s4656_s27  ;;  %v4476_v38 = vpop.eup %4475 }
0x110b   :  { %v1596_v39 = vadd.f32 1.0, %v4476_v38  ;;  %v4478_v40 = vpop.eup %4477 }
0x110c   :  { %v1620_v42 = vadd.f32 1.0, %v4478_v40  ;;  %v5208_v40 = vld [vmem:[%s5605_s5] ss:$0 sm:$0xff] }
0x110d   :  { %4479 = vrcp.f32 %v1596_v39 }
0x110e   :  { %4481 = vrcp.f32 %v1620_v42 }
0x111a   :  { %v4480_v9 = vpop.eup %4479 }
0x111b   :  { %v4482_v50 = vpop.eup %4481  ;;  %v1600_v53 = vmul.f32 %v4480_v9, %v5073_v23 }
0x111c   :  { %v1624_v57 = vmul.f32 %v4482_v50, %v5077_v15 }
0x1174   :  { %v1603_v47 = vpop.permute.xlu0 %1602 }
0x1175   :  { %v1605_v49 = vmul.f32 %v4480_v9, %v1603_v47 }
0x1177   :  { %1607 = vrot.lane.b32.xlu0 %v1605_v49, %s4657_s28 }
0x117c   :  { %v1627_v51 = vpop.permute.xlu1 %1626 }
0x117d   :  { %v1629_v41 = vmul.f32 %v4482_v50, %v1627_v51 }
0x117f   :  { %1631 = vrot.lane.b32.xlu1 %v1629_v41, %s4657_s28 }
0x11e9   :  { %v1608_v55 = vpop.permute.xlu0 %1607 }
0x11ea   :  { %v1610_v56 = vadd.f32 %v1608_v55, %v1600_v53 }
0x11ec   :  { %4483 = vtanh.f32 %v1610_v56 }
0x11f1   :  { %v1632_v58 = vpop.permute.xlu1 %1631 }
0x11f2   :  { %v1634_v59 = vadd.f32 %v1632_v58, %v1624_v57 }
0x11f4   :  { %4485 = vtanh.f32 %v1634_v59 }
0x11f9   :  { %v4484_v60 = vpop.eup %4483 }
0x11fa   :  { %1613 = vrot.lane.b32.xlu0 %v4484_v60, %s4656_s27 }
0x1201   :  { %v4486_v61 = vpop.eup %4485 }
0x1202   :  { %1637 = vrot.lane.b32.xlu1 %v4486_v61, %s4656_s27 }
0x126c   :  { %v1614_v62 = vpop.permute.xlu0 %1613 }
0x126d   :  { %v1616_v63 = vmul.f32 %v4480_v9, %v1614_v62 }
0x126f   :  { %1644 = vrot.lane.b32.xlu0 %v1616_v63, %s4657_s28 }
0x1274   :  { %v1638_v0 = vpop.permute.xlu1 %1637 }
0x1275   :  { %v1640_v1 = vmul.f32 %v4482_v50, %v1638_v0 }
0x1277   :  { %1722 = vrot.lane.b32.xlu1 %v1640_v1, %s4657_s28 }
0x12e1   :  { %v1645_v4 = vpop.permute.xlu0 %1644 }
0x12e2   :  { %4160 = vmatmul.mubr.msk.f32.vlgmr.msra.gmra.mxu1 %vm292_vm3, %v1645_v4 }
0x12e3   :  { %4181 = vmatprep.mubr.msk.f32.mxu1 %vm4655_vm2, %v4654_v2  ;;  %4174 = vmatpush3.msra.mxu1 %v5144_v32 }
0x12e4   :  { %4175 = vmatprep.subr.mxu1 %v4654_v2 }
0x12e5   :  { %4176 = vmatpush3.msra.mxu1 %v5149_v33 }
0x12e6   :  { %4177 = vmatprep.subr.mxu1 %v4654_v2 }
0x12e7   :  { %4178 = vmatpush3.msra.mxu1 %v5157_v34 }
0x12e8   :  { %4179 = vmatprep.subr.mxu1 %v4654_v2 }
0x12e9   :  { %v1723_v8 = vpop.permute.xlu1 %1722  ;;  %4180 = vmatpush3.msra.mxu1 %v5166_v35 }
0x12ea   :  { %4171 = vmatmul.mubr.msk.f32.vlgmr.msra.gmra.mxu0 %vm292_vm3, %v1723_v8  ;;  %4195 = vmatprep.subr.mxu1 %v4654_v2 }
0x12eb   :  { %4192 = vmatprep.mubr.msk.f32.mxu0 %vm4655_vm2, %v4654_v2  ;;  %4185 = vmatpush3.msra.mxu0 %v5144_v32 }
0x12ec   :  { %4186 = vmatprep.subr.mxu0 %v4654_v2 }
0x12ed   :  { %4187 = vmatpush3.msra.mxu0 %v5149_v33 }
0x12ee   :  { %4188 = vmatprep.subr.mxu0 %v4654_v2 }
0x12ef   :  { %4189 = vmatpush3.msra.mxu0 %v5157_v34 }
0x12f0   :  { %4190 = vmatprep.subr.mxu0 %v4654_v2 }
0x12f1   :  { %4191 = vmatpush3.msra.mxu0 %v5166_v35 }
0x12f2   :  { %4206 = vmatprep.subr.mxu0 %v4654_v2 }
0x13a2   :  { %v1714_v11 = vpop.f32.mrf.mxu1 }
0x13a3   :  { %v1718_v12 = vadd.f32 %v1714_v11, %v267_v10 }
0x13a4   :  { %v4161_v13 = vpop.f32.mrf.mxu1 }
0x13a5   :  { %4487 = vtanh.f32 %v1718_v12  ;;  %v3749_v21 = vmul.f32 -1.442695, %v1718_v12 }
0x13aa   :  { %v1792_v14 = vpop.f32.mrf.mxu0 }
0x13ab   :  { %v1796_v16 = vadd.f32 %v1792_v14, %v272_v45 }
0x13ac   :  { %v4172_v17 = vpop.f32.mrf.mxu0 }
0x13ad   :  { %4489 = vtanh.f32 %v1796_v16  ;;  %v3750_v22 = vmul.f32 -1.442695, %v1796_v16 }
0x13ae   :  { %4491 = vpow2.f32 %v3749_v21 }
0x13af   :  { %4493 = vpow2.f32 %v3750_v22 }
0x13b2   :  { %v4488_v19 = vpop.eup %4487 }
0x13b3   :  { %1806 = vrot.lane.b32.xlu0 %v4488_v19, %s4656_s27 }
0x13ba   :  { %v4490_v20 = vpop.eup %4489 }
0x13bb   :  { %1830 = vrot.lane.b32.xlu1 %v4490_v20, %s4656_s27  ;;  %v4492_v54 = vpop.eup %4491 }
0x13bc   :  { %v1800_v23 = vadd.f32 1.0, %v4492_v54  ;;  %v4494_v24 = vpop.eup %4493 }
0x13bd   :  { %v1824_v25 = vadd.f32 1.0, %v4494_v24 }
0x13be   :  { %4495 = vrcp.f32 %v1800_v23 }
0x13bf   :  { %4497 = vrcp.f32 %v1824_v25 }
0x13cb   :  { %v4496_v52 = vpop.eup %4495 }
0x13cc   :  { %v4498_v44 = vpop.eup %4497  ;;  %v1804_v28 = vmul.f32 %v4496_v52, %v1610_v56 }
0x13cd   :  { %v1828_v30 = vmul.f32 %v4498_v44, %v1634_v59 }
0x1425   :  { %v1807_v15 = vpop.permute.xlu0 %1806 }
0x1426   :  { %v1809_v26 = vmul.f32 %v4496_v52, %v1807_v15 }
0x1428   :  { %1811 = vrot.lane.b32.xlu0 %v1809_v26, %s4657_s28 }
0x142d   :  { %v1831_v27 = vpop.permute.xlu1 %1830 }
0x142e   :  { %v1833_v18 = vmul.f32 %v4498_v44, %v1831_v27 }
0x1430   :  { %1835 = vrot.lane.b32.xlu1 %v1833_v18, %s4657_s28 }
0x149a   :  { %v1812_v29 = vpop.permute.xlu0 %1811 }
0x149b   :  { %v5135_v43 = vadd.f32 %v1812_v29, %v1804_v28 }
0x149d   :  { %4499 = vtanh.f32 %v5135_v43 }
0x14a2   :  { %v1836_v3 = vpop.permute.xlu1 %1835 }
0x14a3   :  { %v5138_v31 = vadd.f32 %v1836_v3, %v1828_v30 }
0x14a5   :  { %4501 = vtanh.f32 %v5138_v31 }
0x14aa   :  { %v4500_v5 = vpop.eup %4499 }
0x14ab   :  { %1817 = vrot.lane.b32.xlu0 %v4500_v5, %s4656_s27 }
0x14b2   :  { %v4502_v36 = vpop.eup %4501 }
0x14b3   :  { %1841 = vrot.lane.b32.xlu1 %v4502_v36, %s4656_s27 }
0x151d   :  { %v1818_v6 = vpop.permute.xlu0 %1817 }
0x151e   :  { %v1820_v7 = vmul.f32 %v4496_v52, %v1818_v6 }
0x1520   :  { %1856 = vrot.lane.b32.xlu0 %v1820_v7, %s4657_s28 }
0x1525   :  { %v1842_v37 = vpop.permute.xlu1 %1841 }
0x1526   :  { %v1844_v48 = vmul.f32 %v4498_v44, %v1842_v37 }
0x1528   :  { %1862 = vrot.lane.b32.xlu1 %v1844_v48, %s4657_s28 }
0x1592   :  { %v1857_v38 = vpop.permute.xlu0 %1856 }
0x1593   :  { %1860 = vst.msk [vmem:[#allocation4 + $0x38] sm:$0xff] %vm292_vm3, %v1857_v38  ;;  %4182 = vmatmul.mubr.msk.f32.vlgmr.msra.gmra.mxu1 %vm292_vm3, %v1857_v38 }
0x1594   :  { %4196 = vmatpush3.msra.mxu1 %v5144_v32  ;;  %4203 = vmatprep.mubr.msk.f32.mxu1 %vm4655_vm2, %v4654_v2 }
0x1595   :  { %4197 = vmatprep.subr.mxu1 %v4654_v2 }
0x1596   :  { %4198 = vmatpush3.msra.mxu1 %v5149_v33 }
0x1597   :  { %4199 = vmatprep.subr.mxu1 %v4654_v2 }
0x1598   :  { %4200 = vmatpush3.msra.mxu1 %v5157_v34 }
0x1599   :  { %4201 = vmatprep.subr.mxu1 %v4654_v2 }
0x159a   :  { %v1863_v39 = vpop.permute.xlu1 %1862  ;;  %4202 = vmatpush3.msra.mxu1 %v5166_v35 }
0x159b   :  { %1866 = vst.msk [vmem:[#allocation5 + $0x38] sm:$0xff] %vm292_vm3, %v1863_v39  ;;  %4193 = vmatmul.mubr.msk.f32.vlgmr.msra.gmra.mxu0 %vm292_vm3, %v1863_v39  ;;  %4217 = vmatprep.subr.mxu1 %v4654_v2 }
0x159c   :  { %4207 = vmatpush3.msra.mxu0 %v5144_v32  ;;  %4214 = vmatprep.mubr.msk.f32.mxu0 %vm4655_vm2, %v4654_v2 }
0x159d   :  { %4208 = vmatprep.subr.mxu0 %v4654_v2 }
0x159e   :  { %4209 = vmatpush3.msra.mxu0 %v5149_v33 }
0x159f   :  { %4210 = vmatprep.subr.mxu0 %v4654_v2 }
0x15a0   :  { %4211 = vmatpush3.msra.mxu0 %v5157_v34 }
0x15a1   :  { %4212 = vmatprep.subr.mxu0 %v4654_v2 }
0x15a2   :  { %4213 = vmatpush3.msra.mxu0 %v5166_v35 }
0x15a3   :  { %4228 = vmatprep.subr.mxu0 %v4654_v2 }
0x1653   :  { %v1935_v42 = vpop.f32.mrf.mxu1 }
0x1654   :  { %v1936_v9 = vadd.f32 %v5208_v40, %v1935_v42 }
0x1655   :  { %v4183_v47 = vpop.f32.mrf.mxu1 }
0x1656   :  { %4503 = vtanh.f32 %v1936_v9  ;;  %v3753_v55 = vmul.f32 -1.442695, %v1936_v9 }
0x165b   :  { %v2007_v49 = vpop.f32.mrf.mxu0 }
0x165c   :  { %v2008_v50 = vadd.f32 %v5208_v40, %v2007_v49 }
0x165d   :  { %v4194_v51 = vpop.f32.mrf.mxu0 }
0x165e   :  { %4505 = vtanh.f32 %v2008_v50  ;;  %v3754_v56 = vmul.f32 -1.442695, %v2008_v50 }
0x165f   :  { %4507 = vpow2.f32 %v3753_v55 }
0x1660   :  { %4509 = vpow2.f32 %v3754_v56 }
0x1663   :  { %v4504_v41 = vpop.eup %4503 }
0x1664   :  { %2020 = vrot.lane.b32.xlu0 %v4504_v41, %s4656_s27 }
0x166b   :  { %v4506_v53 = vpop.eup %4505 }
0x166c   :  { %2044 = vrot.lane.b32.xlu1 %v4506_v53, %s4656_s27  ;;  %v4508_v57 = vpop.eup %4507 }
0x166d   :  { %v2014_v58 = vadd.f32 1.0, %v4508_v57  ;;  %v4510_v59 = vpop.eup %4509 }
0x166e   :  { %v2038_v60 = vadd.f32 1.0, %v4510_v59 }
0x166f   :  { %4511 = vrcp.f32 %v2014_v58 }
0x1670   :  { %4513 = vrcp.f32 %v2038_v60 }
0x167c   :  { %v4512_v61 = vpop.eup %4511 }
0x167d   :  { %v4514_v0 = vpop.eup %4513  ;;  %v2018_v8 = vmul.f32 %v4512_v61, %v5135_v43 }
0x167e   :  { %v2042_v11 = vmul.f32 %v4514_v0, %v5138_v31 }
0x16d6   :  { %v2021_v62 = vpop.permute.xlu0 %2020 }
0x16d7   :  { %v2023_v63 = vmul.f32 %v4512_v61, %v2021_v62 }
0x16d9   :  { %2025 = vrot.lane.b32.xlu0 %v2023_v63, %s4657_s28 }
0x16de   :  { %v2045_v1 = vpop.permute.xlu1 %2044 }
0x16df   :  { %v2047_v4 = vmul.f32 %v4514_v0, %v2045_v1 }
0x16e1   :  { %2049 = vrot.lane.b32.xlu1 %v2047_v4, %s4657_s28 }
0x174b   :  { %v2026_v46 = vpop.permute.xlu0 %2025 }
0x174c   :  { %v5217_v10 = vadd.f32 %v2026_v46, %v2018_v8 }
0x174e   :  { %4515 = vtanh.f32 %v5217_v10 }
0x1753   :  { %v2050_v12 = vpop.permute.xlu1 %2049 }
0x1754   :  { %v5221_v13 = vadd.f32 %v2050_v12, %v2042_v11 }
0x1756   :  { %4517 = vtanh.f32 %v5221_v13 }
0x175b   :  { %v4516_v45 = vpop.eup %4515 }
0x175c   :  { %2031 = vrot.lane.b32.xlu0 %v4516_v45, %s4656_s27 }
0x1763   :  { %v4518_v14 = vpop.eup %4517 }
0x1764   :  { %2055 = vrot.lane.b32.xlu1 %v4518_v14, %s4656_s27 }
0x17ce   :  { %v2032_v16 = vpop.permute.xlu0 %2031 }
0x17cf   :  { %v2034_v17 = vmul.f32 %v4512_v61, %v2032_v16 }
0x17d1   :  { %2060 = vrot.lane.b32.xlu0 %v2034_v17, %s4657_s28 }
0x17d6   :  { %v2056_v19 = vpop.permute.xlu1 %2055 }
0x17d7   :  { %v2058_v20 = vmul.f32 %v4514_v0, %v2056_v19 }
0x17d9   :  { %2066 = vrot.lane.b32.xlu1 %v2058_v20, %s4657_s28 }
0x1843   :  { %v2061_v21 = vpop.permute.xlu0 %2060 }
0x1844   :  { %2064 = vst.msk [vmem:[#allocation4 + $0x30] sm:$0xff] %vm292_vm3, %v2061_v21  ;;  %4204 = vmatmul.mubr.msk.f32.vlgmr.msra.gmra.mxu1 %vm292_vm3, %v2061_v21 }
0x1845   :  { %4218 = vmatpush3.msra.mxu1 %v5144_v32  ;;  %4225 = vmatprep.mubr.msk.f32.mxu1 %vm4655_vm2, %v4654_v2 }
0x1846   :  { %4219 = vmatprep.subr.mxu1 %v4654_v2 }
0x1847   :  { %4220 = vmatpush3.msra.mxu1 %v5149_v33 }
0x1848   :  { %4221 = vmatprep.subr.mxu1 %v4654_v2 }
0x1849   :  { %4222 = vmatpush3.msra.mxu1 %v5157_v34 }
0x184a   :  { %4223 = vmatprep.subr.mxu1 %v4654_v2 }
0x184b   :  { %v2067_v22 = vpop.permute.xlu1 %2066  ;;  %4224 = vmatpush3.msra.mxu1 %v5166_v35 }
0x184c   :  { %2070 = vst.msk [vmem:[#allocation5 + $0x30] sm:$0xff] %vm292_vm3, %v2067_v22  ;;  %4215 = vmatmul.mubr.msk.f32.vlgmr.msra.gmra.mxu0 %vm292_vm3, %v2067_v22  ;;  %4239 = vmatprep.subr.mxu1 %v4654_v2 }
0x184d   :  { %4229 = vmatpush3.msra.mxu0 %v5144_v32  ;;  %4236 = vmatprep.mubr.msk.f32.mxu0 %vm4655_vm2, %v4654_v2 }
0x184e   :  { %4230 = vmatprep.subr.mxu0 %v4654_v2 }
0x184f   :  { %4231 = vmatpush3.msra.mxu0 %v5149_v33 }
0x1850   :  { %4232 = vmatprep.subr.mxu0 %v4654_v2 }
0x1851   :  { %4233 = vmatpush3.msra.mxu0 %v5157_v34 }
0x1852   :  { %4234 = vmatprep.subr.mxu0 %v4654_v2 }
0x1853   :  { %4235 = vmatpush3.msra.mxu0 %v5166_v35 }
0x1854   :  { %4250 = vmatprep.subr.mxu0 %v4654_v2 }
0x1904   :  { %v2139_v54 = vpop.f32.mrf.mxu1 }
0x1905   :  { %v2140_v23 = vadd.f32 %v5208_v40, %v2139_v54 }
0x1906   :  { %v4205_v24 = vpop.f32.mrf.mxu1 }
0x1907   :  { %4519 = vtanh.f32 %v2140_v23  ;;  %v3757_v27 = vmul.f32 -1.442695, %v2140_v23 }
0x190c   :  { %v2211_v25 = vpop.f32.mrf.mxu0 }
0x190d   :  { %v2212_v52 = vadd.f32 %v5208_v40, %v2211_v25 }
0x190e   :  { %v4216_v15 = vpop.f32.mrf.mxu0 }
0x190f   :  { %4521 = vtanh.f32 %v2212_v52  ;;  %v3758_v18 = vmul.f32 -1.442695, %v2212_v52 }
0x1910   :  { %4523 = vpow2.f32 %v3757_v27 }
0x1911   :  { %4525 = vpow2.f32 %v3758_v18 }
0x1914   :  { %v4520_v26 = vpop.eup %4519 }
0x1915   :  { %2224 = vrot.lane.b32.xlu0 %v4520_v26, %s4656_s27 }
0x191c   :  { %v4522_v44 = vpop.eup %4521 }
0x191d   :  { %2248 = vrot.lane.b32.xlu1 %v4522_v44, %s4656_s27  ;;  %v4524_v28 = vpop.eup %4523 }
0x191e   :  { %v2218_v29 = vadd.f32 1.0, %v4524_v28  ;;  %v4526_v30 = vpop.eup %4525 }
0x191f   :  { %v2242_v3 = vadd.f32 1.0, %v4526_v30 }
0x1920   :  { %4527 = vrcp.f32 %v2218_v29 }
0x1921   :  { %4529 = vrcp.f32 %v2242_v3 }
0x192d   :  { %v4528_v5 = vpop.eup %4527 }
0x192e   :  { %v4530_v7 = vpop.eup %4529  ;;  %v2222_v38 = vmul.f32 %v4528_v5, %v5217_v10 }
0x192f   :  { %v2246_v9 = vmul.f32 %v4530_v7, %v5221_v13 }
0x1987   :  { %v2225_v36 = vpop.permute.xlu0 %2224 }
0x1988   :  { %v2227_v6 = vmul.f32 %v4528_v5, %v2225_v36 }
0x198a   :  { %2229 = vrot.lane.b32.xlu0 %v2227_v6, %s4657_s28 }
0x198f   :  { %v2249_v37 = vpop.permute.xlu1 %2248 }
0x1990   :  { %v2251_v48 = vmul.f32 %v4530_v7, %v2249_v37 }
0x1992   :  { %2253 = vrot.lane.b32.xlu1 %v2251_v48, %s4657_s28 }
0x19fc   :  { %v2230_v39 = vpop.permute.xlu0 %2229 }
0x19fd   :  { %v5259_v42 = vadd.f32 %v2230_v39, %v2222_v38 }
0x19ff   :  { %4531 = vtanh.f32 %v5259_v42 }
0x1a04   :  { %v2254_v47 = vpop.permute.xlu1 %2253 }
0x1a05   :  { %v5263_v49 = vadd.f32 %v2254_v47, %v2246_v9 }
0x1a07   :  { %4533 = vtanh.f32 %v5263_v49 }
0x1a0c   :  { %v4532_v50 = vpop.eup %4531 }
0x1a0d   :  { %2235 = vrot.lane.b32.xlu0 %v4532_v50, %s4656_s27 }
0x1a14   :  { %v4534_v51 = vpop.eup %4533 }
0x1a15   :  { %2259 = vrot.lane.b32.xlu1 %v4534_v51, %s4656_s27 }
0x1a7f   :  { %v2236_v41 = vpop.permute.xlu0 %2235 }
0x1a80   :  { %v2238_v53 = vmul.f32 %v4528_v5, %v2236_v41 }
0x1a82   :  { %2264 = vrot.lane.b32.xlu0 %v2238_v53, %s4657_s28 }
0x1a87   :  { %v2260_v55 = vpop.permute.xlu1 %2259 }
0x1a88   :  { %v2262_v56 = vmul.f32 %v4530_v7, %v2260_v55 }
0x1a8a   :  { %2270 = vrot.lane.b32.xlu1 %v2262_v56, %s4657_s28 }
0x1af4   :  { %v2265_v57 = vpop.permute.xlu0 %2264 }
0x1af5   :  { %2268 = vst.msk [vmem:[#allocation4 + $0x28] sm:$0xff] %vm292_vm3, %v2265_v57  ;;  %4226 = vmatmul.mubr.msk.f32.vlgmr.msra.gmra.mxu1 %vm292_vm3, %v2265_v57 }
0x1af6   :  { %4240 = vmatpush3.msra.mxu1 %v5144_v32  ;;  %4247 = vmatprep.mubr.msk.f32.mxu1 %vm4655_vm2, %v4654_v2 }
0x1af7   :  { %4241 = vmatprep.subr.mxu1 %v4654_v2 }
0x1af8   :  { %4242 = vmatpush3.msra.mxu1 %v5149_v33 }
0x1af9   :  { %4243 = vmatprep.subr.mxu1 %v4654_v2 }
0x1afa   :  { %4244 = vmatpush3.msra.mxu1 %v5157_v34 }
0x1afb   :  { %4245 = vmatprep.subr.mxu1 %v4654_v2 }
0x1afc   :  { %v2271_v58 = vpop.permute.xlu1 %2270  ;;  %4246 = vmatpush3.msra.mxu1 %v5166_v35 }
0x1afd   :  { %2274 = vst.msk [vmem:[#allocation5 + $0x28] sm:$0xff] %vm292_vm3, %v2271_v58  ;;  %4237 = vmatmul.mubr.msk.f32.vlgmr.msra.gmra.mxu0 %vm292_vm3, %v2271_v58  ;;  %4261 = vmatprep.subr.mxu1 %v4654_v2 }
0x1afe   :  { %4251 = vmatpush3.msra.mxu0 %v5144_v32  ;;  %4258 = vmatprep.mubr.msk.f32.mxu0 %vm4655_vm2, %v4654_v2 }
0x1aff   :  { %4252 = vmatprep.subr.mxu0 %v4654_v2 }
0x1b00   :  { %4253 = vmatpush3.msra.mxu0 %v5149_v33 }
0x1b01   :  { %4254 = vmatprep.subr.mxu0 %v4654_v2 }
0x1b02   :  { %4255 = vmatpush3.msra.mxu0 %v5157_v34 }
0x1b03   :  { %4256 = vmatprep.subr.mxu0 %v4654_v2 }
0x1b04   :  { %4257 = vmatpush3.msra.mxu0 %v5166_v35 }
0x1b05   :  { %4272 = vmatprep.subr.mxu0 %v4654_v2 }
0x1bb5   :  { %v2343_v59 = vpop.f32.mrf.mxu1 }
0x1bb6   :  { %v2344_v60 = vadd.f32 %v5208_v40, %v2343_v59 }
0x1bb7   :  { %v4227_v61 = vpop.f32.mrf.mxu1 }
0x1bb8   :  { %4535 = vtanh.f32 %v2344_v60  ;;  %v3761_v8 = vmul.f32 -1.442695, %v2344_v60 }
0x1bbd   :  { %v2415_v62 = vpop.f32.mrf.mxu0 }
0x1bbe   :  { %v2416_v63 = vadd.f32 %v5208_v40, %v2415_v62 }
0x1bbf   :  { %v4238_v0 = vpop.f32.mrf.mxu0 }
0x1bc0   :  { %4537 = vtanh.f32 %v2416_v63  ;;  %v3762_v46 = vmul.f32 -1.442695, %v2416_v63 }
0x1bc1   :  { %4539 = vpow2.f32 %v3761_v8 }
0x1bc2   :  { %4541 = vpow2.f32 %v3762_v46 }
0x1bc5   :  { %v4536_v1 = vpop.eup %4535 }
0x1bc6   :  { %2428 = vrot.lane.b32.xlu0 %v4536_v1, %s4656_s27 }
0x1bcd   :  { %v4538_v4 = vpop.eup %4537 }
0x1bce   :  { %2452 = vrot.lane.b32.xlu1 %v4538_v4, %s4656_s27  ;;  %v4540_v10 = vpop.eup %4539 }
0x1bcf   :  { %v2422_v11 = vadd.f32 1.0, %v4540_v10  ;;  %v4542_v12 = vpop.eup %4541 }
0x1bd0   :  { %v2446_v13 = vadd.f32 1.0, %v4542_v12 }
0x1bd1   :  { %4543 = vrcp.f32 %v2422_v11 }
0x1bd2   :  { %4545 = vrcp.f32 %v2446_v13 }
0x1bde   :  { %v4544_v45 = vpop.eup %4543 }
0x1bdf   :  { %v4546_v17 = vpop.eup %4545  ;;  %v2426_v21 = vmul.f32 %v4544_v45, %v5259_v42 }
0x1be0   :  { %v2450_v23 = vmul.f32 %v4546_v17, %v5263_v49 }
0x1c38   :  { %v2429_v14 = vpop.permute.xlu0 %2428 }
0x1c39   :  { %v2431_v16 = vmul.f32 %v4544_v45, %v2429_v14 }
0x1c3b   :  { %2433 = vrot.lane.b32.xlu0 %v2431_v16, %s4657_s28 }
0x1c40   :  { %v2453_v19 = vpop.permute.xlu1 %2452 }
0x1c41   :  { %v2455_v20 = vmul.f32 %v4546_v17, %v2453_v19 }
0x1c43   :  { %2457 = vrot.lane.b32.xlu1 %v2455_v20, %s4657_s28 }
0x1cad   :  { %v2434_v22 = vpop.permute.xlu0 %2433 }
0x1cae   :  { %v5301_v54 = vadd.f32 %v2434_v22, %v2426_v21 }
0x1cb0   :  { %4547 = vtanh.f32 %v5301_v54 }
0x1cb5   :  { %v2458_v24 = vpop.permute.xlu1 %2457 }
0x1cb6   :  { %v5305_v25 = vadd.f32 %v2458_v24, %v2450_v23 }
0x1cb8   :  { %4549 = vtanh.f32 %v5305_v25 }
0x1cbd   :  { %v4548_v52 = vpop.eup %4547 }
0x1cbe   :  { %2439 = vrot.lane.b32.xlu0 %v4548_v52, %s4656_s27 }
0x1cc5   :  { %v4550_v15 = vpop.eup %4549 }
0x1cc6   :  { %2463 = vrot.lane.b32.xlu1 %v4550_v15, %s4656_s27 }
0x1d30   :  { %v2440_v26 = vpop.permute.xlu0 %2439 }
0x1d31   :  { %v2442_v44 = vmul.f32 %v4544_v45, %v2440_v26 }
0x1d33   :  { %2468 = vrot.lane.b32.xlu0 %v2442_v44, %s4657_s28 }
0x1d38   :  { %v2464_v27 = vpop.permute.xlu1 %2463 }
0x1d39   :  { %v2466_v18 = vmul.f32 %v4546_v17, %v2464_v27 }
0x1d3b   :  { %2474 = vrot.lane.b32.xlu1 %v2466_v18, %s4657_s28 }
0x1da5   :  { %v2469_v28 = vpop.permute.xlu0 %2468 }
0x1da6   :  { %2472 = vst.msk [vmem:[#allocation4 + $0x20] sm:$0xff] %vm292_vm3, %v2469_v28  ;;  %4248 = vmatmul.mubr.msk.f32.vlgmr.msra.gmra.mxu1 %vm292_vm3, %v2469_v28 }
0x1da7   :  { %4262 = vmatpush3.msra.mxu1 %v5144_v32  ;;  %4269 = vmatprep.mubr.msk.f32.mxu1 %vm4655_vm2, %v4654_v2 }
0x1da8   :  { %4263 = vmatprep.subr.mxu1 %v4654_v2 }
0x1da9   :  { %4264 = vmatpush3.msra.mxu1 %v5149_v33 }
0x1daa   :  { %4265 = vmatprep.subr.mxu1 %v4654_v2 }
0x1dab   :  { %4266 = vmatpush3.msra.mxu1 %v5157_v34 }
0x1dac   :  { %4267 = vmatprep.subr.mxu1 %v4654_v2 }
0x1dad   :  { %v2475_v29 = vpop.permute.xlu1 %2474  ;;  %4268 = vmatpush3.msra.mxu1 %v5166_v35 }
0x1dae   :  { %2478 = vst.msk [vmem:[#allocation5 + $0x20] sm:$0xff] %vm292_vm3, %v2475_v29  ;;  %4259 = vmatmul.mubr.msk.f32.vlgmr.msra.gmra.mxu0 %vm292_vm3, %v2475_v29  ;;  %4283 = vmatprep.subr.mxu1 %v4654_v2 }
0x1daf   :  { %4273 = vmatpush3.msra.mxu0 %v5144_v32  ;;  %4280 = vmatprep.mubr.msk.f32.mxu0 %vm4655_vm2, %v4654_v2 }
0x1db0   :  { %4274 = vmatprep.subr.mxu0 %v4654_v2 }
0x1db1   :  { %4275 = vmatpush3.msra.mxu0 %v5149_v33 }
0x1db2   :  { %4276 = vmatprep.subr.mxu0 %v4654_v2 }
0x1db3   :  { %4277 = vmatpush3.msra.mxu0 %v5157_v34 }
0x1db4   :  { %4278 = vmatprep.subr.mxu0 %v4654_v2 }
0x1db5   :  { %4279 = vmatpush3.msra.mxu0 %v5166_v35 }
0x1db6   :  { %4294 = vmatprep.subr.mxu0 %v4654_v2 }
0x1e66   :  { %v2547_v30 = vpop.f32.mrf.mxu1 }
0x1e67   :  { %v2548_v3 = vadd.f32 %v5208_v40, %v2547_v30 }
0x1e68   :  { %v4249_v5 = vpop.f32.mrf.mxu1 }
0x1e69   :  { %4551 = vtanh.f32 %v2548_v3  ;;  %v3765_v38 = vmul.f32 -1.442695, %v2548_v3 }
0x1e6e   :  { %v2619_v36 = vpop.f32.mrf.mxu0 }
0x1e6f   :  { %v2620_v6 = vadd.f32 %v5208_v40, %v2619_v36 }
0x1e70   :  { %v4260_v7 = vpop.f32.mrf.mxu0 }
0x1e71   :  { %4553 = vtanh.f32 %v2620_v6  ;;  %v3766_v39 = vmul.f32 -1.442695, %v2620_v6 }
0x1e72   :  { %4555 = vpow2.f32 %v3765_v38 }
0x1e73   :  { %4557 = vpow2.f32 %v3766_v39 }
0x1e76   :  { %v4552_v37 = vpop.eup %4551 }
0x1e77   :  { %2632 = vrot.lane.b32.xlu0 %v4552_v37, %s4656_s27 }
0x1e7e   :  { %v4554_v48 = vpop.eup %4553 }
0x1e7f   :  { %2656 = vrot.lane.b32.xlu1 %v4554_v48, %s4656_s27  ;;  %v4556_v42 = vpop.eup %4555 }
0x1e80   :  { %v2626_v9 = vadd.f32 1.0, %v4556_v42  ;;  %v4558_v47 = vpop.eup %4557 }
0x1e81   :  { %v2650_v49 = vadd.f32 1.0, %v4558_v47 }
0x1e82   :  { %4559 = vrcp.f32 %v2626_v9 }
0x1e83   :  { %4561 = vrcp.f32 %v2650_v49 }
0x1e8f   :  { %v4560_v50 = vpop.eup %4559 }
0x1e90   :  { %v4562_v53 = vpop.eup %4561  ;;  %v2630_v57 = vmul.f32 %v4560_v50, %v5301_v54 }
0x1e91   :  { %v2654_v60 = vmul.f32 %v4562_v53, %v5305_v25 }
0x1ee9   :  { %v2633_v51 = vpop.permute.xlu0 %2632 }
0x1eea   :  { %v2635_v41 = vmul.f32 %v4560_v50, %v2633_v51 }
0x1eec   :  { %2637 = vrot.lane.b32.xlu0 %v2635_v41, %s4657_s28 }
0x1ef1   :  { %v2657_v55 = vpop.permute.xlu1 %2656 }
0x1ef2   :  { %v2659_v56 = vmul.f32 %v4562_v53, %v2657_v55 }
0x1ef4   :  { %2661 = vrot.lane.b32.xlu1 %v2659_v56, %s4657_s28 }
0x1f5e   :  { %v2638_v58 = vpop.permute.xlu0 %2637 }
0x1f5f   :  { %v5343_v59 = vadd.f32 %v2638_v58, %v2630_v57 }
0x1f61   :  { %4563 = vtanh.f32 %v5343_v59 }
0x1f66   :  { %v2662_v61 = vpop.permute.xlu1 %2661 }
0x1f67   :  { %v5347_v62 = vadd.f32 %v2662_v61, %v2654_v60 }
0x1f69   :  { %4565 = vtanh.f32 %v5347_v62 }
0x1f6e   :  { %v4564_v63 = vpop.eup %4563 }
0x1f6f   :  { %2643 = vrot.lane.b32.xlu0 %v4564_v63, %s4656_s27 }
0x1f76   :  { %v4566_v0 = vpop.eup %4565 }
0x1f77   :  { %2667 = vrot.lane.b32.xlu1 %v4566_v0, %s4656_s27 }
0x1fe1   :  { %v2644_v1 = vpop.permute.xlu0 %2643 }
0x1fe2   :  { %v2646_v4 = vmul.f32 %v4560_v50, %v2644_v1 }
0x1fe4   :  { %2672 = vrot.lane.b32.xlu0 %v2646_v4, %s4657_s28 }
0x1fe9   :  { %v2668_v8 = vpop.permute.xlu1 %2667 }
0x1fea   :  { %v2670_v46 = vmul.f32 %v4562_v53, %v2668_v8 }
0x1fec   :  { %2678 = vrot.lane.b32.xlu1 %v2670_v46, %s4657_s28 }
0x2056   :  { %v2673_v10 = vpop.permute.xlu0 %2672 }
0x2057   :  { %2676 = vst.msk [vmem:[#allocation4 + $0x18] sm:$0xff] %vm292_vm3, %v2673_v10  ;;  %4270 = vmatmul.mubr.msk.f32.vlgmr.msra.gmra.mxu1 %vm292_vm3, %v2673_v10 }
0x2058   :  { %4284 = vmatpush3.msra.mxu1 %v5144_v32  ;;  %4291 = vmatprep.mubr.msk.f32.mxu1 %vm4655_vm2, %v4654_v2 }
0x2059   :  { %4285 = vmatprep.subr.mxu1 %v4654_v2 }
0x205a   :  { %4286 = vmatpush3.msra.mxu1 %v5149_v33 }
0x205b   :  { %4287 = vmatprep.subr.mxu1 %v4654_v2 }
0x205c   :  { %4288 = vmatpush3.msra.mxu1 %v5157_v34 }
0x205d   :  { %4289 = vmatprep.subr.mxu1 %v4654_v2 }
0x205e   :  { %v2679_v11 = vpop.permute.xlu1 %2678  ;;  %4290 = vmatpush3.msra.mxu1 %v5166_v35 }
0x205f   :  { %2682 = vst.msk [vmem:[#allocation5 + $0x18] sm:$0xff] %vm292_vm3, %v2679_v11  ;;  %4281 = vmatmul.mubr.msk.f32.vlgmr.msra.gmra.mxu0 %vm292_vm3, %v2679_v11  ;;  %4305 = vmatprep.subr.mxu1 %v4654_v2 }
0x2060   :  { %4295 = vmatpush3.msra.mxu0 %v5144_v32  ;;  %4302 = vmatprep.mubr.msk.f32.mxu0 %vm4655_vm2, %v4654_v2 }
0x2061   :  { %4296 = vmatprep.subr.mxu0 %v4654_v2 }
0x2062   :  { %4297 = vmatpush3.msra.mxu0 %v5149_v33 }
0x2063   :  { %4298 = vmatprep.subr.mxu0 %v4654_v2 }
0x2064   :  { %4299 = vmatpush3.msra.mxu0 %v5157_v34 }
0x2065   :  { %4300 = vmatprep.subr.mxu0 %v4654_v2 }
0x2066   :  { %4301 = vmatpush3.msra.mxu0 %v5166_v35 }
0x2067   :  { %4316 = vmatprep.subr.mxu0 %v4654_v2 }
0x2117   :  { %v2751_v12 = vpop.f32.mrf.mxu1 }
0x2118   :  { %v2752_v13 = vadd.f32 %v5208_v40, %v2751_v12 }
0x2119   :  { %v4271_v45 = vpop.f32.mrf.mxu1 }
0x211a   :  { %4567 = vtanh.f32 %v2752_v13  ;;  %v3769_v21 = vmul.f32 -1.442695, %v2752_v13 }
0x211f   :  { %v2823_v14 = vpop.f32.mrf.mxu0 }
0x2120   :  { %v2824_v16 = vadd.f32 %v5208_v40, %v2823_v14 }
0x2121   :  { %v4282_v17 = vpop.f32.mrf.mxu0 }
0x2122   :  { %4569 = vtanh.f32 %v2824_v16  ;;  %v3770_v22 = vmul.f32 -1.442695, %v2824_v16 }
0x2123   :  { %4571 = vpow2.f32 %v3769_v21 }
0x2124   :  { %4573 = vpow2.f32 %v3770_v22 }
0x2127   :  { %v4568_v19 = vpop.eup %4567 }
0x2128   :  { %2836 = vrot.lane.b32.xlu0 %v4568_v19, %s4656_s27 }
0x212f   :  { %v4570_v20 = vpop.eup %4569 }
0x2130   :  { %2860 = vrot.lane.b32.xlu1 %v4570_v20, %s4656_s27  ;;  %v4572_v54 = vpop.eup %4571 }
0x2131   :  { %v2830_v23 = vadd.f32 1.0, %v4572_v54  ;;  %v4574_v24 = vpop.eup %4573 }
0x2132   :  { %v2854_v25 = vadd.f32 1.0, %v4574_v24 }
0x2133   :  { %4575 = vrcp.f32 %v2830_v23 }
0x2134   :  { %4577 = vrcp.f32 %v2854_v25 }
0x2140   :  { %v4576_v52 = vpop.eup %4575 }
0x2141   :  { %v4578_v44 = vpop.eup %4577  ;;  %v2834_v28 = vmul.f32 %v4576_v52, %v5343_v59 }
0x2142   :  { %v2858_v3 = vmul.f32 %v4578_v44, %v5347_v62 }
0x219a   :  { %v2837_v15 = vpop.permute.xlu0 %2836 }
0x219b   :  { %v2839_v26 = vmul.f32 %v4576_v52, %v2837_v15 }
0x219d   :  { %2841 = vrot.lane.b32.xlu0 %v2839_v26, %s4657_s28 }
0x21a2   :  { %v2861_v27 = vpop.permute.xlu1 %2860 }
0x21a3   :  { %v2863_v18 = vmul.f32 %v4578_v44, %v2861_v27 }
0x21a5   :  { %2865 = vrot.lane.b32.xlu1 %v2863_v18, %s4657_s28 }
0x220f   :  { %v2842_v29 = vpop.permute.xlu0 %2841 }
0x2210   :  { %v5385_v30 = vadd.f32 %v2842_v29, %v2834_v28 }
0x2212   :  { %4579 = vtanh.f32 %v5385_v30 }
0x2217   :  { %v2866_v5 = vpop.permute.xlu1 %2865 }
0x2218   :  { %v5389_v36 = vadd.f32 %v2866_v5, %v2858_v3 }
0x221a   :  { %4581 = vtanh.f32 %v5389_v36 }
0x221f   :  { %v4580_v6 = vpop.eup %4579 }
0x2220   :  { %2847 = vrot.lane.b32.xlu0 %v4580_v6, %s4656_s27 }
0x2227   :  { %v4582_v7 = vpop.eup %4581 }
0x2228   :  { %2871 = vrot.lane.b32.xlu1 %v4582_v7, %s4656_s27 }
0x2292   :  { %v2848_v37 = vpop.permute.xlu0 %2847 }
0x2293   :  { %v2850_v48 = vmul.f32 %v4576_v52, %v2848_v37 }
0x2295   :  { %2876 = vrot.lane.b32.xlu0 %v2850_v48, %s4657_s28 }
0x229a   :  { %v2872_v38 = vpop.permute.xlu1 %2871 }
0x229b   :  { %v2874_v39 = vmul.f32 %v4578_v44, %v2872_v38 }
0x229d   :  { %2882 = vrot.lane.b32.xlu1 %v2874_v39, %s4657_s28 }
0x2307   :  { %v2877_v42 = vpop.permute.xlu0 %2876 }
0x2308   :  { %2880 = vst.msk [vmem:[#allocation4 + $0x10] sm:$0xff] %vm292_vm3, %v2877_v42  ;;  %4292 = vmatmul.mubr.msk.f32.vlgmr.msra.gmra.mxu1 %vm292_vm3, %v2877_v42 }
0x2309   :  { %4306 = vmatpush3.msra.mxu1 %v5144_v32  ;;  %4313 = vmatprep.mubr.msk.f32.mxu1 %vm4655_vm2, %v4654_v2 }
0x230a   :  { %4307 = vmatprep.subr.mxu1 %v4654_v2 }
0x230b   :  { %4308 = vmatpush3.msra.mxu1 %v5149_v33 }
0x230c   :  { %4309 = vmatprep.subr.mxu1 %v4654_v2 }
0x230d   :  { %4310 = vmatpush3.msra.mxu1 %v5157_v34 }
0x230e   :  { %4311 = vmatprep.subr.mxu1 %v4654_v2 }
0x230f   :  { %v2883_v9 = vpop.permute.xlu1 %2882  ;;  %4312 = vmatpush3.msra.mxu1 %v5166_v35 }
0x2310   :  { %2886 = vst.msk [vmem:[#allocation5 + $0x10] sm:$0xff] %vm292_vm3, %v2883_v9  ;;  %4303 = vmatmul.mubr.msk.f32.vlgmr.msra.gmra.mxu0 %vm292_vm3, %v2883_v9 }
0x2311   :  { %4317 = vmatpush3.msra.mxu0 %v5144_v32  ;;  %4324 = vmatprep.mubr.msk.f32.mxu0 %vm4655_vm2, %v4654_v2 }
0x2312   :  { %4318 = vmatprep.subr.mxu0 %v4654_v2 }
0x2313   :  { %4319 = vmatpush3.msra.mxu0 %v5149_v33 }
0x2314   :  { %4320 = vmatprep.subr.mxu0 %v4654_v2 }
0x2315   :  { %4321 = vmatpush3.msra.mxu0 %v5157_v34 }
0x2316   :  { %4322 = vmatprep.subr.mxu0 %v4654_v2 }
0x2317   :  { %4323 = vmatpush3.msra.mxu0 %v5166_v35 }
0x23c8   :  { %v2955_v47 = vpop.f32.mrf.mxu1 }
0x23c9   :  { %v2956_v49 = vadd.f32 %v5208_v40, %v2955_v47  ;;  %v45_v47 = vld [vmem:[%s5606_s6 + $0x18] sm:$0xff] }
0x23ca   :  { %v4293_v50 = vpop.f32.mrf.mxu1  ;;  %4327 = vmatprep.subr.mxu1 %v45_v47  ;;  %4347 = vmatprep.subr.mxu0 %v45_v47 }
0x23cb   :  { %4583 = vtanh.f32 %v2956_v49  ;;  %v3773_v34 = vmul.f32 -1.442695, %v2956_v49  ;;  %v44_v49 = vld [vmem:[%s5606_s6 + $0x10] sm:$0xff]  ;;  %v43_v50 = vld [vmem:[%s5606_s6 + $0x8] sm:$0xff] }
0x23d0   :  { %v3027_v32 = vpop.f32.mrf.mxu0 }
0x23d1   :  { %v3028_v51 = vadd.f32 %v5208_v40, %v3027_v32  ;;  %v42_v32 = vld [vmem:[%s5606_s6] sm:$0xff] }
0x23d2   :  { %v4304_v41 = vpop.f32.mrf.mxu0 }
0x23d3   :  { %4585 = vtanh.f32 %v3028_v51  ;;  %v3774_v2 = vmul.f32 -1.442695, %v3028_v51 }
0x23d4   :  { %4587 = vpow2.f32 %v3773_v34 }
0x23d5   :  { %4589 = vpow2.f32 %v3774_v2 }
0x23d8   :  { %v4584_v53 = vpop.eup %4583 }
0x23d9   :  { %3040 = vrot.lane.b32.xlu0 %v4584_v53, %s4656_s27 }
0x23e0   :  { %v4586_v33 = vpop.eup %4585 }
0x23e1   :  { %3064 = vrot.lane.b32.xlu1 %v4586_v33, %s4656_s27  ;;  %v4588_v35 = vpop.eup %4587 }
0x23e2   :  { %v3034_v55 = vadd.f32 1.0, %v4588_v35  ;;  %v4590_v56 = vpop.eup %4589 }
0x23e3   :  { %v3058_v57 = vadd.f32 1.0, %v4590_v56  ;;  %v3295_v56 = vld [vmem:[#allocation4 + $0x10] sm:$0xff] }
0x23e4   :  { %4591 = vrcp.f32 %v3034_v55 }
0x23e5   :  { %4593 = vrcp.f32 %v3058_v57  ;;  %v3296_v57 = vld [vmem:[#allocation4 + $0x18] sm:$0xff] }
0x23f1   :  { %v4592_v58 = vpop.eup %4591 }
0x23f2   :  { %v4594_v61 = vpop.eup %4593  ;;  %v3038_v0 = vmul.f32 %v4592_v58, %v5385_v30 }
0x23f3   :  { %v3062_v8 = vmul.f32 %v4594_v61, %v5389_v36 }
0x244b   :  { %v3041_v59 = vpop.permute.xlu0 %3040 }
0x244c   :  { %v3043_v60 = vmul.f32 %v4592_v58, %v3041_v59 }
0x244e   :  { %3045 = vrot.lane.b32.xlu0 %v3043_v60, %s4657_s28 }
0x2453   :  { %v3065_v62 = vpop.permute.xlu1 %3064 }
0x2454   :  { %v3067_v63 = vmul.f32 %v4594_v61, %v3065_v62  ;;  %v3438_v62 = vld [vmem:[#allocation5 + $0x10] sm:$0xff] }
0x2456   :  { %3069 = vrot.lane.b32.xlu1 %v3067_v63, %s4657_s28  ;;  %v3299_v63 = vld [vmem:[#allocation4 + $0x30] sm:$0xff] }
0x24c0   :  { %v3046_v1 = vpop.permute.xlu0 %3045 }
0x24c1   :  { %v3048_v4 = vadd.f32 %v3046_v1, %v3038_v0  ;;  %v3439_v0 = vld [vmem:[#allocation5 + $0x18] sm:$0xff] }
0x24c2   :  { %v3300_v1 = vld [vmem:[#allocation4 + $0x38] sm:$0xff] }
0x24c3   :  { %4595 = vtanh.f32 %v3048_v4 }
0x24c8   :  { %v3070_v46 = vpop.permute.xlu1 %3069 }
0x24c9   :  { %v3072_v10 = vadd.f32 %v3070_v46, %v3062_v8  ;;  %v3441_v8 = vld [vmem:[#allocation5 + $0x28] sm:$0xff]  ;;  %v3442_v46 = vld [vmem:[#allocation5 + $0x30] sm:$0xff] }
0x24cb   :  { %4597 = vtanh.f32 %v3072_v10 }
0x24d0   :  { %v4596_v11 = vpop.eup %4595 }
0x24d1   :  { %3051 = vrot.lane.b32.xlu0 %v4596_v11, %s4656_s27  ;;  %v5477_v11 = vld [vmem:[%s5607_s7] ss:$0 sm:$0xff] }
0x24d8   :  { %v4598_v12 = vpop.eup %4597 }
0x24d9   :  { %3075 = vrot.lane.b32.xlu1 %v4598_v12, %s4656_s27 }
0x2543   :  { %v3052_v13 = vpop.permute.xlu0 %3051 }
0x2544   :  { %v3054_v45 = vmul.f32 %v4592_v58, %v3052_v13  ;;  %v3297_v58 = vld [vmem:[#allocation4 + $0x20] sm:$0xff]  ;;  %v4616_v13 = vld [vmem:[%s5600_s0 + $0x10] sm:$0xff] }
0x2546   :  { %3080 = vrot.lane.b32.xlu0 %v3054_v45, %s4657_s28  ;;  %v3584_v45 = vmul.f32 %v4616_v13, %v4616_v13 }
0x254b   :  { %v3076_v14 = vpop.permute.xlu1 %3075 }
0x254c   :  { %v3078_v16 = vmul.f32 %v4594_v61, %v3076_v14  ;;  %v3298_v61 = vld [vmem:[#allocation4 + $0x28] sm:$0xff] }
0x254e   :  { %3086 = vrot.lane.b32.xlu1 %v3078_v16, %s4657_s28 }
0x25b8   :  { %v3081_v17 = vpop.permute.xlu0 %3080 }
0x25b9   :  { %3084 = vst.msk [vmem:[#allocation4 + $0x8] sm:$0xff] %vm292_vm3, %v3081_v17  ;;  %4314 = vmatmul.mubr.msk.f32.vlgmr.msra.gmra.mxu1 %vm292_vm3, %v3081_v17  ;;  %v4617_v17 = vld [vmem:[%s5600_s0] sm:$0xff] }
0x25ba   :  { %4328 = vmatpush3.msra.mxu1 %v45_v47 }
0x25bb   :  { %4329 = vmatprep.subr.mxu1 %v44_v49 }
0x25bc   :  { %4330 = vmatpush3.msra.mxu1 %v44_v49 }
0x25bd   :  { %4331 = vmatprep.subr.mxu1 %v43_v50 }
0x25be   :  { %4332 = vmatpush3.msra.mxu1 %v43_v50 }
0x25bf   :  { %4333 = vmatprep.subr.mxu1 %v42_v32 }
0x25c0   :  { %v3087_v19 = vpop.permute.xlu1 %3086  ;;  %4334 = vmatpush3.msra.mxu1 %v42_v32  ;;  %v3294_v55 = vld [vmem:[#allocation4 + $0x8] sm:$0xff] }
0x25c1   :  { %3090 = vst.msk [vmem:[#allocation5 + $0x8] sm:$0xff] %vm292_vm3, %v3087_v19  ;;  %4325 = vmatmul.mubr.msk.f32.vlgmr.msra.gmra.mxu0 %vm292_vm3, %v3087_v19  ;;  %v3583_v19 = vmul.f32 %v4617_v17, %v4617_v17 }
0x25c2   :  { %4348 = vmatpush3.msra.mxu0 %v45_v47 }
0x25c3   :  { %4349 = vmatprep.subr.mxu0 %v44_v49 }
0x25c4   :  { %4350 = vmatpush3.msra.mxu0 %v44_v49 }
0x25c5   :  { %4351 = vmatprep.subr.mxu0 %v43_v50 }
0x25c6   :  { %4352 = vmatpush3.msra.mxu0 %v43_v50 }
0x25c7   :  { %4353 = vmatprep.subr.mxu0 %v42_v32 }
0x25c8   :  { %4354 = vmatpush3.msra.mxu0 %v42_v32  ;;  %v3437_v60 = vld [vmem:[#allocation5 + $0x8] sm:$0xff]  ;;  %v4627_v32 = vld [vmem:[%s5600_s0 + $0x58] sm:$0xff] }
0x2679   :  { %v3159_v20 = vpop.f32.mrf.mxu1 }
0x267a   :  { %v3160_v21 = vadd.f32 %v5208_v40, %v3159_v20 }
0x267b   :  { %v4315_v22 = vpop.f32.mrf.mxu1 }
0x267c   :  { %4599 = vtanh.f32 %v3160_v21  ;;  %v3777_v15 = vmul.f32 -1.442695, %v3160_v21 }
0x2681   :  { %v3231_v54 = vpop.f32.mrf.mxu0 }
0x2682   :  { %v3232_v23 = vadd.f32 %v5208_v40, %v3231_v54  ;;  %v4618_v54 = vld [vmem:[%s5600_s0 + $0x30] sm:$0xff] }
0x2683   :  { %v4326_v24 = vpop.f32.mrf.mxu0 }
0x2684   :  { %4601 = vtanh.f32 %v3232_v23  ;;  %v3778_v26 = vmul.f32 -1.442695, %v3232_v23  ;;  %v3586_v23 = vmul.f32 %v4618_v54, %v4618_v54 }
0x2685   :  { %4603 = vpow2.f32 %v3777_v15  ;;  %v4619_v15 = vld [vmem:[%s5600_s0 + $0x8] sm:$0xff] }
0x2686   :  { %4605 = vpow2.f32 %v3778_v26  ;;  %v5494_v26 = vmul.f32 %v4619_v15, %v4619_v15 }
0x2689   :  { %v4600_v25 = vpop.eup %4599 }
0x268a   :  { %3244 = vrot.lane.b32.xlu0 %v4600_v25, %s4656_s27 }
0x2691   :  { %v4602_v52 = vpop.eup %4601 }
0x2692   :  { %3268 = vrot.lane.b32.xlu1 %v4602_v52, %s4656_s27  ;;  %v4604_v44 = vpop.eup %4603 }
0x2693   :  { %v3238_v27 = vadd.f32 1.0, %v4604_v44  ;;  %v4606_v18 = vpop.eup %4605  ;;  %v4620_v44 = vld [vmem:[%s5600_s0 + $0x18] sm:$0xff] }
0x2694   :  { %v3262_v28 = vadd.f32 1.0, %v4606_v18  ;;  %v4621_v18 = vld [vmem:[%s5600_s0 + $0x20] sm:$0xff] }
0x2695   :  { %4607 = vrcp.f32 %v3238_v27  ;;  %v3634_v27 = vmul.f32 %v4620_v44, %v4620_v44 }
0x2696   :  { %4609 = vrcp.f32 %v3262_v28  ;;  %v3585_v28 = vmul.f32 %v4621_v18, %v4621_v18 }
0x26a2   :  { %v4608_v29 = vpop.eup %4607 }
0x26a3   :  { %v4610_v3 = vpop.eup %4609  ;;  %v3242_v6 = vmul.f32 %v4608_v29, %v3048_v4  ;;  %v3440_v4 = vld [vmem:[#allocation5 + $0x20] sm:$0xff] }
0x26a4   :  { %v3266_v48 = vmul.f32 %v4610_v3, %v3072_v10  ;;  %v3443_v10 = vld [vmem:[#allocation5 + $0x38] sm:$0xff] }
0x26fc   :  { %v3245_v40 = vpop.permute.xlu0 %3244 }
0x26fd   :  { %v3247_v30 = vmul.f32 %v4608_v29, %v3245_v40 }
0x26ff   :  { %3249 = vrot.lane.b32.xlu0 %v3247_v30, %s4657_s28 }
0x2704   :  { %v3269_v5 = vpop.permute.xlu1 %3268 }
0x2705   :  { %v3271_v36 = vmul.f32 %v4610_v3, %v3269_v5 }
0x2707   :  { %3273 = vrot.lane.b32.xlu1 %v3271_v36, %s4657_s28 }
0x2771   :  { %v3250_v7 = vpop.permute.xlu0 %3249 }
0x2772   :  { %v3252_v37 = vadd.f32 %v3250_v7, %v3242_v6  ;;  %v4623_v7 = vld [vmem:[%s5600_s0 + $0x38] sm:$0xff] }
0x2774   :  { %4611 = vtanh.f32 %v3252_v37  ;;  %v5511_v37 = vmul.f32 %v4623_v7, %v4623_v7 }
0x2779   :  { %v3274_v38 = vpop.permute.xlu1 %3273 }
0x277a   :  { %v3276_v39 = vadd.f32 %v3274_v38, %v3266_v48  ;;  %v4624_v48 = vld [vmem:[%s5600_s0 + $0x40] sm:$0xff] }
0x277b   :  { %v3587_v38 = vmul.f32 %v4624_v48, %v4624_v48 }
0x277c   :  { %4613 = vtanh.f32 %v3276_v39  ;;  %v4625_v39 = vld [vmem:[%s5600_s0 + $0x48] sm:$0xff] }
0x2781   :  { %v4612_v42 = vpop.eup %4611 }
0x2782   :  { %3255 = vrot.lane.b32.xlu0 %v4612_v42, %s4656_s27  ;;  %v5519_v42 = vmul.f32 %v4625_v39, %v4625_v39 }
0x2789   :  { %v4614_v9 = vpop.eup %4613 }
0x278a   :  { %3279 = vrot.lane.b32.xlu1 %v4614_v9, %s4656_s27  ;;  %v4626_v9 = vld [vmem:[%s5600_s0 + $0x50] sm:$0xff] }
0x278b   :  { %v3588_v47 = vmul.f32 %v4626_v9, %v4626_v9 }
0x27f4   :  { %v3256_v51 = vpop.permute.xlu0 %3255 }
0x27f5   :  { %v3258_v41 = vmul.f32 %v4608_v29, %v3256_v51  ;;  %v4622_v29 = vld [vmem:[%s5600_s0 + $0x28] sm:$0xff]  ;;  %v5527_v51 = vmul.f32 %v4627_v32, %v4627_v32 }
0x27f6   :  { %v5505_v40 = vmul.f32 %v4622_v29, %v4622_v29 }
0x27f7   :  { %3284 = vrot.lane.b32.xlu0 %v3258_v41, %s4657_s28 }
0x27fc   :  { %v3280_v53 = vpop.permute.xlu1 %3279 }
0x27fd   :  { %v3282_v33 = vmul.f32 %v4610_v3, %v3280_v53 }
0x27ff   :  { %3289 = vrot.lane.b32.xlu1 %v3282_v33, %s4657_s28 }
0x2869   :  { %v3285_v34 = vpop.permute.xlu0 %3284 }
0x286a   :  { %3287 = vst.msk [vmem:[#allocation4] sm:$0xff] %vm292_vm3, %v3285_v34  ;;  %v4628_v34 = vld [vmem:[%s5600_s0 + $0x70] sm:$0xff] }
0x2871   :  { %v3290_v2 = vpop.permute.xlu1 %3289  ;;  %v3293_v35 = vld [vmem:[#allocation4] sm:$0xff] }
0x2872   :  { %3292 = vst.msk [vmem:[#allocation5] sm:$0xff] %vm292_vm3, %v3290_v2  ;;  %4335 = vmatprep.mubr.msk.f32.mxu1 %vm292_vm3, %v3293_v35  ;;  %v5532_v2 = vmul.f32 %v4628_v34, %v4628_v34 }
0x2873   :  { %4336 = vmatmul.mubr.msk.f32.vlgmr.msra.gmra.mxu1 %vm292_vm3, %v3294_v55 }
0x2874   :  { %4338 = vmatprep.mubr.msk.f32.mxu1 %vm292_vm3, %v3295_v56 }
0x2877   :  { %4339 = vmatmul.mubr.msk.f32.gmra.mxu1 %vm292_vm3, %v3296_v57 }
0x2878   :  { %4341 = vmatprep.mubr.msk.f32.mxu1 %vm292_vm3, %v3297_v58 }
0x2879   :  { %v3436_v59 = vld [vmem:[#allocation5] sm:$0xff] }
0x287a   :  { %4355 = vmatprep.mubr.msk.f32.mxu0 %vm292_vm3, %v3436_v59 }
0x287b   :  { %4356 = vmatmul.mubr.msk.f32.vlgmr.msra.gmra.mxu0 %vm292_vm3, %v3437_v60  ;;  %4342 = vmatmul.mubr.msk.f32.gmra.mxu1 %vm292_vm3, %v3298_v61 }
0x287c   :  { %4358 = vmatprep.mubr.msk.f32.mxu0 %vm292_vm3, %v3438_v62  ;;  %4344 = vmatprep.mubr.msk.f32.mxu1 %vm292_vm3, %v3299_v63 }
0x287f   :  { %4359 = vmatmul.mubr.msk.f32.gmra.mxu0 %vm292_vm3, %v3439_v0  ;;  %4345 = vmatmul.mubr.msk.f32.gmra.mxu1 %vm292_vm3, %v3300_v1 }
0x2880   :  { %4361 = vmatprep.mubr.msk.f32.mxu0 %vm292_vm3, %v3440_v4 }
0x2883   :  { %4362 = vmatmul.mubr.msk.f32.gmra.mxu0 %vm292_vm3, %v3441_v8 }
0x2884   :  { %4364 = vmatprep.mubr.msk.f32.mxu0 %vm292_vm3, %v3442_v46 }
0x2887   :  { %4365 = vmatmul.mubr.msk.f32.gmra.mxu0 %vm292_vm3, %v3443_v10 }
0x2933   :  { %v4337_v12 = vpop.f32.mrf.mxu1 }
0x2934   :  { %v3403_v14 = vadd.f32 %v4337_v12, %v5477_v11 }
0x2935   :  { %v3397_v16 = vpop.f32.mrf.mxu1 }
0x2936   :  { %v3576_v20 = vmul.f32 %v3403_v14, %v3403_v14  ;;  %v3398_v21 = vadd.f32 %v5477_v11, %v3397_v16 }
0x2937   :  { %v4340_v22 = vpop.f32.mrf.mxu1 }
0x2938   :  { %v3592_v24 = vsub.f32 %v3576_v20, %v3584_v45  ;;  %v3575_v25 = vmul.f32 %v3398_v21, %v3398_v21  ;;  %v3413_v52 = vadd.f32 %v4340_v22, %v5477_v11 }
0x2939   :  { %v3407_v30 = vpop.f32.mrf.mxu1 }
0x293a   :  { %v3600_v3 = vand.u32 2147483647, %v3592_v24  ;;  %v3591_v5 = vsub.f32 %v3575_v25, %v3583_v19  ;;  %v3578_v36 = vmul.f32 %v3413_v52, %v3413_v52  ;;  %v3408_v6 = vadd.f32 %v5477_v11, %v3407_v30 }
0x293b   :  { %v4357_v49 = vpop.f32.mrf.mxu0  ;;  %v4343_v50 = vpop.f32.mrf.mxu1 }
0x293c   :  { %v3599_v41 = vand.u32 2147483647, %v3591_v5  ;;  %v3594_v53 = vsub.f32 %v3578_v36, %v3586_v23  ;;  %v3577_v33 = vmul.f32 %v3408_v6, %v3408_v6  ;;  %v3608_v35 = vsel %vm77_vm1, %v3600_v3, 0.0  ;;  %v4630_v5 = vld [vmem:[%s5600_s0 + $0x68] sm:$0xff] }
0x293d   :  { %v3540_v55 = vadd.f32 %v4357_v49, %v5477_v11  ;;  %v3423_v56 = vadd.f32 %v4343_v50, %v5477_v11  ;;  %v3534_v57 = vpop.f32.mrf.mxu0  ;;  %v3417_v58 = vpop.f32.mrf.mxu1  ;;  %v3639_v36 = vmul.f32 %v4630_v5, %v4630_v5 }
0x293e   :  { %v3607_v59 = vsel %vm77_vm1, %v3599_v41, 0.0  ;;  %v3602_v60 = vand.u32 2147483647, %v3594_v53  ;;  %v3593_v61 = vsub.f32 %v3577_v33, %v3585_v28  ;;  %v3535_v62 = vadd.f32 %v5477_v11, %v3534_v57 }
0x293f   :  { %v3609_v63 = vadd.f32 %v3608_v35, %v3607_v59  ;;  %v3626_v0 = vmul.f32 %v3540_v55, %v3540_v55  ;;  %v3580_v1 = vmul.f32 %v3423_v56, %v3423_v56  ;;  %v3418_v4 = vadd.f32 %v5477_v11, %v3417_v58  ;;  %v4360_v8 = vpop.f32.mrf.mxu0  ;;  %v4346_v46 = vpop.f32.mrf.mxu1  ;;  %v4631_v59 = vld [vmem:[%s5600_s0 + $0x78] sm:$0xff] }
0x2940   :  { %v3612_v10 = vsel %vm77_vm1, %v3602_v60, 0.0  ;;  %v3601_v12 = vand.u32 2147483647, %v3593_v61  ;;  %v3625_v13 = vmul.f32 %v3535_v62, %v3535_v62  ;;  %v3550_v45 = vadd.f32 %v4360_v8, %v5477_v11 }
0x2941   :  { %v3642_v14 = vsub.f32 %v3626_v0, %v3634_v27  ;;  %v3596_v16 = vsub.f32 %v3580_v1, %v3588_v47  ;;  %v3579_v17 = vmul.f32 %v3418_v4, %v3418_v4  ;;  %v3433_v19 = vadd.f32 %v4346_v46, %v5477_v11  ;;  %v3544_v20 = vpop.f32.mrf.mxu0  ;;  %v3427_v30 = vpop.f32.mrf.mxu1 }
0x2942   :  { %v3610_v21 = vsel %vm77_vm1, %v3601_v12, 0.0  ;;  %v3641_v22 = vsub.f32 %v3625_v13, %v5494_v26  ;;  %v3628_v54 = vmul.f32 %v3550_v45, %v3550_v45  ;;  %v3545_v23 = vadd.f32 %v5477_v11, %v3544_v20  ;;  %v4629_v26 = vld [vmem:[%s5600_s0 + $0x60] sm:$0xff]  ;;  %s4658_s0 = smov 96  }
0x2943   :  { %v3611_v24 = vadd.f32 %v3610_v21, %v3609_v63  ;;  %v3650_v25 = vand.u32 2147483647, %v3642_v14  ;;  %v3604_v52 = vand.u32 2147483647, %v3596_v16  ;;  %v3595_v15 = vsub.f32 %v3579_v17, %v3587_v38  ;;  %3573 = vst.msk [vmem:[%s5609_s9] sm:$0xff] %vm77_vm1, %v3433_v19  ;;  %v4363_v44 = vpop.f32.mrf.mxu0 }
0x2944   :  { %v3649_v27 = vand.u32 2147483647, %v3641_v22  ;;  %v3644_v18 = vsub.f32 %v3628_v54, %v5511_v37  ;;  %v3582_v28 = vmul.f32 %v3433_v19, %v3433_v19  ;;  %v3627_v29 = vmul.f32 %v3545_v23, %v3545_v23 }
0x2945   :  { %v3589_v3 = vmul.f32 %v4629_v26, %v4629_v26  ;;  %v3603_v6 = vand.u32 2147483647, %v3595_v15  ;;  %v3613_v7 = vadd.f32 %v3612_v10, %v3611_v24  ;;  %v3554_v48 = vpop.f32.mrf.mxu0  ;;  %v3658_v38 = vsel %vm77_vm1, %v3650_v25, 0.0 }
0x2946   :  { %v3616_v37 = vsel %vm77_vm1, %v3604_v52, 0.0  ;;  %v3657_v39 = vsel %vm77_vm1, %v3649_v27, 0.0  ;;  %v3643_v9 = vsub.f32 %v3627_v29, %v5505_v40  ;;  %v3428_v50 = vadd.f32 %v5477_v11, %v3427_v30 }
0x2947   :  { %v3659_v47 = vadd.f32 %v3658_v38, %v3657_v39  ;;  %v3614_v49 = vsel %vm77_vm1, %v3603_v6, 0.0  ;;  %v3560_v32 = vadd.f32 %v4363_v44, %v5477_v11  ;;  %v4366_v41 = vpop.f32.mrf.mxu0  ;;  %v3652_v33 = vand.u32 2147483647, %v3644_v18 }
0x2948   :  { %v3615_v53 = vadd.f32 %v3614_v49, %v3613_v7  ;;  %v3598_v34 = vsub.f32 %v3582_v28, %v5532_v2  ;;  %v3651_v35 = vand.u32 2147483647, %v3643_v9  ;;  %v3581_v55 = vmul.f32 %v3428_v50, %v3428_v50 }
0x2949   :  { %v3630_v56 = vmul.f32 %v3560_v32, %v3560_v32  ;;  %v3555_v57 = vadd.f32 %v5477_v11, %v3554_v48  ;;  %v3570_v58 = vadd.f32 %v4366_v41, %v5477_v11  ;;  %v3564_v40 = vpop.f32.mrf.mxu0  ;;  %v3640_v60 = vmul.f32 %v4631_v59, %v4631_v59 }
0x294a   :  { %v3660_v61 = vsel %vm77_vm1, %v3651_v35, 0.0  ;;  %v3565_v62 = vadd.f32 %v5477_v11, %v3564_v40  ;;  %v3617_v63 = vadd.f32 %v3616_v37, %v3615_v53  ;;  %v3597_v2 = vsub.f32 %v3581_v55, %v3589_v3 }
0x294b   :  { %v3661_v0 = vadd.f32 %v3660_v61, %v3659_v47  ;;  %v3646_v1 = vsub.f32 %v3630_v56, %v5527_v51  ;;  %v3629_v4 = vmul.f32 %v3555_v57, %v3555_v57  ;;  %3574 = vst.msk [vmem:[%s5609_s9 + $0x8] sm:$0xff] %vm77_vm1, %v3570_v58  ;;  %v3662_v8 = vsel %vm77_vm1, %v3652_v33, 0.0 }
0x294c   :  { %v3632_v46 = vmul.f32 %v3570_v58, %v3570_v58  ;;  %v3631_v10 = vmul.f32 %v3565_v62, %v3565_v62  ;;  %v3606_v12 = vand.u32 2147483647, %v3598_v34  ;;  %v3605_v13 = vand.u32 2147483647, %v3597_v2 }
0x294d   :  { %v3645_v45 = vsub.f32 %v3629_v4, %v5519_v42  ;;  %v3663_v11 = vadd.f32 %v3662_v8, %v3661_v0  ;;  %v3654_v17 = vand.u32 2147483647, %v3646_v1 }
0x294e   :  { %v3647_v14 = vsub.f32 %v3631_v10, %v3639_v36  ;;  %v3618_v16 = vsel %vm77_vm1, %v3605_v13, 0.0  ;;  %v3648_v19 = vsub.f32 %v3632_v46, %v3640_v60  ;;  %v3620_v54 = vsel %vm77_vm1, %v3606_v12, 0.0 }
0x294f   :  { %v3653_v51 = vand.u32 2147483647, %v3645_v45  ;;  %v3619_v21 = vadd.f32 %v3618_v16, %v3617_v63  ;;  %v3666_v25 = vsel %vm77_vm1, %v3654_v17, 0.0 }
0x2950   :  { %v3655_v20 = vand.u32 2147483647, %v3647_v14  ;;  %v3656_v52 = vand.u32 2147483647, %v3648_v19 }
0x2951   :  { %v3664_v22 = vsel %vm77_vm1, %v3653_v51, 0.0  ;;  %v3621_v24 = vadd.f32 %v3620_v54, %v3619_v21 }
0x2952   :  { %v3665_v23 = vadd.f32 %v3664_v22, %v3663_v11  ;;  %v3668_v42 = vsel %vm77_vm1, %v3655_v20, 0.0  ;;  %v3670_v18 = vsel %vm77_vm1, %v3656_v52, 0.0 }
0x2953   :  { %v3622_v15 = vsel %vm77_vm1, %v3621_v24, 0.0 }
0x2954   :  { %v3667_v44 = vadd.f32 %v3666_v25, %v3665_v23  ;;  %3623 = vadd.xlane.f32.xlu0 %v3622_v15 }
0x2956   :  { %v3669_v27 = vadd.f32 %v3668_v42, %v3667_v44 }
0x2958   :  { %v3671_v28 = vadd.f32 %v3670_v18, %v3669_v27 }
0x295a   :  { %v3672_v29 = vsel %vm77_vm1, %v3671_v28, 0.0 }
0x295b   :  { %3673 = vadd.xlane.f32.xlu1 %v3672_v29 }
0x296a   :  { %1846 = vrot.lane.b32.xlu0 %v5135_v43, %s4658_s0 }
0x296c   :  { %1851 = vrot.lane.b32.xlu1 %v5138_v31, %s4658_s0 }
0x29dd   :  { %v3624_v30 = vpop.xlane.xlu0 %3623 }
0x29de   :  { %3676 = vst.msk [vmem:[%s5610_s10] sm:$0xff] %vm3675_vm4, %v3624_v30 }
0x29e1   :  { %v1847_v26 = vpop.permute.xlu0 %1846 }
0x29e2   :  { %1849 = vst.msk [vmem:[#allocation6] sm:$0xff] %vm292_vm3, %v1847_v26 }
0x29e4   :  { %v3674_v3 = vpop.xlane.xlu1 %3673 }
0x29e5   :  { %3677 = vst.msk [vmem:[%s5610_s10 + $0x8] sm:$0xff] %vm3675_vm4, %v3674_v3 }
0x29e8   :  { %v1852_v43 = vpop.permute.xlu1 %1851 }
0x29e9   :  { %1854 = vst.msk [vmem:[#allocation6 + $0x8] sm:$0xff] %vm292_vm3, %v1852_v43 }
0x29ea   :  { %4643 = shalt.err (!%p4640_p4)
}
0x29eb   :  { %s4660_s4 = smov 128   ;;  %s4661_s25 = smov 8  }
0x29ec   :  { %3689 = dma.vmem_to_hbm [thread:$0]  %s3684_s21, 256, %s5608_s8, [#allocation7], %s4660_s4, %s4660_s4, %s4661_s25  }
0x29ed   :  { %4652 = dma.done.wait [#allocation7], 256  }
0x29ee   :  { %4653 = vsyncadd [#allocation7], 4294967040 }
0x29ef   :  { %3701 = vsyncpa [#allocation7], 1 }

</bundles_post_ra>
